<compile_context>
chip_gen: v5e
topology: v5e:2x2
jax: 0.10.0
libtpu: 0.0.40
codegen_flags: <defaults>
</compile_context>

<pallas_src>
from functools import partial

import numpy as np

import jax
import jax.numpy as jnp
from jax.experimental import pallas as pl
from jax.experimental.pallas import tpu as pltpu

LANE = 128             # vreg lane width
SUB_ROWS = 64          # compute chunk: 64 rows x 128 lanes = 8 f32 vregs
MAX_BLOCK_ROWS = 2048  # DMA tile cap: 2048 x 128 f32 = 1 MiB per buffer


def _round_up(a, b):
    return ((a + b - 1) // b) * b


def _choose_tiling(n):
    """Pick (rows_padded, block_rows, num_tiles, total_chunks) for n scalar inputs."""
    rows = _round_up(max(pl.cdiv(n, LANE), 1), SUB_ROWS)
    total_chunks = rows // SUB_ROWS
    num_tiles = pl.cdiv(rows, MAX_BLOCK_ROWS)
    if total_chunks >= 2:
        # Keep the "parallel" grid axis >= 2 and even so both v7x TensorCores get work.
        num_tiles = max(num_tiles, 2)
        if num_tiles % 2:
            num_tiles += 1
    block_rows = _round_up(pl.cdiv(rows, num_tiles), SUB_ROWS)
    num_tiles = pl.cdiv(rows, block_rows)
    rows_padded = num_tiles * block_rows       # tiny HBM-only pad; never computed on
    return rows_padded, block_rows, num_tiles, total_chunks


def _build_kernel(n_pos, hidden, chunks_per_tile, total_chunks):
    """Kernel over one (block_rows, 128) tile; all loop bounds are static Python ints."""

    def kernel(x_ref, a_ref, c_ref, b2_ref, o_ref):
        tile = pl.program_id(0)
        # Number of valid 64-row chunks in this tile (last tile may be partial).
        chunks_here = jnp.minimum(chunks_per_tile,
                                  total_chunks - tile * chunks_per_tile)
        b2 = b2_ref[0]  # hoist scalar SMEM read out of all loops

        @pl.loop(0, chunks_per_tile)
        def _(ci):
            @pl.when(ci < chunks_here)
            def _():
                r0 = pl.multiple_of(ci * SUB_ROWS, SUB_ROWS)
                x = x_ref[pl.ds(r0, SUB_ROWS), :]
                acc0 = jnp.full_like(x, b2)            # fold b2 into the init

                def pos_body(h, acc):                  # w2[h] >= 0 units
                    return acc + jnp.maximum(x * a_ref[h] + c_ref[h], 0.0)

                def neg_body(h, acc):                  # w2[h] < 0 units
                    return acc + jnp.minimum(x * a_ref[h] + c_ref[h], 0.0)

                acc = jax.lax.fori_loop(0, n_pos, pos_body, acc0, unroll=True)
                acc = jax.lax.fori_loop(n_pos, hidden, neg_body, acc, unroll=True)
                o_ref[pl.ds(r0, SUB_ROWS), :] = acc

    return kernel


def prepare_params(w1, b1, w2, b2):
    """Host-side (eager) param prep: fold w2 into coefficients and partition by sign."""
    w1 = np.asarray(w1, np.float32)
    b1 = np.asarray(b1, np.float32)
    w2 = np.asarray(w2, np.float32)
    b2 = np.asarray(b2, np.float32).reshape(1)
    a = w1 * w2
    c = b1 * w2
    pos = w2 >= 0.0
    order = np.argsort(~pos, kind="stable")   # positive-w2 units first
    n_pos = int(pos.sum())
    return jnp.asarray(a[order]), jnp.asarray(c[order]), jnp.asarray(b2), n_pos


@partial(jax.jit, static_argnames=("n_pos",))
def _forward_prepared(x, a, c, b2, *, n_pos):
    N = x.shape[0]
    xf = x.reshape(-1).astype(jnp.float32)
    n = xf.shape[0]

    rows_padded, block_rows, num_tiles, total_chunks = _choose_tiling(n)
    pad = rows_padded * LANE - n
    if pad:
        xf = jnp.pad(xf, (0, pad))
    x2 = xf.reshape(rows_padded, LANE)

    hidden = a.shape[0]
    chunks_per_tile = block_rows // SUB_ROWS
    kernel = _build_kernel(n_pos, hidden, chunks_per_tile, total_chunks)

    out2 = pl.pallas_call(
        kernel,
        out_shape=jax.ShapeDtypeStruct((rows_padded, LANE), jnp.float32),
        grid=(num_tiles,),
        in_specs=[
            pl.BlockSpec((block_rows, LANE), lambda i: (i, 0)),    # x tile (pipelined)
            pl.BlockSpec(memory_space=pltpu.MemorySpace.SMEM),     # a = w1*w2 (sorted)
            pl.BlockSpec(memory_space=pltpu.MemorySpace.SMEM),     # c = b1*w2 (sorted)
            pl.BlockSpec(memory_space=pltpu.MemorySpace.SMEM),     # b2
        ],
        out_specs=pl.BlockSpec((block_rows, LANE), lambda i: (i, 0)),
        compiler_params=pltpu.CompilerParams(
            dimension_semantics=("parallel",)),
    )(x2, a, c, b2)

    # Slice off the lane/row padding and restore the (N, 1) PyTorch layout.
    return out2.reshape(-1)[:N].reshape(N, 1)


def nonlin_reg_forward(x, w1, b1, w2, b2):
    """x: (N, 1) f32; w1, b1, w2: (H,) f32; b2: (1,) f32 (squeezed nn.Linear params)."""
    a, c, b2p, n_pos = prepare_params(w1, b1, w2, b2)
    return _forward_prepared(x, a, c, b2p, n_pos=n_pos)


def init_params(key, hidden=64):
    # PyTorch nn.Linear default init, stored squeezed:
    #   layer1.weight (64,1) -> w1 (64,), layer1.bias (64,) -> b1 (64,)
    #   layer2.weight (1,64) -> w2 (64,), layer2.bias (1,)  -> b2 (1,)
    k1, k2, k3, k4 = jax.random.split(key, 4)
    bound1 = 1.0                                   # 1/sqrt(fan_in=1)
    bound2 = 1.0 / jnp.sqrt(float(hidden))         # 1/sqrt(fan_in=64)
    w1 = jax.random.uniform(k1, (hidden,), jnp.float32, -bound1, bound1)
    b1 = jax.random.uniform(k2, (hidden,), jnp.float32, -bound1, bound1)
    w2 = jax.random.uniform(k3, (hidden,), jnp.float32, -bound2, bound2)
    b2 = jax.random.uniform(k4, (1,), jnp.float32, -bound2, bound2)
    return w1, b1, w2, b2


def _ref_fn(x, w1, b1, w2, b2):
    # Plain-JAX reference, same math as the PyTorch forward.
    h = jnp.maximum(x @ w1.reshape(1, -1) + b1.reshape(1, -1), 0.0)
    return h @ w2.reshape(-1, 1) + b2.reshape(1, 1)


if __name__ == "__main__":
    key = jax.random.PRNGKey(0)
    kx, kp = jax.random.split(key)
    w1, b1, w2, b2 = init_params(kp, hidden=64)

    # Small demo shape consistent with the module: a batch of scalar inputs (N, 1).
    x_small = jax.random.normal(kx, (8, 1), jnp.float32)
    out_small = jax.block_until_ready(nonlin_reg_forward(x_small, w1, b1, w2, b2))
    assert out_small.shape == (8, 1)
    assert jnp.allclose(out_small, _ref_fn(x_small, w1, b1, w2, b2),
                        atol=1e-4, rtol=1e-4), "mismatch (small)"

    # Larger batch exercising the multi-tile, partial-last-tile, parallel-grid path.
    x_big = jax.random.normal(jax.random.PRNGKey(1), (70_000, 1), jnp.float32)
    out_big = jax.block_until_ready(nonlin_reg_forward(x_big, w1, b1, w2, b2))
    assert out_big.shape == (70_000, 1)
    assert jnp.allclose(out_big, _ref_fn(x_big, w1, b1, w2, b2),
                        atol=1e-4, rtol=1e-4), "mismatch (big)"

    print("KERNEL_OK")
</pallas_src>

<mosaic_0001>
module attributes {stable_mosaic.version = 11 : i64} {
  func.func @kernel(%arg0: i32, %arg1: memref<64x128xf32, #tpu.memory_space<vmem>>, %arg2: memref<64xf32, #tpu.memory_space<smem>>, %arg3: memref<64xf32, #tpu.memory_space<smem>>, %arg4: memref<1xf32, #tpu.memory_space<smem>>, %arg5: memref<64x128xf32, #tpu.memory_space<vmem>>) attributes {dimension_semantics = [#tpu.dimension_semantics<parallel>], iteration_bounds = array<i64: 1>, scalar_prefetch = 0 : i64, scratch_operands = 0 : i64, tpu.core_type = #tpu.core_type<tc>, window_params = [{transform_indices = @transform_0, window_bounds = array<i64: 64, 128>}, {transform_indices = @transform_1, window_bounds = array<i64: 64>}, {transform_indices = @transform_2, window_bounds = array<i64: 64>}, {transform_indices = @transform_3, window_bounds = array<i64: 1>}, {transform_indices = @transform_4, window_bounds = array<i64: 64, 128>}]} {
    %c1_i32 = arith.constant 1 : i32
    %0 = arith.muli %arg0, %c1_i32 : i32
    %c1_i32_0 = arith.constant 1 : i32
    %1 = arith.subi %c1_i32_0, %0 : i32
    %c1_i32_1 = arith.constant 1 : i32
    %2 = arith.minsi %c1_i32_1, %1 : i32
    %c0 = arith.constant 0 : index
    %3 = memref.load %arg4[%c0] : memref<1xf32, #tpu.memory_space<smem>>
    %c0_i32 = arith.constant 0 : i32
    %c1_i32_2 = arith.constant 1 : i32
    %4 = arith.muli %c0_i32, %c1_i32_2 : i32
    %c0_i32_3 = arith.constant 0 : i32
    %5 = arith.addi %c0_i32_3, %4 : i32
    %6 = arith.cmpi slt, %5, %2 : i32
    %7 = arith.extui %6 : i1 to i32
    %c0_i32_4 = arith.constant 0 : i32
    %8 = arith.cmpi ne, %7, %c0_i32_4 : i32
    scf.if %8 {
      %c64_i32 = arith.constant 64 : i32
      %9 = arith.muli %5, %c64_i32 : i32
      %10 = tpu.assume_multiple %9, 64 : i32
      %11 = arith.index_cast %10 : i32 to index
      %c0_6 = arith.constant 0 : index
      %12 = vector.load %arg1[%11, %c0_6] : memref<64x128xf32, #tpu.memory_space<vmem>>, vector<64x128xf32>
      %13 = vector.broadcast %3 : f32 to vector<64x128xf32>
      %c0_i32_7 = arith.constant 0 : i32
      %14 = arith.index_cast %c0_i32_7 : i32 to index
      %15 = memref.load %arg2[%14] : memref<64xf32, #tpu.memory_space<smem>>
      %16 = vector.broadcast %15 : f32 to vector<64x128xf32>
      %17 = arith.mulf %12, %16 : vector<64x128xf32>
      %18 = arith.index_cast %c0_i32_7 : i32 to index
      %19 = memref.load %arg3[%18] : memref<64xf32, #tpu.memory_space<smem>>
      %20 = vector.broadcast %19 : f32 to vector<64x128xf32>
      %21 = arith.addf %17, %20 : vector<64x128xf32>
      %cst = arith.constant 0.000000e+00 : f32
      %22 = vector.broadcast %cst : f32 to vector<64x128xf32>
      %23 = arith.maximumf %21, %22 : vector<64x128xf32>
      %24 = arith.addf %13, %23 : vector<64x128xf32>
      %c1_i32_8 = arith.constant 1 : i32
      %25 = arith.index_cast %c1_i32_8 : i32 to index
      %26 = memref.load %arg2[%25] : memref<64xf32, #tpu.memory_space<smem>>
      %27 = vector.broadcast %26 : f32 to vector<64x128xf32>
      %28 = arith.mulf %12, %27 : vector<64x128xf32>
      %29 = arith.index_cast %c1_i32_8 : i32 to index
      %30 = memref.load %arg3[%29] : memref<64xf32, #tpu.memory_space<smem>>
      %31 = vector.broadcast %30 : f32 to vector<64x128xf32>
      %32 = arith.addf %28, %31 : vector<64x128xf32>
      %cst_9 = arith.constant 0.000000e+00 : f32
      %33 = vector.broadcast %cst_9 : f32 to vector<64x128xf32>
      %34 = arith.maximumf %32, %33 : vector<64x128xf32>
      %35 = arith.addf %24, %34 : vector<64x128xf32>
      %c2_i32 = arith.constant 2 : i32
      %36 = arith.index_cast %c2_i32 : i32 to index
      %37 = memref.load %arg2[%36] : memref<64xf32, #tpu.memory_space<smem>>
      %38 = vector.broadcast %37 : f32 to vector<64x128xf32>
      %39 = arith.mulf %12, %38 : vector<64x128xf32>
      %40 = arith.index_cast %c2_i32 : i32 to index
      %41 = memref.load %arg3[%40] : memref<64xf32, #tpu.memory_space<smem>>
      %42 = vector.broadcast %41 : f32 to vector<64x128xf32>
      %43 = arith.addf %39, %42 : vector<64x128xf32>
      %cst_10 = arith.constant 0.000000e+00 : f32
      %44 = vector.broadcast %cst_10 : f32 to vector<64x128xf32>
      %45 = arith.maximumf %43, %44 : vector<64x128xf32>
      %46 = arith.addf %35, %45 : vector<64x128xf32>
      %c3_i32 = arith.constant 3 : i32
      %47 = arith.index_cast %c3_i32 : i32 to index
      %48 = memref.load %arg2[%47] : memref<64xf32, #tpu.memory_space<smem>>
      %49 = vector.broadcast %48 : f32 to vector<64x128xf32>
      %50 = arith.mulf %12, %49 : vector<64x128xf32>
      %51 = arith.index_cast %c3_i32 : i32 to index
      %52 = memref.load %arg3[%51] : memref<64xf32, #tpu.memory_space<smem>>
      %53 = vector.broadcast %52 : f32 to vector<64x128xf32>
      %54 = arith.addf %50, %53 : vector<64x128xf32>
      %cst_11 = arith.constant 0.000000e+00 : f32
      %55 = vector.broadcast %cst_11 : f32 to vector<64x128xf32>
      %56 = arith.maximumf %54, %55 : vector<64x128xf32>
      %57 = arith.addf %46, %56 : vector<64x128xf32>
      %c4_i32 = arith.constant 4 : i32
      %58 = arith.index_cast %c4_i32 : i32 to index
      %59 = memref.load %arg2[%58] : memref<64xf32, #tpu.memory_space<smem>>
      %60 = vector.broadcast %59 : f32 to vector<64x128xf32>
      %61 = arith.mulf %12, %60 : vector<64x128xf32>
      %62 = arith.index_cast %c4_i32 : i32 to index
      %63 = memref.load %arg3[%62] : memref<64xf32, #tpu.memory_space<smem>>
      %64 = vector.broadcast %63 : f32 to vector<64x128xf32>
      %65 = arith.addf %61, %64 : vector<64x128xf32>
      %cst_12 = arith.constant 0.000000e+00 : f32
      %66 = vector.broadcast %cst_12 : f32 to vector<64x128xf32>
      %67 = arith.maximumf %65, %66 : vector<64x128xf32>
      %68 = arith.addf %57, %67 : vector<64x128xf32>
      %c5_i32 = arith.constant 5 : i32
      %69 = arith.index_cast %c5_i32 : i32 to index
      %70 = memref.load %arg2[%69] : memref<64xf32, #tpu.memory_space<smem>>
      %71 = vector.broadcast %70 : f32 to vector<64x128xf32>
      %72 = arith.mulf %12, %71 : vector<64x128xf32>
      %73 = arith.index_cast %c5_i32 : i32 to index
      %74 = memref.load %arg3[%73] : memref<64xf32, #tpu.memory_space<smem>>
      %75 = vector.broadcast %74 : f32 to vector<64x128xf32>
      %76 = arith.addf %72, %75 : vector<64x128xf32>
      %cst_13 = arith.constant 0.000000e+00 : f32
      %77 = vector.broadcast %cst_13 : f32 to vector<64x128xf32>
      %78 = arith.maximumf %76, %77 : vector<64x128xf32>
      %79 = arith.addf %68, %78 : vector<64x128xf32>
      %c6_i32 = arith.constant 6 : i32
      %80 = arith.index_cast %c6_i32 : i32 to index
      %81 = memref.load %arg2[%80] : memref<64xf32, #tpu.memory_space<smem>>
      %82 = vector.broadcast %81 : f32 to vector<64x128xf32>
      %83 = arith.mulf %12, %82 : vector<64x128xf32>
      %84 = arith.index_cast %c6_i32 : i32 to index
      %85 = memref.load %arg3[%84] : memref<64xf32, #tpu.memory_space<smem>>
      %86 = vector.broadcast %85 : f32 to vector<64x128xf32>
      %87 = arith.addf %83, %86 : vector<64x128xf32>
      %cst_14 = arith.constant 0.000000e+00 : f32
      %88 = vector.broadcast %cst_14 : f32 to vector<64x128xf32>
      %89 = arith.maximumf %87, %88 : vector<64x128xf32>
      %90 = arith.addf %79, %89 : vector<64x128xf32>
      %c7_i32 = arith.constant 7 : i32
      %91 = arith.index_cast %c7_i32 : i32 to index
      %92 = memref.load %arg2[%91] : memref<64xf32, #tpu.memory_space<smem>>
      %93 = vector.broadcast %92 : f32 to vector<64x128xf32>
      %94 = arith.mulf %12, %93 : vector<64x128xf32>
      %95 = arith.index_cast %c7_i32 : i32 to index
      %96 = memref.load %arg3[%95] : memref<64xf32, #tpu.memory_space<smem>>
      %97 = vector.broadcast %96 : f32 to vector<64x128xf32>
      %98 = arith.addf %94, %97 : vector<64x128xf32>
      %cst_15 = arith.constant 0.000000e+00 : f32
      %99 = vector.broadcast %cst_15 : f32 to vector<64x128xf32>
      %100 = arith.maximumf %98, %99 : vector<64x128xf32>
      %101 = arith.addf %90, %100 : vector<64x128xf32>
      %c8_i32 = arith.constant 8 : i32
      %102 = arith.index_cast %c8_i32 : i32 to index
      %103 = memref.load %arg2[%102] : memref<64xf32, #tpu.memory_space<smem>>
      %104 = vector.broadcast %103 : f32 to vector<64x128xf32>
      %105 = arith.mulf %12, %104 : vector<64x128xf32>
      %106 = arith.index_cast %c8_i32 : i32 to index
      %107 = memref.load %arg3[%106] : memref<64xf32, #tpu.memory_space<smem>>
      %108 = vector.broadcast %107 : f32 to vector<64x128xf32>
      %109 = arith.addf %105, %108 : vector<64x128xf32>
      %cst_16 = arith.constant 0.000000e+00 : f32
      %110 = vector.broadcast %cst_16 : f32 to vector<64x128xf32>
      %111 = arith.maximumf %109, %110 : vector<64x128xf32>
      %112 = arith.addf %101, %111 : vector<64x128xf32>
      %c9_i32 = arith.constant 9 : i32
      %113 = arith.index_cast %c9_i32 : i32 to index
      %114 = memref.load %arg2[%113] : memref<64xf32, #tpu.memory_space<smem>>
      %115 = vector.broadcast %114 : f32 to vector<64x128xf32>
      %116 = arith.mulf %12, %115 : vector<64x128xf32>
      %117 = arith.index_cast %c9_i32 : i32 to index
      %118 = memref.load %arg3[%117] : memref<64xf32, #tpu.memory_space<smem>>
      %119 = vector.broadcast %118 : f32 to vector<64x128xf32>
      %120 = arith.addf %116, %119 : vector<64x128xf32>
      %cst_17 = arith.constant 0.000000e+00 : f32
      %121 = vector.broadcast %cst_17 : f32 to vector<64x128xf32>
      %122 = arith.maximumf %120, %121 : vector<64x128xf32>
      %123 = arith.addf %112, %122 : vector<64x128xf32>
      %c10_i32 = arith.constant 10 : i32
      %124 = arith.index_cast %c10_i32 : i32 to index
      %125 = memref.load %arg2[%124] : memref<64xf32, #tpu.memory_space<smem>>
      %126 = vector.broadcast %125 : f32 to vector<64x128xf32>
      %127 = arith.mulf %12, %126 : vector<64x128xf32>
      %128 = arith.index_cast %c10_i32 : i32 to index
      %129 = memref.load %arg3[%128] : memref<64xf32, #tpu.memory_space<smem>>
      %130 = vector.broadcast %129 : f32 to vector<64x128xf32>
      %131 = arith.addf %127, %130 : vector<64x128xf32>
      %cst_18 = arith.constant 0.000000e+00 : f32
      %132 = vector.broadcast %cst_18 : f32 to vector<64x128xf32>
      %133 = arith.maximumf %131, %132 : vector<64x128xf32>
      %134 = arith.addf %123, %133 : vector<64x128xf32>
      %c11_i32 = arith.constant 11 : i32
      %135 = arith.index_cast %c11_i32 : i32 to index
      %136 = memref.load %arg2[%135] : memref<64xf32, #tpu.memory_space<smem>>
      %137 = vector.broadcast %136 : f32 to vector<64x128xf32>
      %138 = arith.mulf %12, %137 : vector<64x128xf32>
      %139 = arith.index_cast %c11_i32 : i32 to index
      %140 = memref.load %arg3[%139] : memref<64xf32, #tpu.memory_space<smem>>
      %141 = vector.broadcast %140 : f32 to vector<64x128xf32>
      %142 = arith.addf %138, %141 : vector<64x128xf32>
      %cst_19 = arith.constant 0.000000e+00 : f32
      %143 = vector.broadcast %cst_19 : f32 to vector<64x128xf32>
      %144 = arith.maximumf %142, %143 : vector<64x128xf32>
      %145 = arith.addf %134, %144 : vector<64x128xf32>
      %c12_i32 = arith.constant 12 : i32
      %146 = arith.index_cast %c12_i32 : i32 to index
      %147 = memref.load %arg2[%146] : memref<64xf32, #tpu.memory_space<smem>>
      %148 = vector.broadcast %147 : f32 to vector<64x128xf32>
      %149 = arith.mulf %12, %148 : vector<64x128xf32>
      %150 = arith.index_cast %c12_i32 : i32 to index
      %151 = memref.load %arg3[%150] : memref<64xf32, #tpu.memory_space<smem>>
      %152 = vector.broadcast %151 : f32 to vector<64x128xf32>
      %153 = arith.addf %149, %152 : vector<64x128xf32>
      %cst_20 = arith.constant 0.000000e+00 : f32
      %154 = vector.broadcast %cst_20 : f32 to vector<64x128xf32>
      %155 = arith.maximumf %153, %154 : vector<64x128xf32>
      %156 = arith.addf %145, %155 : vector<64x128xf32>
      %c13_i32 = arith.constant 13 : i32
      %157 = arith.index_cast %c13_i32 : i32 to index
      %158 = memref.load %arg2[%157] : memref<64xf32, #tpu.memory_space<smem>>
      %159 = vector.broadcast %158 : f32 to vector<64x128xf32>
      %160 = arith.mulf %12, %159 : vector<64x128xf32>
      %161 = arith.index_cast %c13_i32 : i32 to index
      %162 = memref.load %arg3[%161] : memref<64xf32, #tpu.memory_space<smem>>
      %163 = vector.broadcast %162 : f32 to vector<64x128xf32>
      %164 = arith.addf %160, %163 : vector<64x128xf32>
      %cst_21 = arith.constant 0.000000e+00 : f32
      %165 = vector.broadcast %cst_21 : f32 to vector<64x128xf32>
      %166 = arith.maximumf %164, %165 : vector<64x128xf32>
      %167 = arith.addf %156, %166 : vector<64x128xf32>
      %c14_i32 = arith.constant 14 : i32
      %168 = arith.index_cast %c14_i32 : i32 to index
      %169 = memref.load %arg2[%168] : memref<64xf32, #tpu.memory_space<smem>>
      %170 = vector.broadcast %169 : f32 to vector<64x128xf32>
      %171 = arith.mulf %12, %170 : vector<64x128xf32>
      %172 = arith.index_cast %c14_i32 : i32 to index
      %173 = memref.load %arg3[%172] : memref<64xf32, #tpu.memory_space<smem>>
      %174 = vector.broadcast %173 : f32 to vector<64x128xf32>
      %175 = arith.addf %171, %174 : vector<64x128xf32>
      %cst_22 = arith.constant 0.000000e+00 : f32
      %176 = vector.broadcast %cst_22 : f32 to vector<64x128xf32>
      %177 = arith.maximumf %175, %176 : vector<64x128xf32>
      %178 = arith.addf %167, %177 : vector<64x128xf32>
      %c15_i32 = arith.constant 15 : i32
      %179 = arith.index_cast %c15_i32 : i32 to index
      %180 = memref.load %arg2[%179] : memref<64xf32, #tpu.memory_space<smem>>
      %181 = vector.broadcast %180 : f32 to vector<64x128xf32>
      %182 = arith.mulf %12, %181 : vector<64x128xf32>
      %183 = arith.index_cast %c15_i32 : i32 to index
      %184 = memref.load %arg3[%183] : memref<64xf32, #tpu.memory_space<smem>>
      %185 = vector.broadcast %184 : f32 to vector<64x128xf32>
      %186 = arith.addf %182, %185 : vector<64x128xf32>
      %cst_23 = arith.constant 0.000000e+00 : f32
      %187 = vector.broadcast %cst_23 : f32 to vector<64x128xf32>
      %188 = arith.maximumf %186, %187 : vector<64x128xf32>
      %189 = arith.addf %178, %188 : vector<64x128xf32>
      %c16_i32 = arith.constant 16 : i32
      %190 = arith.index_cast %c16_i32 : i32 to index
      %191 = memref.load %arg2[%190] : memref<64xf32, #tpu.memory_space<smem>>
      %192 = vector.broadcast %191 : f32 to vector<64x128xf32>
      %193 = arith.mulf %12, %192 : vector<64x128xf32>
      %194 = arith.index_cast %c16_i32 : i32 to index
      %195 = memref.load %arg3[%194] : memref<64xf32, #tpu.memory_space<smem>>
      %196 = vector.broadcast %195 : f32 to vector<64x128xf32>
      %197 = arith.addf %193, %196 : vector<64x128xf32>
      %cst_24 = arith.constant 0.000000e+00 : f32
      %198 = vector.broadcast %cst_24 : f32 to vector<64x128xf32>
      %199 = arith.maximumf %197, %198 : vector<64x128xf32>
      %200 = arith.addf %189, %199 : vector<64x128xf32>
      %c17_i32 = arith.constant 17 : i32
      %201 = arith.index_cast %c17_i32 : i32 to index
      %202 = memref.load %arg2[%201] : memref<64xf32, #tpu.memory_space<smem>>
      %203 = vector.broadcast %202 : f32 to vector<64x128xf32>
      %204 = arith.mulf %12, %203 : vector<64x128xf32>
      %205 = arith.index_cast %c17_i32 : i32 to index
      %206 = memref.load %arg3[%205] : memref<64xf32, #tpu.memory_space<smem>>
      %207 = vector.broadcast %206 : f32 to vector<64x128xf32>
      %208 = arith.addf %204, %207 : vector<64x128xf32>
      %cst_25 = arith.constant 0.000000e+00 : f32
      %209 = vector.broadcast %cst_25 : f32 to vector<64x128xf32>
      %210 = arith.maximumf %208, %209 : vector<64x128xf32>
      %211 = arith.addf %200, %210 : vector<64x128xf32>
      %c18_i32 = arith.constant 18 : i32
      %212 = arith.index_cast %c18_i32 : i32 to index
      %213 = memref.load %arg2[%212] : memref<64xf32, #tpu.memory_space<smem>>
      %214 = vector.broadcast %213 : f32 to vector<64x128xf32>
      %215 = arith.mulf %12, %214 : vector<64x128xf32>
      %216 = arith.index_cast %c18_i32 : i32 to index
      %217 = memref.load %arg3[%216] : memref<64xf32, #tpu.memory_space<smem>>
      %218 = vector.broadcast %217 : f32 to vector<64x128xf32>
      %219 = arith.addf %215, %218 : vector<64x128xf32>
      %cst_26 = arith.constant 0.000000e+00 : f32
      %220 = vector.broadcast %cst_26 : f32 to vector<64x128xf32>
      %221 = arith.maximumf %219, %220 : vector<64x128xf32>
      %222 = arith.addf %211, %221 : vector<64x128xf32>
      %c19_i32 = arith.constant 19 : i32
      %223 = arith.index_cast %c19_i32 : i32 to index
      %224 = memref.load %arg2[%223] : memref<64xf32, #tpu.memory_space<smem>>
      %225 = vector.broadcast %224 : f32 to vector<64x128xf32>
      %226 = arith.mulf %12, %225 : vector<64x128xf32>
      %227 = arith.index_cast %c19_i32 : i32 to index
      %228 = memref.load %arg3[%227] : memref<64xf32, #tpu.memory_space<smem>>
      %229 = vector.broadcast %228 : f32 to vector<64x128xf32>
      %230 = arith.addf %226, %229 : vector<64x128xf32>
      %cst_27 = arith.constant 0.000000e+00 : f32
      %231 = vector.broadcast %cst_27 : f32 to vector<64x128xf32>
      %232 = arith.maximumf %230, %231 : vector<64x128xf32>
      %233 = arith.addf %222, %232 : vector<64x128xf32>
      %c20_i32 = arith.constant 20 : i32
      %234 = arith.index_cast %c20_i32 : i32 to index
      %235 = memref.load %arg2[%234] : memref<64xf32, #tpu.memory_space<smem>>
      %236 = vector.broadcast %235 : f32 to vector<64x128xf32>
      %237 = arith.mulf %12, %236 : vector<64x128xf32>
      %238 = arith.index_cast %c20_i32 : i32 to index
      %239 = memref.load %arg3[%238] : memref<64xf32, #tpu.memory_space<smem>>
      %240 = vector.broadcast %239 : f32 to vector<64x128xf32>
      %241 = arith.addf %237, %240 : vector<64x128xf32>
      %cst_28 = arith.constant 0.000000e+00 : f32
      %242 = vector.broadcast %cst_28 : f32 to vector<64x128xf32>
      %243 = arith.maximumf %241, %242 : vector<64x128xf32>
      %244 = arith.addf %233, %243 : vector<64x128xf32>
      %c21_i32 = arith.constant 21 : i32
      %245 = arith.index_cast %c21_i32 : i32 to index
      %246 = memref.load %arg2[%245] : memref<64xf32, #tpu.memory_space<smem>>
      %247 = vector.broadcast %246 : f32 to vector<64x128xf32>
      %248 = arith.mulf %12, %247 : vector<64x128xf32>
      %249 = arith.index_cast %c21_i32 : i32 to index
      %250 = memref.load %arg3[%249] : memref<64xf32, #tpu.memory_space<smem>>
      %251 = vector.broadcast %250 : f32 to vector<64x128xf32>
      %252 = arith.addf %248, %251 : vector<64x128xf32>
      %cst_29 = arith.constant 0.000000e+00 : f32
      %253 = vector.broadcast %cst_29 : f32 to vector<64x128xf32>
      %254 = arith.maximumf %252, %253 : vector<64x128xf32>
      %255 = arith.addf %244, %254 : vector<64x128xf32>
      %c22_i32 = arith.constant 22 : i32
      %256 = arith.index_cast %c22_i32 : i32 to index
      %257 = memref.load %arg2[%256] : memref<64xf32, #tpu.memory_space<smem>>
      %258 = vector.broadcast %257 : f32 to vector<64x128xf32>
      %259 = arith.mulf %12, %258 : vector<64x128xf32>
      %260 = arith.index_cast %c22_i32 : i32 to index
      %261 = memref.load %arg3[%260] : memref<64xf32, #tpu.memory_space<smem>>
      %262 = vector.broadcast %261 : f32 to vector<64x128xf32>
      %263 = arith.addf %259, %262 : vector<64x128xf32>
      %cst_30 = arith.constant 0.000000e+00 : f32
      %264 = vector.broadcast %cst_30 : f32 to vector<64x128xf32>
      %265 = arith.maximumf %263, %264 : vector<64x128xf32>
      %266 = arith.addf %255, %265 : vector<64x128xf32>
      %c23_i32 = arith.constant 23 : i32
      %267 = arith.index_cast %c23_i32 : i32 to index
      %268 = memref.load %arg2[%267] : memref<64xf32, #tpu.memory_space<smem>>
      %269 = vector.broadcast %268 : f32 to vector<64x128xf32>
      %270 = arith.mulf %12, %269 : vector<64x128xf32>
      %271 = arith.index_cast %c23_i32 : i32 to index
      %272 = memref.load %arg3[%271] : memref<64xf32, #tpu.memory_space<smem>>
      %273 = vector.broadcast %272 : f32 to vector<64x128xf32>
      %274 = arith.addf %270, %273 : vector<64x128xf32>
      %cst_31 = arith.constant 0.000000e+00 : f32
      %275 = vector.broadcast %cst_31 : f32 to vector<64x128xf32>
      %276 = arith.maximumf %274, %275 : vector<64x128xf32>
      %277 = arith.addf %266, %276 : vector<64x128xf32>
      %c24_i32 = arith.constant 24 : i32
      %278 = arith.index_cast %c24_i32 : i32 to index
      %279 = memref.load %arg2[%278] : memref<64xf32, #tpu.memory_space<smem>>
      %280 = vector.broadcast %279 : f32 to vector<64x128xf32>
      %281 = arith.mulf %12, %280 : vector<64x128xf32>
      %282 = arith.index_cast %c24_i32 : i32 to index
      %283 = memref.load %arg3[%282] : memref<64xf32, #tpu.memory_space<smem>>
      %284 = vector.broadcast %283 : f32 to vector<64x128xf32>
      %285 = arith.addf %281, %284 : vector<64x128xf32>
      %cst_32 = arith.constant 0.000000e+00 : f32
      %286 = vector.broadcast %cst_32 : f32 to vector<64x128xf32>
      %287 = arith.maximumf %285, %286 : vector<64x128xf32>
      %288 = arith.addf %277, %287 : vector<64x128xf32>
      %c25_i32 = arith.constant 25 : i32
      %289 = arith.index_cast %c25_i32 : i32 to index
      %290 = memref.load %arg2[%289] : memref<64xf32, #tpu.memory_space<smem>>
      %291 = vector.broadcast %290 : f32 to vector<64x128xf32>
      %292 = arith.mulf %12, %291 : vector<64x128xf32>
      %293 = arith.index_cast %c25_i32 : i32 to index
      %294 = memref.load %arg3[%293] : memref<64xf32, #tpu.memory_space<smem>>
      %295 = vector.broadcast %294 : f32 to vector<64x128xf32>
      %296 = arith.addf %292, %295 : vector<64x128xf32>
      %cst_33 = arith.constant 0.000000e+00 : f32
      %297 = vector.broadcast %cst_33 : f32 to vector<64x128xf32>
      %298 = arith.maximumf %296, %297 : vector<64x128xf32>
      %299 = arith.addf %288, %298 : vector<64x128xf32>
      %c26_i32 = arith.constant 26 : i32
      %300 = arith.index_cast %c26_i32 : i32 to index
      %301 = memref.load %arg2[%300] : memref<64xf32, #tpu.memory_space<smem>>
      %302 = vector.broadcast %301 : f32 to vector<64x128xf32>
      %303 = arith.mulf %12, %302 : vector<64x128xf32>
      %304 = arith.index_cast %c26_i32 : i32 to index
      %305 = memref.load %arg3[%304] : memref<64xf32, #tpu.memory_space<smem>>
      %306 = vector.broadcast %305 : f32 to vector<64x128xf32>
      %307 = arith.addf %303, %306 : vector<64x128xf32>
      %cst_34 = arith.constant 0.000000e+00 : f32
      %308 = vector.broadcast %cst_34 : f32 to vector<64x128xf32>
      %309 = arith.maximumf %307, %308 : vector<64x128xf32>
      %310 = arith.addf %299, %309 : vector<64x128xf32>
      %c27_i32 = arith.constant 27 : i32
      %311 = arith.index_cast %c27_i32 : i32 to index
      %312 = memref.load %arg2[%311] : memref<64xf32, #tpu.memory_space<smem>>
      %313 = vector.broadcast %312 : f32 to vector<64x128xf32>
      %314 = arith.mulf %12, %313 : vector<64x128xf32>
      %315 = arith.index_cast %c27_i32 : i32 to index
      %316 = memref.load %arg3[%315] : memref<64xf32, #tpu.memory_space<smem>>
      %317 = vector.broadcast %316 : f32 to vector<64x128xf32>
      %318 = arith.addf %314, %317 : vector<64x128xf32>
      %cst_35 = arith.constant 0.000000e+00 : f32
      %319 = vector.broadcast %cst_35 : f32 to vector<64x128xf32>
      %320 = arith.maximumf %318, %319 : vector<64x128xf32>
      %321 = arith.addf %310, %320 : vector<64x128xf32>
      %c28_i32 = arith.constant 28 : i32
      %322 = arith.index_cast %c28_i32 : i32 to index
      %323 = memref.load %arg2[%322] : memref<64xf32, #tpu.memory_space<smem>>
      %324 = vector.broadcast %323 : f32 to vector<64x128xf32>
      %325 = arith.mulf %12, %324 : vector<64x128xf32>
      %326 = arith.index_cast %c28_i32 : i32 to index
      %327 = memref.load %arg3[%326] : memref<64xf32, #tpu.memory_space<smem>>
      %328 = vector.broadcast %327 : f32 to vector<64x128xf32>
      %329 = arith.addf %325, %328 : vector<64x128xf32>
      %cst_36 = arith.constant 0.000000e+00 : f32
      %330 = vector.broadcast %cst_36 : f32 to vector<64x128xf32>
      %331 = arith.maximumf %329, %330 : vector<64x128xf32>
      %332 = arith.addf %321, %331 : vector<64x128xf32>
      %c29_i32 = arith.constant 29 : i32
      %c29_i32_37 = arith.constant 29 : i32
      %333 = arith.index_cast %c29_i32_37 : i32 to index
      %334 = memref.load %arg2[%333] : memref<64xf32, #tpu.memory_space<smem>>
      %335 = vector.broadcast %334 : f32 to vector<64x128xf32>
      %336 = arith.mulf %12, %335 : vector<64x128xf32>
      %337 = arith.index_cast %c29_i32_37 : i32 to index
      %338 = memref.load %arg3[%337] : memref<64xf32, #tpu.memory_space<smem>>
      %339 = vector.broadcast %338 : f32 to vector<64x128xf32>
      %340 = arith.addf %336, %339 : vector<64x128xf32>
      %cst_38 = arith.constant 0.000000e+00 : f32
      %341 = vector.broadcast %cst_38 : f32 to vector<64x128xf32>
      %342 = arith.minimumf %340, %341 : vector<64x128xf32>
      %343 = arith.addf %332, %342 : vector<64x128xf32>
      %c30_i32 = arith.constant 30 : i32
      %344 = arith.index_cast %c30_i32 : i32 to index
      %345 = memref.load %arg2[%344] : memref<64xf32, #tpu.memory_space<smem>>
      %346 = vector.broadcast %345 : f32 to vector<64x128xf32>
      %347 = arith.mulf %12, %346 : vector<64x128xf32>
      %348 = arith.index_cast %c30_i32 : i32 to index
      %349 = memref.load %arg3[%348] : memref<64xf32, #tpu.memory_space<smem>>
      %350 = vector.broadcast %349 : f32 to vector<64x128xf32>
      %351 = arith.addf %347, %350 : vector<64x128xf32>
      %cst_39 = arith.constant 0.000000e+00 : f32
      %352 = vector.broadcast %cst_39 : f32 to vector<64x128xf32>
      %353 = arith.minimumf %351, %352 : vector<64x128xf32>
      %354 = arith.addf %343, %353 : vector<64x128xf32>
      %c31_i32 = arith.constant 31 : i32
      %355 = arith.index_cast %c31_i32 : i32 to index
      %356 = memref.load %arg2[%355] : memref<64xf32, #tpu.memory_space<smem>>
      %357 = vector.broadcast %356 : f32 to vector<64x128xf32>
      %358 = arith.mulf %12, %357 : vector<64x128xf32>
      %359 = arith.index_cast %c31_i32 : i32 to index
      %360 = memref.load %arg3[%359] : memref<64xf32, #tpu.memory_space<smem>>
      %361 = vector.broadcast %360 : f32 to vector<64x128xf32>
      %362 = arith.addf %358, %361 : vector<64x128xf32>
      %cst_40 = arith.constant 0.000000e+00 : f32
      %363 = vector.broadcast %cst_40 : f32 to vector<64x128xf32>
      %364 = arith.minimumf %362, %363 : vector<64x128xf32>
      %365 = arith.addf %354, %364 : vector<64x128xf32>
      %c32_i32 = arith.constant 32 : i32
      %366 = arith.index_cast %c32_i32 : i32 to index
      %367 = memref.load %arg2[%366] : memref<64xf32, #tpu.memory_space<smem>>
      %368 = vector.broadcast %367 : f32 to vector<64x128xf32>
      %369 = arith.mulf %12, %368 : vector<64x128xf32>
      %370 = arith.index_cast %c32_i32 : i32 to index
      %371 = memref.load %arg3[%370] : memref<64xf32, #tpu.memory_space<smem>>
      %372 = vector.broadcast %371 : f32 to vector<64x128xf32>
      %373 = arith.addf %369, %372 : vector<64x128xf32>
      %cst_41 = arith.constant 0.000000e+00 : f32
      %374 = vector.broadcast %cst_41 : f32 to vector<64x128xf32>
      %375 = arith.minimumf %373, %374 : vector<64x128xf32>
      %376 = arith.addf %365, %375 : vector<64x128xf32>
      %c33_i32 = arith.constant 33 : i32
      %377 = arith.index_cast %c33_i32 : i32 to index
      %378 = memref.load %arg2[%377] : memref<64xf32, #tpu.memory_space<smem>>
      %379 = vector.broadcast %378 : f32 to vector<64x128xf32>
      %380 = arith.mulf %12, %379 : vector<64x128xf32>
      %381 = arith.index_cast %c33_i32 : i32 to index
      %382 = memref.load %arg3[%381] : memref<64xf32, #tpu.memory_space<smem>>
      %383 = vector.broadcast %382 : f32 to vector<64x128xf32>
      %384 = arith.addf %380, %383 : vector<64x128xf32>
      %cst_42 = arith.constant 0.000000e+00 : f32
      %385 = vector.broadcast %cst_42 : f32 to vector<64x128xf32>
      %386 = arith.minimumf %384, %385 : vector<64x128xf32>
      %387 = arith.addf %376, %386 : vector<64x128xf32>
      %c34_i32 = arith.constant 34 : i32
      %388 = arith.index_cast %c34_i32 : i32 to index
      %389 = memref.load %arg2[%388] : memref<64xf32, #tpu.memory_space<smem>>
      %390 = vector.broadcast %389 : f32 to vector<64x128xf32>
      %391 = arith.mulf %12, %390 : vector<64x128xf32>
      %392 = arith.index_cast %c34_i32 : i32 to index
      %393 = memref.load %arg3[%392] : memref<64xf32, #tpu.memory_space<smem>>
      %394 = vector.broadcast %393 : f32 to vector<64x128xf32>
      %395 = arith.addf %391, %394 : vector<64x128xf32>
      %cst_43 = arith.constant 0.000000e+00 : f32
      %396 = vector.broadcast %cst_43 : f32 to vector<64x128xf32>
      %397 = arith.minimumf %395, %396 : vector<64x128xf32>
      %398 = arith.addf %387, %397 : vector<64x128xf32>
      %c35_i32 = arith.constant 35 : i32
      %399 = arith.index_cast %c35_i32 : i32 to index
      %400 = memref.load %arg2[%399] : memref<64xf32, #tpu.memory_space<smem>>
      %401 = vector.broadcast %400 : f32 to vector<64x128xf32>
      %402 = arith.mulf %12, %401 : vector<64x128xf32>
      %403 = arith.index_cast %c35_i32 : i32 to index
      %404 = memref.load %arg3[%403] : memref<64xf32, #tpu.memory_space<smem>>
      %405 = vector.broadcast %404 : f32 to vector<64x128xf32>
      %406 = arith.addf %402, %405 : vector<64x128xf32>
      %cst_44 = arith.constant 0.000000e+00 : f32
      %407 = vector.broadcast %cst_44 : f32 to vector<64x128xf32>
      %408 = arith.minimumf %406, %407 : vector<64x128xf32>
      %409 = arith.addf %398, %408 : vector<64x128xf32>
      %c36_i32 = arith.constant 36 : i32
      %410 = arith.index_cast %c36_i32 : i32 to index
      %411 = memref.load %arg2[%410] : memref<64xf32, #tpu.memory_space<smem>>
      %412 = vector.broadcast %411 : f32 to vector<64x128xf32>
      %413 = arith.mulf %12, %412 : vector<64x128xf32>
      %414 = arith.index_cast %c36_i32 : i32 to index
      %415 = memref.load %arg3[%414] : memref<64xf32, #tpu.memory_space<smem>>
      %416 = vector.broadcast %415 : f32 to vector<64x128xf32>
      %417 = arith.addf %413, %416 : vector<64x128xf32>
      %cst_45 = arith.constant 0.000000e+00 : f32
      %418 = vector.broadcast %cst_45 : f32 to vector<64x128xf32>
      %419 = arith.minimumf %417, %418 : vector<64x128xf32>
      %420 = arith.addf %409, %419 : vector<64x128xf32>
      %c37_i32 = arith.constant 37 : i32
      %421 = arith.index_cast %c37_i32 : i32 to index
      %422 = memref.load %arg2[%421] : memref<64xf32, #tpu.memory_space<smem>>
      %423 = vector.broadcast %422 : f32 to vector<64x128xf32>
      %424 = arith.mulf %12, %423 : vector<64x128xf32>
      %425 = arith.index_cast %c37_i32 : i32 to index
      %426 = memref.load %arg3[%425] : memref<64xf32, #tpu.memory_space<smem>>
      %427 = vector.broadcast %426 : f32 to vector<64x128xf32>
      %428 = arith.addf %424, %427 : vector<64x128xf32>
      %cst_46 = arith.constant 0.000000e+00 : f32
      %429 = vector.broadcast %cst_46 : f32 to vector<64x128xf32>
      %430 = arith.minimumf %428, %429 : vector<64x128xf32>
      %431 = arith.addf %420, %430 : vector<64x128xf32>
      %c38_i32 = arith.constant 38 : i32
      %432 = arith.index_cast %c38_i32 : i32 to index
      %433 = memref.load %arg2[%432] : memref<64xf32, #tpu.memory_space<smem>>
      %434 = vector.broadcast %433 : f32 to vector<64x128xf32>
      %435 = arith.mulf %12, %434 : vector<64x128xf32>
      %436 = arith.index_cast %c38_i32 : i32 to index
      %437 = memref.load %arg3[%436] : memref<64xf32, #tpu.memory_space<smem>>
      %438 = vector.broadcast %437 : f32 to vector<64x128xf32>
      %439 = arith.addf %435, %438 : vector<64x128xf32>
      %cst_47 = arith.constant 0.000000e+00 : f32
      %440 = vector.broadcast %cst_47 : f32 to vector<64x128xf32>
      %441 = arith.minimumf %439, %440 : vector<64x128xf32>
      %442 = arith.addf %431, %441 : vector<64x128xf32>
      %c39_i32 = arith.constant 39 : i32
      %443 = arith.index_cast %c39_i32 : i32 to index
      %444 = memref.load %arg2[%443] : memref<64xf32, #tpu.memory_space<smem>>
      %445 = vector.broadcast %444 : f32 to vector<64x128xf32>
      %446 = arith.mulf %12, %445 : vector<64x128xf32>
      %447 = arith.index_cast %c39_i32 : i32 to index
      %448 = memref.load %arg3[%447] : memref<64xf32, #tpu.memory_space<smem>>
      %449 = vector.broadcast %448 : f32 to vector<64x128xf32>
      %450 = arith.addf %446, %449 : vector<64x128xf32>
      %cst_48 = arith.constant 0.000000e+00 : f32
      %451 = vector.broadcast %cst_48 : f32 to vector<64x128xf32>
      %452 = arith.minimumf %450, %451 : vector<64x128xf32>
      %453 = arith.addf %442, %452 : vector<64x128xf32>
      %c40_i32 = arith.constant 40 : i32
      %454 = arith.index_cast %c40_i32 : i32 to index
      %455 = memref.load %arg2[%454] : memref<64xf32, #tpu.memory_space<smem>>
      %456 = vector.broadcast %455 : f32 to vector<64x128xf32>
      %457 = arith.mulf %12, %456 : vector<64x128xf32>
      %458 = arith.index_cast %c40_i32 : i32 to index
      %459 = memref.load %arg3[%458] : memref<64xf32, #tpu.memory_space<smem>>
      %460 = vector.broadcast %459 : f32 to vector<64x128xf32>
      %461 = arith.addf %457, %460 : vector<64x128xf32>
      %cst_49 = arith.constant 0.000000e+00 : f32
      %462 = vector.broadcast %cst_49 : f32 to vector<64x128xf32>
      %463 = arith.minimumf %461, %462 : vector<64x128xf32>
      %464 = arith.addf %453, %463 : vector<64x128xf32>
      %c41_i32 = arith.constant 41 : i32
      %465 = arith.index_cast %c41_i32 : i32 to index
      %466 = memref.load %arg2[%465] : memref<64xf32, #tpu.memory_space<smem>>
      %467 = vector.broadcast %466 : f32 to vector<64x128xf32>
      %468 = arith.mulf %12, %467 : vector<64x128xf32>
      %469 = arith.index_cast %c41_i32 : i32 to index
      %470 = memref.load %arg3[%469] : memref<64xf32, #tpu.memory_space<smem>>
      %471 = vector.broadcast %470 : f32 to vector<64x128xf32>
      %472 = arith.addf %468, %471 : vector<64x128xf32>
      %cst_50 = arith.constant 0.000000e+00 : f32
      %473 = vector.broadcast %cst_50 : f32 to vector<64x128xf32>
      %474 = arith.minimumf %472, %473 : vector<64x128xf32>
      %475 = arith.addf %464, %474 : vector<64x128xf32>
      %c42_i32 = arith.constant 42 : i32
      %476 = arith.index_cast %c42_i32 : i32 to index
      %477 = memref.load %arg2[%476] : memref<64xf32, #tpu.memory_space<smem>>
      %478 = vector.broadcast %477 : f32 to vector<64x128xf32>
      %479 = arith.mulf %12, %478 : vector<64x128xf32>
      %480 = arith.index_cast %c42_i32 : i32 to index
      %481 = memref.load %arg3[%480] : memref<64xf32, #tpu.memory_space<smem>>
      %482 = vector.broadcast %481 : f32 to vector<64x128xf32>
      %483 = arith.addf %479, %482 : vector<64x128xf32>
      %cst_51 = arith.constant 0.000000e+00 : f32
      %484 = vector.broadcast %cst_51 : f32 to vector<64x128xf32>
      %485 = arith.minimumf %483, %484 : vector<64x128xf32>
      %486 = arith.addf %475, %485 : vector<64x128xf32>
      %c43_i32 = arith.constant 43 : i32
      %487 = arith.index_cast %c43_i32 : i32 to index
      %488 = memref.load %arg2[%487] : memref<64xf32, #tpu.memory_space<smem>>
      %489 = vector.broadcast %488 : f32 to vector<64x128xf32>
      %490 = arith.mulf %12, %489 : vector<64x128xf32>
      %491 = arith.index_cast %c43_i32 : i32 to index
      %492 = memref.load %arg3[%491] : memref<64xf32, #tpu.memory_space<smem>>
      %493 = vector.broadcast %492 : f32 to vector<64x128xf32>
      %494 = arith.addf %490, %493 : vector<64x128xf32>
      %cst_52 = arith.constant 0.000000e+00 : f32
      %495 = vector.broadcast %cst_52 : f32 to vector<64x128xf32>
      %496 = arith.minimumf %494, %495 : vector<64x128xf32>
      %497 = arith.addf %486, %496 : vector<64x128xf32>
      %c44_i32 = arith.constant 44 : i32
      %498 = arith.index_cast %c44_i32 : i32 to index
      %499 = memref.load %arg2[%498] : memref<64xf32, #tpu.memory_space<smem>>
      %500 = vector.broadcast %499 : f32 to vector<64x128xf32>
      %501 = arith.mulf %12, %500 : vector<64x128xf32>
      %502 = arith.index_cast %c44_i32 : i32 to index
      %503 = memref.load %arg3[%502] : memref<64xf32, #tpu.memory_space<smem>>
      %504 = vector.broadcast %503 : f32 to vector<64x128xf32>
      %505 = arith.addf %501, %504 : vector<64x128xf32>
      %cst_53 = arith.constant 0.000000e+00 : f32
      %506 = vector.broadcast %cst_53 : f32 to vector<64x128xf32>
      %507 = arith.minimumf %505, %506 : vector<64x128xf32>
      %508 = arith.addf %497, %507 : vector<64x128xf32>
      %c45_i32 = arith.constant 45 : i32
      %509 = arith.index_cast %c45_i32 : i32 to index
      %510 = memref.load %arg2[%509] : memref<64xf32, #tpu.memory_space<smem>>
      %511 = vector.broadcast %510 : f32 to vector<64x128xf32>
      %512 = arith.mulf %12, %511 : vector<64x128xf32>
      %513 = arith.index_cast %c45_i32 : i32 to index
      %514 = memref.load %arg3[%513] : memref<64xf32, #tpu.memory_space<smem>>
      %515 = vector.broadcast %514 : f32 to vector<64x128xf32>
      %516 = arith.addf %512, %515 : vector<64x128xf32>
      %cst_54 = arith.constant 0.000000e+00 : f32
      %517 = vector.broadcast %cst_54 : f32 to vector<64x128xf32>
      %518 = arith.minimumf %516, %517 : vector<64x128xf32>
      %519 = arith.addf %508, %518 : vector<64x128xf32>
      %c46_i32 = arith.constant 46 : i32
      %520 = arith.index_cast %c46_i32 : i32 to index
      %521 = memref.load %arg2[%520] : memref<64xf32, #tpu.memory_space<smem>>
      %522 = vector.broadcast %521 : f32 to vector<64x128xf32>
      %523 = arith.mulf %12, %522 : vector<64x128xf32>
      %524 = arith.index_cast %c46_i32 : i32 to index
      %525 = memref.load %arg3[%524] : memref<64xf32, #tpu.memory_space<smem>>
      %526 = vector.broadcast %525 : f32 to vector<64x128xf32>
      %527 = arith.addf %523, %526 : vector<64x128xf32>
      %cst_55 = arith.constant 0.000000e+00 : f32
      %528 = vector.broadcast %cst_55 : f32 to vector<64x128xf32>
      %529 = arith.minimumf %527, %528 : vector<64x128xf32>
      %530 = arith.addf %519, %529 : vector<64x128xf32>
      %c47_i32 = arith.constant 47 : i32
      %531 = arith.index_cast %c47_i32 : i32 to index
      %532 = memref.load %arg2[%531] : memref<64xf32, #tpu.memory_space<smem>>
      %533 = vector.broadcast %532 : f32 to vector<64x128xf32>
      %534 = arith.mulf %12, %533 : vector<64x128xf32>
      %535 = arith.index_cast %c47_i32 : i32 to index
      %536 = memref.load %arg3[%535] : memref<64xf32, #tpu.memory_space<smem>>
      %537 = vector.broadcast %536 : f32 to vector<64x128xf32>
      %538 = arith.addf %534, %537 : vector<64x128xf32>
      %cst_56 = arith.constant 0.000000e+00 : f32
      %539 = vector.broadcast %cst_56 : f32 to vector<64x128xf32>
      %540 = arith.minimumf %538, %539 : vector<64x128xf32>
      %541 = arith.addf %530, %540 : vector<64x128xf32>
      %c48_i32 = arith.constant 48 : i32
      %542 = arith.index_cast %c48_i32 : i32 to index
      %543 = memref.load %arg2[%542] : memref<64xf32, #tpu.memory_space<smem>>
      %544 = vector.broadcast %543 : f32 to vector<64x128xf32>
      %545 = arith.mulf %12, %544 : vector<64x128xf32>
      %546 = arith.index_cast %c48_i32 : i32 to index
      %547 = memref.load %arg3[%546] : memref<64xf32, #tpu.memory_space<smem>>
      %548 = vector.broadcast %547 : f32 to vector<64x128xf32>
      %549 = arith.addf %545, %548 : vector<64x128xf32>
      %cst_57 = arith.constant 0.000000e+00 : f32
      %550 = vector.broadcast %cst_57 : f32 to vector<64x128xf32>
      %551 = arith.minimumf %549, %550 : vector<64x128xf32>
      %552 = arith.addf %541, %551 : vector<64x128xf32>
      %c49_i32 = arith.constant 49 : i32
      %553 = arith.index_cast %c49_i32 : i32 to index
      %554 = memref.load %arg2[%553] : memref<64xf32, #tpu.memory_space<smem>>
      %555 = vector.broadcast %554 : f32 to vector<64x128xf32>
      %556 = arith.mulf %12, %555 : vector<64x128xf32>
      %557 = arith.index_cast %c49_i32 : i32 to index
      %558 = memref.load %arg3[%557] : memref<64xf32, #tpu.memory_space<smem>>
      %559 = vector.broadcast %558 : f32 to vector<64x128xf32>
      %560 = arith.addf %556, %559 : vector<64x128xf32>
      %cst_58 = arith.constant 0.000000e+00 : f32
      %561 = vector.broadcast %cst_58 : f32 to vector<64x128xf32>
      %562 = arith.minimumf %560, %561 : vector<64x128xf32>
      %563 = arith.addf %552, %562 : vector<64x128xf32>
      %c50_i32 = arith.constant 50 : i32
      %564 = arith.index_cast %c50_i32 : i32 to index
      %565 = memref.load %arg2[%564] : memref<64xf32, #tpu.memory_space<smem>>
      %566 = vector.broadcast %565 : f32 to vector<64x128xf32>
      %567 = arith.mulf %12, %566 : vector<64x128xf32>
      %568 = arith.index_cast %c50_i32 : i32 to index
      %569 = memref.load %arg3[%568] : memref<64xf32, #tpu.memory_space<smem>>
      %570 = vector.broadcast %569 : f32 to vector<64x128xf32>
      %571 = arith.addf %567, %570 : vector<64x128xf32>
      %cst_59 = arith.constant 0.000000e+00 : f32
      %572 = vector.broadcast %cst_59 : f32 to vector<64x128xf32>
      %573 = arith.minimumf %571, %572 : vector<64x128xf32>
      %574 = arith.addf %563, %573 : vector<64x128xf32>
      %c51_i32 = arith.constant 51 : i32
      %575 = arith.index_cast %c51_i32 : i32 to index
      %576 = memref.load %arg2[%575] : memref<64xf32, #tpu.memory_space<smem>>
      %577 = vector.broadcast %576 : f32 to vector<64x128xf32>
      %578 = arith.mulf %12, %577 : vector<64x128xf32>
      %579 = arith.index_cast %c51_i32 : i32 to index
      %580 = memref.load %arg3[%579] : memref<64xf32, #tpu.memory_space<smem>>
      %581 = vector.broadcast %580 : f32 to vector<64x128xf32>
      %582 = arith.addf %578, %581 : vector<64x128xf32>
      %cst_60 = arith.constant 0.000000e+00 : f32
      %583 = vector.broadcast %cst_60 : f32 to vector<64x128xf32>
      %584 = arith.minimumf %582, %583 : vector<64x128xf32>
      %585 = arith.addf %574, %584 : vector<64x128xf32>
      %c52_i32 = arith.constant 52 : i32
      %586 = arith.index_cast %c52_i32 : i32 to index
      %587 = memref.load %arg2[%586] : memref<64xf32, #tpu.memory_space<smem>>
      %588 = vector.broadcast %587 : f32 to vector<64x128xf32>
      %589 = arith.mulf %12, %588 : vector<64x128xf32>
      %590 = arith.index_cast %c52_i32 : i32 to index
      %591 = memref.load %arg3[%590] : memref<64xf32, #tpu.memory_space<smem>>
      %592 = vector.broadcast %591 : f32 to vector<64x128xf32>
      %593 = arith.addf %589, %592 : vector<64x128xf32>
      %cst_61 = arith.constant 0.000000e+00 : f32
      %594 = vector.broadcast %cst_61 : f32 to vector<64x128xf32>
      %595 = arith.minimumf %593, %594 : vector<64x128xf32>
      %596 = arith.addf %585, %595 : vector<64x128xf32>
      %c53_i32 = arith.constant 53 : i32
      %597 = arith.index_cast %c53_i32 : i32 to index
      %598 = memref.load %arg2[%597] : memref<64xf32, #tpu.memory_space<smem>>
      %599 = vector.broadcast %598 : f32 to vector<64x128xf32>
      %600 = arith.mulf %12, %599 : vector<64x128xf32>
      %601 = arith.index_cast %c53_i32 : i32 to index
      %602 = memref.load %arg3[%601] : memref<64xf32, #tpu.memory_space<smem>>
      %603 = vector.broadcast %602 : f32 to vector<64x128xf32>
      %604 = arith.addf %600, %603 : vector<64x128xf32>
      %cst_62 = arith.constant 0.000000e+00 : f32
      %605 = vector.broadcast %cst_62 : f32 to vector<64x128xf32>
      %606 = arith.minimumf %604, %605 : vector<64x128xf32>
      %607 = arith.addf %596, %606 : vector<64x128xf32>
      %c54_i32 = arith.constant 54 : i32
      %608 = arith.index_cast %c54_i32 : i32 to index
      %609 = memref.load %arg2[%608] : memref<64xf32, #tpu.memory_space<smem>>
      %610 = vector.broadcast %609 : f32 to vector<64x128xf32>
      %611 = arith.mulf %12, %610 : vector<64x128xf32>
      %612 = arith.index_cast %c54_i32 : i32 to index
      %613 = memref.load %arg3[%612] : memref<64xf32, #tpu.memory_space<smem>>
      %614 = vector.broadcast %613 : f32 to vector<64x128xf32>
      %615 = arith.addf %611, %614 : vector<64x128xf32>
      %cst_63 = arith.constant 0.000000e+00 : f32
      %616 = vector.broadcast %cst_63 : f32 to vector<64x128xf32>
      %617 = arith.minimumf %615, %616 : vector<64x128xf32>
      %618 = arith.addf %607, %617 : vector<64x128xf32>
      %c55_i32 = arith.constant 55 : i32
      %619 = arith.index_cast %c55_i32 : i32 to index
      %620 = memref.load %arg2[%619] : memref<64xf32, #tpu.memory_space<smem>>
      %621 = vector.broadcast %620 : f32 to vector<64x128xf32>
      %622 = arith.mulf %12, %621 : vector<64x128xf32>
      %623 = arith.index_cast %c55_i32 : i32 to index
      %624 = memref.load %arg3[%623] : memref<64xf32, #tpu.memory_space<smem>>
      %625 = vector.broadcast %624 : f32 to vector<64x128xf32>
      %626 = arith.addf %622, %625 : vector<64x128xf32>
      %cst_64 = arith.constant 0.000000e+00 : f32
      %627 = vector.broadcast %cst_64 : f32 to vector<64x128xf32>
      %628 = arith.minimumf %626, %627 : vector<64x128xf32>
      %629 = arith.addf %618, %628 : vector<64x128xf32>
      %c56_i32 = arith.constant 56 : i32
      %630 = arith.index_cast %c56_i32 : i32 to index
      %631 = memref.load %arg2[%630] : memref<64xf32, #tpu.memory_space<smem>>
      %632 = vector.broadcast %631 : f32 to vector<64x128xf32>
      %633 = arith.mulf %12, %632 : vector<64x128xf32>
      %634 = arith.index_cast %c56_i32 : i32 to index
      %635 = memref.load %arg3[%634] : memref<64xf32, #tpu.memory_space<smem>>
      %636 = vector.broadcast %635 : f32 to vector<64x128xf32>
      %637 = arith.addf %633, %636 : vector<64x128xf32>
      %cst_65 = arith.constant 0.000000e+00 : f32
      %638 = vector.broadcast %cst_65 : f32 to vector<64x128xf32>
      %639 = arith.minimumf %637, %638 : vector<64x128xf32>
      %640 = arith.addf %629, %639 : vector<64x128xf32>
      %c57_i32 = arith.constant 57 : i32
      %641 = arith.index_cast %c57_i32 : i32 to index
      %642 = memref.load %arg2[%641] : memref<64xf32, #tpu.memory_space<smem>>
      %643 = vector.broadcast %642 : f32 to vector<64x128xf32>
      %644 = arith.mulf %12, %643 : vector<64x128xf32>
      %645 = arith.index_cast %c57_i32 : i32 to index
      %646 = memref.load %arg3[%645] : memref<64xf32, #tpu.memory_space<smem>>
      %647 = vector.broadcast %646 : f32 to vector<64x128xf32>
      %648 = arith.addf %644, %647 : vector<64x128xf32>
      %cst_66 = arith.constant 0.000000e+00 : f32
      %649 = vector.broadcast %cst_66 : f32 to vector<64x128xf32>
      %650 = arith.minimumf %648, %649 : vector<64x128xf32>
      %651 = arith.addf %640, %650 : vector<64x128xf32>
      %c58_i32 = arith.constant 58 : i32
      %652 = arith.index_cast %c58_i32 : i32 to index
      %653 = memref.load %arg2[%652] : memref<64xf32, #tpu.memory_space<smem>>
      %654 = vector.broadcast %653 : f32 to vector<64x128xf32>
      %655 = arith.mulf %12, %654 : vector<64x128xf32>
      %656 = arith.index_cast %c58_i32 : i32 to index
      %657 = memref.load %arg3[%656] : memref<64xf32, #tpu.memory_space<smem>>
      %658 = vector.broadcast %657 : f32 to vector<64x128xf32>
      %659 = arith.addf %655, %658 : vector<64x128xf32>
      %cst_67 = arith.constant 0.000000e+00 : f32
      %660 = vector.broadcast %cst_67 : f32 to vector<64x128xf32>
      %661 = arith.minimumf %659, %660 : vector<64x128xf32>
      %662 = arith.addf %651, %661 : vector<64x128xf32>
      %c59_i32 = arith.constant 59 : i32
      %663 = arith.index_cast %c59_i32 : i32 to index
      %664 = memref.load %arg2[%663] : memref<64xf32, #tpu.memory_space<smem>>
      %665 = vector.broadcast %664 : f32 to vector<64x128xf32>
      %666 = arith.mulf %12, %665 : vector<64x128xf32>
      %667 = arith.index_cast %c59_i32 : i32 to index
      %668 = memref.load %arg3[%667] : memref<64xf32, #tpu.memory_space<smem>>
      %669 = vector.broadcast %668 : f32 to vector<64x128xf32>
      %670 = arith.addf %666, %669 : vector<64x128xf32>
      %cst_68 = arith.constant 0.000000e+00 : f32
      %671 = vector.broadcast %cst_68 : f32 to vector<64x128xf32>
      %672 = arith.minimumf %670, %671 : vector<64x128xf32>
      %673 = arith.addf %662, %672 : vector<64x128xf32>
      %c60_i32 = arith.constant 60 : i32
      %674 = arith.index_cast %c60_i32 : i32 to index
      %675 = memref.load %arg2[%674] : memref<64xf32, #tpu.memory_space<smem>>
      %676 = vector.broadcast %675 : f32 to vector<64x128xf32>
      %677 = arith.mulf %12, %676 : vector<64x128xf32>
      %678 = arith.index_cast %c60_i32 : i32 to index
      %679 = memref.load %arg3[%678] : memref<64xf32, #tpu.memory_space<smem>>
      %680 = vector.broadcast %679 : f32 to vector<64x128xf32>
      %681 = arith.addf %677, %680 : vector<64x128xf32>
      %cst_69 = arith.constant 0.000000e+00 : f32
      %682 = vector.broadcast %cst_69 : f32 to vector<64x128xf32>
      %683 = arith.minimumf %681, %682 : vector<64x128xf32>
      %684 = arith.addf %673, %683 : vector<64x128xf32>
      %c61_i32 = arith.constant 61 : i32
      %685 = arith.index_cast %c61_i32 : i32 to index
      %686 = memref.load %arg2[%685] : memref<64xf32, #tpu.memory_space<smem>>
      %687 = vector.broadcast %686 : f32 to vector<64x128xf32>
      %688 = arith.mulf %12, %687 : vector<64x128xf32>
      %689 = arith.index_cast %c61_i32 : i32 to index
      %690 = memref.load %arg3[%689] : memref<64xf32, #tpu.memory_space<smem>>
      %691 = vector.broadcast %690 : f32 to vector<64x128xf32>
      %692 = arith.addf %688, %691 : vector<64x128xf32>
      %cst_70 = arith.constant 0.000000e+00 : f32
      %693 = vector.broadcast %cst_70 : f32 to vector<64x128xf32>
      %694 = arith.minimumf %692, %693 : vector<64x128xf32>
      %695 = arith.addf %684, %694 : vector<64x128xf32>
      %c62_i32 = arith.constant 62 : i32
      %696 = arith.index_cast %c62_i32 : i32 to index
      %697 = memref.load %arg2[%696] : memref<64xf32, #tpu.memory_space<smem>>
      %698 = vector.broadcast %697 : f32 to vector<64x128xf32>
      %699 = arith.mulf %12, %698 : vector<64x128xf32>
      %700 = arith.index_cast %c62_i32 : i32 to index
      %701 = memref.load %arg3[%700] : memref<64xf32, #tpu.memory_space<smem>>
      %702 = vector.broadcast %701 : f32 to vector<64x128xf32>
      %703 = arith.addf %699, %702 : vector<64x128xf32>
      %cst_71 = arith.constant 0.000000e+00 : f32
      %704 = vector.broadcast %cst_71 : f32 to vector<64x128xf32>
      %705 = arith.minimumf %703, %704 : vector<64x128xf32>
      %706 = arith.addf %695, %705 : vector<64x128xf32>
      %c63_i32 = arith.constant 63 : i32
      %707 = arith.index_cast %c63_i32 : i32 to index
      %708 = memref.load %arg2[%707] : memref<64xf32, #tpu.memory_space<smem>>
      %709 = vector.broadcast %708 : f32 to vector<64x128xf32>
      %710 = arith.mulf %12, %709 : vector<64x128xf32>
      %711 = arith.index_cast %c63_i32 : i32 to index
      %712 = memref.load %arg3[%711] : memref<64xf32, #tpu.memory_space<smem>>
      %713 = vector.broadcast %712 : f32 to vector<64x128xf32>
      %714 = arith.addf %710, %713 : vector<64x128xf32>
      %cst_72 = arith.constant 0.000000e+00 : f32
      %715 = vector.broadcast %cst_72 : f32 to vector<64x128xf32>
      %716 = arith.minimumf %714, %715 : vector<64x128xf32>
      %717 = arith.addf %706, %716 : vector<64x128xf32>
      %c35_i32_73 = arith.constant 35 : i32
      %718 = arith.index_cast %10 : i32 to index
      %c0_74 = arith.constant 0 : index
      %719 = vector.load %arg5[%718, %c0_74] : memref<64x128xf32, #tpu.memory_space<vmem>>, vector<64x128xf32>
      tpu.vector_store %arg5[%718, %c0_74], %717 {strides = array<i32>} : memref<64x128xf32, #tpu.memory_space<vmem>>, vector<64x128xf32>,
    } else {
    }
    %c1_i32_5 = arith.constant 1 : i32
    return
  }
  func.func @transform_0(%arg0: i32) -> (i32, i32) {
    %c0_i32 = arith.constant 0 : i32
    %c0_i32_0 = arith.constant 0 : i32
    return %arg0, %c0_i32 : i32, i32
  }
  func.func @transform_1(%arg0: i32) -> i32 {
    %c0_i32 = arith.constant 0 : i32
    %c0_i32_0 = arith.constant 0 : i32
    return %c0_i32 : i32
  }
  func.func @transform_2(%arg0: i32) -> i32 {
    %c0_i32 = arith.constant 0 : i32
    %c0_i32_0 = arith.constant 0 : i32
    return %c0_i32 : i32
  }
  func.func @transform_3(%arg0: i32) -> i32 {
    %c0_i32 = arith.constant 0 : i32
    %c0_i32_0 = arith.constant 0 : i32
    return %c0_i32 : i32
  }
  func.func @transform_4(%arg0: i32) -> (i32, i32) {
    %c0_i32 = arith.constant 0 : i32
    %c0_i32_0 = arith.constant 0 : i32
    return %arg0, %c0_i32 : i32, i32
  }
}

</mosaic_0001>

<bundles_post_ra>
// kernel: _forward_prepared.1
= control target key start
LH: loop header
LB: loop body
LE: loop exit
PB: predicated region body
PF: predicated region fallthrough
CT: control target
= control target key end

     0   :  { %10 = vsyncpa [#allocation4], 0  ;;  %s3710_s0 = inlined_call_operand.vmem [shape: f32[64,128], index: 0, kind: input, shape index: {}]   ;;  %s3711_s1 = inlined_call_operand.vmem [shape: f32[64], index: 1, kind: input, shape index: {}]   ;;  %s3712_s2 = inlined_call_operand.vmem [shape: f32[64], index: 2, kind: input, shape index: {}]   ;;  %s3713_s3 = inlined_call_operand.<no memory space> [shape: f32[1], index: 3, kind: input, shape index: {}]   ;;  %s3714_s4 = inlined_call_operand.vmem [shape: f32[64,128], index: 4, kind: output, shape index: {}]  }
   0x1   :  { %s19_s17 = sshll.u32 %s3711_s1, 4  ;;  %s20_s17 = int_to_ptr.vmem [resolvable:$true] %s19_s17 }
   0x2   :  { %11 = vsyncpa [#allocation6], 0  ;;  %s28_s20 = sshll.u32 %s3712_s2, 4  ;;  %s2566_s21 = smov [#allocation3]   ;;  %s29_s20 = int_to_ptr.vmem [resolvable:$true] %s28_s20 }
   0x3   :  { %22 = dma.vmem_to_smem %s20_s17, 16, %s2566_s21, [#allocation4]  }
   0x4   :  { %s2567_s22 = smov [#allocation5]  }
   0x5   :  { %31 = dma.vmem_to_smem %s29_s20, 16, %s2567_s22, [#allocation6]  }
   0x6   :  { %2562 = dma.done.wait [#allocation4], 16  }
   0x7   :  { %2563 = vsyncadd [#allocation4], 4294967280 }
   0x8   :  { %2564 = dma.done.wait [#allocation6], 16  }
   0x9   :  { %2565 = vsyncadd [#allocation6], 4294967280 }
   0xa   :  { %42 = sfence }
   0xb   :  { %s60_s23 = sld [smem:[#allocation3]]  ;;  %v2602_v0 = vld [vmem:[%s3710_s0] sm:$0xff]  ;;  %v2607_v1 = vld [vmem:[%s3710_s0 + $0x8] sm:$0xff]  ;;  %v2612_v2 = vld [vmem:[%s3710_s0 + $0x10] sm:$0xff]  ;;  %v59_v17 = vstv %s3713_s3 }
   0xc   :  { %s70_s24 = sld [smem:[#allocation5]]  ;;  %v2617_v3 = vld [vmem:[%s3710_s0 + $0x18] sm:$0xff]  ;;  %v2622_v4 = vld [vmem:[%s3710_s0 + $0x20] sm:$0xff]  ;;  %v2627_v5 = vld [vmem:[%s3710_s0 + $0x28] sm:$0xff] }
   0xd   :  { %s2378_s25 = sld [smem:[#allocation3 + $0x1]]  ;;  %v2632_v6 = vld [vmem:[%s3710_s0 + $0x30] sm:$0xff]  ;;  %v2637_v7 = vld [vmem:[%s3710_s0 + $0x38] sm:$0xff] }
   0xe   :  { %s2379_s28 = sld [smem:[#allocation5 + $0x1]] }
   0xf   :  { %s2650_s3 = sld [smem:[#allocation3 + $0x2]] }
  0x10   :  { %s2652_s17 = sld [smem:[#allocation5 + $0x2]] }
  0x11   :  { %v61_v8 = vstv %s60_s23  ;;  %s2654_s18 = sld [smem:[#allocation3 + $0x3]] }
  0x12   :  { %v62_v9 = vmul.f32 %v61_v8, %v2602_v0  ;;  %v63_v10 = vmul.f32 %v61_v8, %v2607_v1  ;;  %v64_v11 = vmul.f32 %v61_v8, %v2612_v2  ;;  %v65_v12 = vmul.f32 %v61_v8, %v2617_v3  ;;  %s2660_s19 = sld [smem:[#allocation5 + $0x3]] }
  0x13   :  { %v66_v13 = vmul.f32 %v61_v8, %v2622_v4  ;;  %v67_v14 = vmul.f32 %v61_v8, %v2627_v5  ;;  %v68_v15 = vmul.f32 %v61_v8, %v2632_v6  ;;  %v69_v16 = vmul.f32 %v61_v8, %v2637_v7  ;;  %s2678_s20 = sld [smem:[#allocation3 + $0x4]] }
  0x14   :  { %v71_v18 = vstv %s70_s24  ;;  %v97_v19 = vstv %s2378_s25  ;;  %v107_v20 = vstv %s2379_s28  ;;  %s2680_s21 = sld [smem:[#allocation5 + $0x4]] }
  0x15   :  { %v72_v21 = vadd.f32 %v71_v18, %v62_v9  ;;  %v73_v22 = vadd.f32 %v71_v18, %v63_v10  ;;  %v74_v23 = vadd.f32 %v71_v18, %v64_v11  ;;  %v75_v24 = vadd.f32 %v71_v18, %v65_v12  ;;  %s2682_s22 = sld [smem:[#allocation3 + $0x5]] }
  0x16   :  { %v76_v25 = vadd.f32 %v71_v18, %v66_v13  ;;  %v77_v26 = vadd.f32 %v71_v18, %v67_v14  ;;  %v78_v27 = vadd.f32 %v71_v18, %v68_v15  ;;  %v79_v28 = vadd.f32 %v71_v18, %v69_v16  ;;  %s2688_s23 = sld [smem:[#allocation5 + $0x5]] }
  0x17   :  { %v80_v29 = vmax.f32 %v72_v21, 0.0  ;;  %v81_v30 = vmax.f32 %v73_v22, 0.0  ;;  %v82_v31 = vmax.f32 %v74_v23, 0.0  ;;  %v83_v32 = vmax.f32 %v75_v24, 0.0  ;;  %s2706_s24 = sld [smem:[#allocation3 + $0x6]] }
  0x18   :  { %v84_v33 = vmax.f32 %v76_v25, 0.0  ;;  %v85_v34 = vmax.f32 %v77_v26, 0.0  ;;  %v86_v35 = vmax.f32 %v78_v27, 0.0  ;;  %v87_v36 = vmax.f32 %v79_v28, 0.0  ;;  %s2708_s25 = sld [smem:[#allocation5 + $0x6]] }
  0x19   :  { %v88_v37 = vadd.f32 %v80_v29, %v59_v17  ;;  %v89_v38 = vadd.f32 %v81_v30, %v59_v17  ;;  %v90_v39 = vadd.f32 %v82_v31, %v59_v17  ;;  %v91_v40 = vadd.f32 %v83_v32, %v59_v17  ;;  %s2710_s1 = sld [smem:[#allocation3 + $0x7]] }
  0x1a   :  { %v92_v41 = vadd.f32 %v84_v33, %v59_v17  ;;  %v93_v42 = vadd.f32 %v85_v34, %v59_v17  ;;  %v94_v43 = vadd.f32 %v86_v35, %v59_v17  ;;  %v95_v44 = vadd.f32 %v87_v36, %v59_v17  ;;  %s2716_s26 = sld [smem:[#allocation5 + $0x7]] }
  0x1b   :  { %v98_v45 = vmul.f32 %v97_v19, %v2602_v0  ;;  %v99_v46 = vmul.f32 %v97_v19, %v2607_v1  ;;  %v100_v47 = vmul.f32 %v97_v19, %v2612_v2  ;;  %v101_v48 = vmul.f32 %v97_v19, %v2617_v3  ;;  %s2734_s27 = sld [smem:[#allocation3 + $0x8]] }
  0x1c   :  { %v102_v49 = vmul.f32 %v97_v19, %v2622_v4  ;;  %v103_v50 = vmul.f32 %v97_v19, %v2627_v5  ;;  %v104_v51 = vmul.f32 %v97_v19, %v2632_v6  ;;  %v105_v52 = vmul.f32 %v97_v19, %v2637_v7  ;;  %s2736_s2 = sld [smem:[#allocation5 + $0x8]] }
  0x1d   :  { %v108_v53 = vadd.f32 %v107_v20, %v98_v45  ;;  %v109_v54 = vadd.f32 %v107_v20, %v99_v46  ;;  %v110_v55 = vadd.f32 %v107_v20, %v100_v47  ;;  %v111_v56 = vadd.f32 %v107_v20, %v101_v48  ;;  %s2738_s28 = sld [smem:[#allocation3 + $0x9]] }
  0x1e   :  { %v112_v57 = vadd.f32 %v107_v20, %v102_v49  ;;  %v113_v58 = vadd.f32 %v107_v20, %v103_v50  ;;  %v114_v59 = vadd.f32 %v107_v20, %v104_v51  ;;  %v115_v60 = vadd.f32 %v107_v20, %v105_v52  ;;  %s2744_s29 = sld [smem:[#allocation5 + $0x9]] }
  0x1f   :  { %v116_v61 = vmax.f32 %v108_v53, 0.0  ;;  %v117_v62 = vmax.f32 %v109_v54, 0.0  ;;  %v118_v63 = vmax.f32 %v110_v55, 0.0  ;;  %v119_v8 = vmax.f32 %v111_v56, 0.0  ;;  %s2762_s30 = sld [smem:[#allocation3 + $0xa]] }
  0x20   :  { %v120_v9 = vmax.f32 %v112_v57, 0.0  ;;  %v121_v10 = vmax.f32 %v113_v58, 0.0  ;;  %v122_v11 = vmax.f32 %v114_v59, 0.0  ;;  %v123_v12 = vmax.f32 %v115_v60, 0.0  ;;  %s2764_s5 = sld [smem:[#allocation5 + $0xa]] }
  0x21   :  { %v124_v13 = vadd.f32 %v116_v61, %v88_v37  ;;  %v125_v14 = vadd.f32 %v117_v62, %v89_v38  ;;  %v126_v15 = vadd.f32 %v118_v63, %v90_v39  ;;  %v127_v16 = vadd.f32 %v119_v8, %v91_v40  ;;  %s2766_s6 = sld [smem:[#allocation3 + $0xb]] }
  0x22   :  { %v128_v17 = vadd.f32 %v120_v9, %v92_v41  ;;  %v129_v18 = vadd.f32 %v121_v10, %v93_v42  ;;  %v130_v19 = vadd.f32 %v122_v11, %v94_v43  ;;  %v131_v20 = vadd.f32 %v123_v12, %v95_v44  ;;  %s2772_s7 = sld [smem:[#allocation5 + $0xb]] }
  0x23   :  { %v133_v21 = vstv %s2650_s3  ;;  %v143_v22 = vstv %s2652_s17  ;;  %v169_v23 = vstv %s2654_s18  ;;  %v179_v24 = vstv %s2660_s19  ;;  %s2790_s8 = sld [smem:[#allocation3 + $0xc]] }
  0x24   :  { %v134_v25 = vmul.f32 %v133_v21, %v2602_v0  ;;  %v135_v26 = vmul.f32 %v133_v21, %v2607_v1  ;;  %v136_v27 = vmul.f32 %v133_v21, %v2612_v2  ;;  %v137_v28 = vmul.f32 %v133_v21, %v2617_v3  ;;  %s2792_s9 = sld [smem:[#allocation5 + $0xc]] }
  0x25   :  { %v138_v29 = vmul.f32 %v133_v21, %v2622_v4  ;;  %v139_v30 = vmul.f32 %v133_v21, %v2627_v5  ;;  %v140_v31 = vmul.f32 %v133_v21, %v2632_v6  ;;  %v141_v32 = vmul.f32 %v133_v21, %v2637_v7  ;;  %s2794_s10 = sld [smem:[#allocation3 + $0xd]] }
  0x26   :  { %v144_v33 = vadd.f32 %v143_v22, %v134_v25  ;;  %v145_v34 = vadd.f32 %v143_v22, %v135_v26  ;;  %v146_v35 = vadd.f32 %v143_v22, %v136_v27  ;;  %v147_v36 = vadd.f32 %v143_v22, %v137_v28  ;;  %s2800_s11 = sld [smem:[#allocation5 + $0xd]] }
  0x27   :  { %v148_v37 = vadd.f32 %v143_v22, %v138_v29  ;;  %v149_v38 = vadd.f32 %v143_v22, %v139_v30  ;;  %v150_v39 = vadd.f32 %v143_v22, %v140_v31  ;;  %v151_v40 = vadd.f32 %v143_v22, %v141_v32  ;;  %s2818_s12 = sld [smem:[#allocation3 + $0xe]] }
  0x28   :  { %v152_v41 = vmax.f32 %v144_v33, 0.0  ;;  %v153_v42 = vmax.f32 %v145_v34, 0.0  ;;  %v154_v43 = vmax.f32 %v146_v35, 0.0  ;;  %v155_v44 = vmax.f32 %v147_v36, 0.0  ;;  %s2820_s13 = sld [smem:[#allocation5 + $0xe]] }
  0x29   :  { %v156_v45 = vmax.f32 %v148_v37, 0.0  ;;  %v157_v46 = vmax.f32 %v149_v38, 0.0  ;;  %v158_v47 = vmax.f32 %v150_v39, 0.0  ;;  %v159_v48 = vmax.f32 %v151_v40, 0.0  ;;  %s2822_s14 = sld [smem:[#allocation3 + $0xf]] }
  0x2a   :  { %v160_v49 = vadd.f32 %v152_v41, %v124_v13  ;;  %v161_v50 = vadd.f32 %v153_v42, %v125_v14  ;;  %v162_v51 = vadd.f32 %v154_v43, %v126_v15  ;;  %v163_v52 = vadd.f32 %v155_v44, %v127_v16  ;;  %s2828_s15 = sld [smem:[#allocation5 + $0xf]] }
  0x2b   :  { %v164_v53 = vadd.f32 %v156_v45, %v128_v17  ;;  %v165_v54 = vadd.f32 %v157_v46, %v129_v18  ;;  %v166_v55 = vadd.f32 %v158_v47, %v130_v19  ;;  %v167_v56 = vadd.f32 %v159_v48, %v131_v20  ;;  %s2972_s16 = sld [smem:[#allocation5 + $0x16]] }
  0x2c   :  { %v170_v57 = vmul.f32 %v169_v23, %v2602_v0  ;;  %v171_v58 = vmul.f32 %v169_v23, %v2607_v1  ;;  %v172_v59 = vmul.f32 %v169_v23, %v2612_v2  ;;  %v173_v60 = vmul.f32 %v169_v23, %v2617_v3  ;;  %s2974_s3 = sld [smem:[#allocation3 + $0x17]] }
  0x2d   :  { %v174_v61 = vmul.f32 %v169_v23, %v2622_v4  ;;  %v175_v62 = vmul.f32 %v169_v23, %v2627_v5  ;;  %v176_v63 = vmul.f32 %v169_v23, %v2632_v6  ;;  %v177_v8 = vmul.f32 %v169_v23, %v2637_v7  ;;  %s2980_s17 = sld [smem:[#allocation5 + $0x17]] }
  0x2e   :  { %v180_v9 = vadd.f32 %v179_v24, %v170_v57  ;;  %v181_v10 = vadd.f32 %v179_v24, %v171_v58  ;;  %v182_v11 = vadd.f32 %v179_v24, %v172_v59  ;;  %v183_v12 = vadd.f32 %v179_v24, %v173_v60  ;;  %s2998_s18 = sld [smem:[#allocation3 + $0x18]] }
  0x2f   :  { %v184_v13 = vadd.f32 %v179_v24, %v174_v61  ;;  %v185_v14 = vadd.f32 %v179_v24, %v175_v62  ;;  %v186_v15 = vadd.f32 %v179_v24, %v176_v63  ;;  %v187_v16 = vadd.f32 %v179_v24, %v177_v8  ;;  %s3000_s19 = sld [smem:[#allocation5 + $0x18]] }
  0x30   :  { %v188_v17 = vmax.f32 %v180_v9, 0.0  ;;  %v189_v18 = vmax.f32 %v181_v10, 0.0  ;;  %v190_v19 = vmax.f32 %v182_v11, 0.0  ;;  %v191_v20 = vmax.f32 %v183_v12, 0.0 }
  0x31   :  { %v192_v21 = vmax.f32 %v184_v13, 0.0  ;;  %v193_v22 = vmax.f32 %v185_v14, 0.0  ;;  %v194_v25 = vmax.f32 %v186_v15, 0.0  ;;  %v195_v23 = vmax.f32 %v187_v16, 0.0 }
  0x32   :  { %v196_v26 = vadd.f32 %v188_v17, %v160_v49  ;;  %v197_v27 = vadd.f32 %v189_v18, %v161_v50  ;;  %v198_v28 = vadd.f32 %v190_v19, %v162_v51  ;;  %v199_v29 = vadd.f32 %v191_v20, %v163_v52 }
  0x33   :  { %v200_v30 = vadd.f32 %v192_v21, %v164_v53  ;;  %v201_v31 = vadd.f32 %v193_v22, %v165_v54  ;;  %v202_v32 = vadd.f32 %v194_v25, %v166_v55  ;;  %v203_v24 = vadd.f32 %v195_v23, %v167_v56 }
  0x34   :  { %v205_v33 = vstv %s2678_s20  ;;  %v215_v34 = vstv %s2680_s21  ;;  %v241_v35 = vstv %s2682_s22  ;;  %v251_v36 = vstv %s2688_s23  ;;  %s3002_s20 = sld [smem:[#allocation3 + $0x19]] }
  0x35   :  { %v206_v37 = vmul.f32 %v205_v33, %v2602_v0  ;;  %v207_v38 = vmul.f32 %v205_v33, %v2607_v1  ;;  %v208_v39 = vmul.f32 %v205_v33, %v2612_v2  ;;  %v209_v40 = vmul.f32 %v205_v33, %v2617_v3  ;;  %s3008_s21 = sld [smem:[#allocation5 + $0x19]] }
  0x36   :  { %v210_v41 = vmul.f32 %v205_v33, %v2622_v4  ;;  %v211_v42 = vmul.f32 %v205_v33, %v2627_v5  ;;  %v212_v43 = vmul.f32 %v205_v33, %v2632_v6  ;;  %v213_v44 = vmul.f32 %v205_v33, %v2637_v7  ;;  %s3026_s22 = sld [smem:[#allocation3 + $0x1a]] }
  0x37   :  { %v216_v45 = vadd.f32 %v215_v34, %v206_v37  ;;  %v217_v46 = vadd.f32 %v215_v34, %v207_v38  ;;  %v218_v47 = vadd.f32 %v215_v34, %v208_v39  ;;  %v219_v48 = vadd.f32 %v215_v34, %v209_v40  ;;  %s3028_s23 = sld [smem:[#allocation5 + $0x1a]] }
  0x38   :  { %v220_v49 = vadd.f32 %v215_v34, %v210_v41  ;;  %v221_v50 = vadd.f32 %v215_v34, %v211_v42  ;;  %v222_v51 = vadd.f32 %v215_v34, %v212_v43  ;;  %v223_v52 = vadd.f32 %v215_v34, %v213_v44 }
  0x39   :  { %v224_v53 = vmax.f32 %v216_v45, 0.0  ;;  %v225_v54 = vmax.f32 %v217_v46, 0.0  ;;  %v226_v55 = vmax.f32 %v218_v47, 0.0  ;;  %v227_v56 = vmax.f32 %v219_v48, 0.0 }
  0x3a   :  { %v228_v57 = vmax.f32 %v220_v49, 0.0  ;;  %v229_v58 = vmax.f32 %v221_v50, 0.0  ;;  %v230_v59 = vmax.f32 %v222_v51, 0.0  ;;  %v231_v60 = vmax.f32 %v223_v52, 0.0 }
  0x3b   :  { %v232_v61 = vadd.f32 %v224_v53, %v196_v26  ;;  %v233_v62 = vadd.f32 %v225_v54, %v197_v27  ;;  %v234_v63 = vadd.f32 %v226_v55, %v198_v28  ;;  %v235_v8 = vadd.f32 %v227_v56, %v199_v29 }
  0x3c   :  { %v236_v9 = vadd.f32 %v228_v57, %v200_v30  ;;  %v237_v10 = vadd.f32 %v229_v58, %v201_v31  ;;  %v238_v11 = vadd.f32 %v230_v59, %v202_v32  ;;  %v239_v12 = vadd.f32 %v231_v60, %v203_v24 }
  0x3d   :  { %v242_v13 = vmul.f32 %v241_v35, %v2602_v0  ;;  %v243_v14 = vmul.f32 %v241_v35, %v2607_v1  ;;  %v244_v15 = vmul.f32 %v241_v35, %v2612_v2  ;;  %v245_v16 = vmul.f32 %v241_v35, %v2617_v3 }
  0x3e   :  { %v246_v17 = vmul.f32 %v241_v35, %v2622_v4  ;;  %v247_v18 = vmul.f32 %v241_v35, %v2627_v5  ;;  %v248_v19 = vmul.f32 %v241_v35, %v2632_v6  ;;  %v249_v20 = vmul.f32 %v241_v35, %v2637_v7 }
  0x3f   :  { %v252_v21 = vadd.f32 %v251_v36, %v242_v13  ;;  %v253_v22 = vadd.f32 %v251_v36, %v243_v14  ;;  %v254_v25 = vadd.f32 %v251_v36, %v244_v15  ;;  %v255_v23 = vadd.f32 %v251_v36, %v245_v16 }
  0x40   :  { %v256_v26 = vadd.f32 %v251_v36, %v246_v17  ;;  %v257_v27 = vadd.f32 %v251_v36, %v247_v18  ;;  %v258_v28 = vadd.f32 %v251_v36, %v248_v19  ;;  %v259_v29 = vadd.f32 %v251_v36, %v249_v20 }
  0x41   :  { %v260_v30 = vmax.f32 %v252_v21, 0.0  ;;  %v261_v31 = vmax.f32 %v253_v22, 0.0  ;;  %v262_v32 = vmax.f32 %v254_v25, 0.0  ;;  %v263_v24 = vmax.f32 %v255_v23, 0.0 }
  0x42   :  { %v264_v33 = vmax.f32 %v256_v26, 0.0  ;;  %v265_v34 = vmax.f32 %v257_v27, 0.0  ;;  %v266_v37 = vmax.f32 %v258_v28, 0.0  ;;  %v267_v35 = vmax.f32 %v259_v29, 0.0 }
  0x43   :  { %v268_v38 = vadd.f32 %v260_v30, %v232_v61  ;;  %v269_v39 = vadd.f32 %v261_v31, %v233_v62  ;;  %v270_v40 = vadd.f32 %v262_v32, %v234_v63  ;;  %v271_v41 = vadd.f32 %v263_v24, %v235_v8 }
  0x44   :  { %v272_v42 = vadd.f32 %v264_v33, %v236_v9  ;;  %v273_v43 = vadd.f32 %v265_v34, %v237_v10  ;;  %v274_v44 = vadd.f32 %v266_v37, %v238_v11  ;;  %v275_v36 = vadd.f32 %v267_v35, %v239_v12 }
  0x45   :  { %v277_v45 = vstv %s2706_s24  ;;  %v287_v46 = vstv %s2708_s25  ;;  %v313_v47 = vstv %s2710_s1  ;;  %v323_v48 = vstv %s2716_s26  ;;  %s3030_s24 = sld [smem:[#allocation3 + $0x1b]] }
  0x46   :  { %v278_v49 = vmul.f32 %v277_v45, %v2602_v0  ;;  %v279_v50 = vmul.f32 %v277_v45, %v2607_v1  ;;  %v280_v51 = vmul.f32 %v277_v45, %v2612_v2  ;;  %v281_v52 = vmul.f32 %v277_v45, %v2617_v3  ;;  %s3036_s25 = sld [smem:[#allocation5 + $0x1b]] }
  0x47   :  { %v282_v53 = vmul.f32 %v277_v45, %v2622_v4  ;;  %v283_v54 = vmul.f32 %v277_v45, %v2627_v5  ;;  %v284_v55 = vmul.f32 %v277_v45, %v2632_v6  ;;  %v285_v56 = vmul.f32 %v277_v45, %v2637_v7  ;;  %s3054_s1 = sld [smem:[#allocation3 + $0x1c]] }
  0x48   :  { %v288_v57 = vadd.f32 %v287_v46, %v278_v49  ;;  %v289_v58 = vadd.f32 %v287_v46, %v279_v50  ;;  %v290_v59 = vadd.f32 %v287_v46, %v280_v51  ;;  %v291_v60 = vadd.f32 %v287_v46, %v281_v52  ;;  %s3056_s26 = sld [smem:[#allocation5 + $0x1c]] }
  0x49   :  { %v292_v61 = vadd.f32 %v287_v46, %v282_v53  ;;  %v293_v62 = vadd.f32 %v287_v46, %v283_v54  ;;  %v294_v63 = vadd.f32 %v287_v46, %v284_v55  ;;  %v295_v8 = vadd.f32 %v287_v46, %v285_v56 }
  0x4a   :  { %v296_v9 = vmax.f32 %v288_v57, 0.0  ;;  %v297_v10 = vmax.f32 %v289_v58, 0.0  ;;  %v298_v11 = vmax.f32 %v290_v59, 0.0  ;;  %v299_v12 = vmax.f32 %v291_v60, 0.0 }
  0x4b   :  { %v300_v13 = vmax.f32 %v292_v61, 0.0  ;;  %v301_v14 = vmax.f32 %v293_v62, 0.0  ;;  %v302_v15 = vmax.f32 %v294_v63, 0.0  ;;  %v303_v16 = vmax.f32 %v295_v8, 0.0 }
  0x4c   :  { %v304_v17 = vadd.f32 %v296_v9, %v268_v38  ;;  %v305_v18 = vadd.f32 %v297_v10, %v269_v39  ;;  %v306_v19 = vadd.f32 %v298_v11, %v270_v40  ;;  %v307_v20 = vadd.f32 %v299_v12, %v271_v41 }
  0x4d   :  { %v308_v21 = vadd.f32 %v300_v13, %v272_v42  ;;  %v309_v22 = vadd.f32 %v301_v14, %v273_v43  ;;  %v310_v25 = vadd.f32 %v302_v15, %v274_v44  ;;  %v311_v23 = vadd.f32 %v303_v16, %v275_v36 }
  0x4e   :  { %v314_v26 = vmul.f32 %v313_v47, %v2602_v0  ;;  %v315_v27 = vmul.f32 %v313_v47, %v2607_v1  ;;  %v316_v28 = vmul.f32 %v313_v47, %v2612_v2  ;;  %v317_v29 = vmul.f32 %v313_v47, %v2617_v3 }
  0x4f   :  { %v318_v30 = vmul.f32 %v313_v47, %v2622_v4  ;;  %v319_v31 = vmul.f32 %v313_v47, %v2627_v5  ;;  %v320_v32 = vmul.f32 %v313_v47, %v2632_v6  ;;  %v321_v24 = vmul.f32 %v313_v47, %v2637_v7 }
  0x50   :  { %v324_v33 = vadd.f32 %v323_v48, %v314_v26  ;;  %v325_v34 = vadd.f32 %v323_v48, %v315_v27  ;;  %v326_v37 = vadd.f32 %v323_v48, %v316_v28  ;;  %v327_v35 = vadd.f32 %v323_v48, %v317_v29 }
  0x51   :  { %v328_v38 = vadd.f32 %v323_v48, %v318_v30  ;;  %v329_v39 = vadd.f32 %v323_v48, %v319_v31  ;;  %v330_v40 = vadd.f32 %v323_v48, %v320_v32  ;;  %v331_v41 = vadd.f32 %v323_v48, %v321_v24 }
  0x52   :  { %v332_v42 = vmax.f32 %v324_v33, 0.0  ;;  %v333_v43 = vmax.f32 %v325_v34, 0.0  ;;  %v334_v44 = vmax.f32 %v326_v37, 0.0  ;;  %v335_v36 = vmax.f32 %v327_v35, 0.0 }
  0x53   :  { %v336_v45 = vmax.f32 %v328_v38, 0.0  ;;  %v337_v46 = vmax.f32 %v329_v39, 0.0  ;;  %v338_v49 = vmax.f32 %v330_v40, 0.0  ;;  %v339_v47 = vmax.f32 %v331_v41, 0.0 }
  0x54   :  { %v340_v50 = vadd.f32 %v332_v42, %v304_v17  ;;  %v341_v51 = vadd.f32 %v333_v43, %v305_v18  ;;  %v342_v52 = vadd.f32 %v334_v44, %v306_v19  ;;  %v343_v53 = vadd.f32 %v335_v36, %v307_v20 }
  0x55   :  { %v344_v54 = vadd.f32 %v336_v45, %v308_v21  ;;  %v345_v55 = vadd.f32 %v337_v46, %v309_v22  ;;  %v346_v56 = vadd.f32 %v338_v49, %v310_v25  ;;  %v347_v48 = vadd.f32 %v339_v47, %v311_v23 }
  0x56   :  { %v349_v57 = vstv %s2734_s27  ;;  %v359_v58 = vstv %s2736_s2  ;;  %v385_v59 = vstv %s2738_s28  ;;  %v395_v60 = vstv %s2744_s29  ;;  %s2886_s29 = sld [smem:[#allocation3 + $0x10]] }
  0x57   :  { %v350_v61 = vmul.f32 %v349_v57, %v2602_v0  ;;  %v351_v62 = vmul.f32 %v349_v57, %v2607_v1  ;;  %v352_v63 = vmul.f32 %v349_v57, %v2612_v2  ;;  %v353_v8 = vmul.f32 %v349_v57, %v2617_v3  ;;  %s3058_s27 = sld [smem:[#allocation3 + $0x1d]] }
  0x58   :  { %v354_v9 = vmul.f32 %v349_v57, %v2622_v4  ;;  %v355_v10 = vmul.f32 %v349_v57, %v2627_v5  ;;  %v356_v11 = vmul.f32 %v349_v57, %v2632_v6  ;;  %v357_v12 = vmul.f32 %v349_v57, %v2637_v7  ;;  %s3064_s2 = sld [smem:[#allocation5 + $0x1d]] }
  0x59   :  { %v360_v13 = vadd.f32 %v359_v58, %v350_v61  ;;  %v361_v14 = vadd.f32 %v359_v58, %v351_v62  ;;  %v362_v15 = vadd.f32 %v359_v58, %v352_v63  ;;  %v363_v16 = vadd.f32 %v359_v58, %v353_v8  ;;  %s3082_s28 = sld [smem:[#allocation3 + $0x1e]] }
  0x5a   :  { %v364_v17 = vadd.f32 %v359_v58, %v354_v9  ;;  %v365_v18 = vadd.f32 %v359_v58, %v355_v10  ;;  %v366_v19 = vadd.f32 %v359_v58, %v356_v11  ;;  %v367_v20 = vadd.f32 %v359_v58, %v357_v12 }
  0x5b   :  { %v368_v21 = vmax.f32 %v360_v13, 0.0  ;;  %v369_v22 = vmax.f32 %v361_v14, 0.0  ;;  %v370_v25 = vmax.f32 %v362_v15, 0.0  ;;  %v371_v23 = vmax.f32 %v363_v16, 0.0 }
  0x5c   :  { %v372_v26 = vmax.f32 %v364_v17, 0.0  ;;  %v373_v27 = vmax.f32 %v365_v18, 0.0  ;;  %v374_v28 = vmax.f32 %v366_v19, 0.0  ;;  %v375_v29 = vmax.f32 %v367_v20, 0.0 }
  0x5d   :  { %v376_v30 = vadd.f32 %v368_v21, %v340_v50  ;;  %v377_v31 = vadd.f32 %v369_v22, %v341_v51  ;;  %v378_v32 = vadd.f32 %v370_v25, %v342_v52  ;;  %v379_v24 = vadd.f32 %v371_v23, %v343_v53 }
  0x5e   :  { %v380_v33 = vadd.f32 %v372_v26, %v344_v54  ;;  %v381_v34 = vadd.f32 %v373_v27, %v345_v55  ;;  %v382_v37 = vadd.f32 %v374_v28, %v346_v56  ;;  %v383_v35 = vadd.f32 %v375_v29, %v347_v48 }
  0x5f   :  { %v386_v38 = vmul.f32 %v385_v59, %v2602_v0  ;;  %v387_v39 = vmul.f32 %v385_v59, %v2607_v1  ;;  %v388_v40 = vmul.f32 %v385_v59, %v2612_v2  ;;  %v389_v41 = vmul.f32 %v385_v59, %v2617_v3 }
  0x60   :  { %v390_v42 = vmul.f32 %v385_v59, %v2622_v4  ;;  %v391_v43 = vmul.f32 %v385_v59, %v2627_v5  ;;  %v392_v44 = vmul.f32 %v385_v59, %v2632_v6  ;;  %v393_v36 = vmul.f32 %v385_v59, %v2637_v7 }
  0x61   :  { %v396_v45 = vadd.f32 %v395_v60, %v386_v38  ;;  %v397_v46 = vadd.f32 %v395_v60, %v387_v39  ;;  %v398_v49 = vadd.f32 %v395_v60, %v388_v40  ;;  %v399_v47 = vadd.f32 %v395_v60, %v389_v41 }
  0x62   :  { %v400_v50 = vadd.f32 %v395_v60, %v390_v42  ;;  %v401_v51 = vadd.f32 %v395_v60, %v391_v43  ;;  %v402_v52 = vadd.f32 %v395_v60, %v392_v44  ;;  %v403_v53 = vadd.f32 %v395_v60, %v393_v36 }
  0x63   :  { %v404_v54 = vmax.f32 %v396_v45, 0.0  ;;  %v405_v55 = vmax.f32 %v397_v46, 0.0  ;;  %v406_v56 = vmax.f32 %v398_v49, 0.0  ;;  %v407_v48 = vmax.f32 %v399_v47, 0.0 }
  0x64   :  { %v408_v57 = vmax.f32 %v400_v50, 0.0  ;;  %v409_v58 = vmax.f32 %v401_v51, 0.0  ;;  %v410_v61 = vmax.f32 %v402_v52, 0.0  ;;  %v411_v59 = vmax.f32 %v403_v53, 0.0 }
  0x65   :  { %v412_v62 = vadd.f32 %v404_v54, %v376_v30  ;;  %v413_v63 = vadd.f32 %v405_v55, %v377_v31  ;;  %v414_v8 = vadd.f32 %v406_v56, %v378_v32  ;;  %v415_v9 = vadd.f32 %v407_v48, %v379_v24 }
  0x66   :  { %v416_v10 = vadd.f32 %v408_v57, %v380_v33  ;;  %v417_v11 = vadd.f32 %v409_v58, %v381_v34  ;;  %v418_v12 = vadd.f32 %v410_v61, %v382_v37  ;;  %v419_v60 = vadd.f32 %v411_v59, %v383_v35 }
  0x67   :  { %v421_v13 = vstv %s2762_s30  ;;  %v431_v14 = vstv %s2764_s5  ;;  %v457_v15 = vstv %s2766_s6  ;;  %v467_v16 = vstv %s2772_s7  ;;  %s2888_s30 = sld [smem:[#allocation5 + $0x10]] }
  0x68   :  { %v422_v17 = vmul.f32 %v421_v13, %v2602_v0  ;;  %v423_v18 = vmul.f32 %v421_v13, %v2607_v1  ;;  %v424_v19 = vmul.f32 %v421_v13, %v2612_v2  ;;  %v425_v20 = vmul.f32 %v421_v13, %v2617_v3  ;;  %s2890_s5 = sld [smem:[#allocation3 + $0x11]] }
  0x69   :  { %v426_v21 = vmul.f32 %v421_v13, %v2622_v4  ;;  %v427_v22 = vmul.f32 %v421_v13, %v2627_v5  ;;  %v428_v25 = vmul.f32 %v421_v13, %v2632_v6  ;;  %v429_v23 = vmul.f32 %v421_v13, %v2637_v7  ;;  %s2896_s6 = sld [smem:[#allocation5 + $0x11]] }
  0x6a   :  { %v432_v26 = vadd.f32 %v431_v14, %v422_v17  ;;  %v433_v27 = vadd.f32 %v431_v14, %v423_v18  ;;  %v434_v28 = vadd.f32 %v431_v14, %v424_v19  ;;  %v435_v29 = vadd.f32 %v431_v14, %v425_v20  ;;  %s2914_s7 = sld [smem:[#allocation3 + $0x12]] }
  0x6b   :  { %v436_v30 = vadd.f32 %v431_v14, %v426_v21  ;;  %v437_v31 = vadd.f32 %v431_v14, %v427_v22  ;;  %v438_v32 = vadd.f32 %v431_v14, %v428_v25  ;;  %v439_v24 = vadd.f32 %v431_v14, %v429_v23 }
  0x6c   :  { %v440_v33 = vmax.f32 %v432_v26, 0.0  ;;  %v441_v34 = vmax.f32 %v433_v27, 0.0  ;;  %v442_v37 = vmax.f32 %v434_v28, 0.0  ;;  %v443_v35 = vmax.f32 %v435_v29, 0.0 }
  0x6d   :  { %v444_v38 = vmax.f32 %v436_v30, 0.0  ;;  %v445_v39 = vmax.f32 %v437_v31, 0.0  ;;  %v446_v40 = vmax.f32 %v438_v32, 0.0  ;;  %v447_v41 = vmax.f32 %v439_v24, 0.0 }
  0x6e   :  { %v448_v42 = vadd.f32 %v440_v33, %v412_v62  ;;  %v449_v43 = vadd.f32 %v441_v34, %v413_v63  ;;  %v450_v44 = vadd.f32 %v442_v37, %v414_v8  ;;  %v451_v36 = vadd.f32 %v443_v35, %v415_v9 }
  0x6f   :  { %v452_v45 = vadd.f32 %v444_v38, %v416_v10  ;;  %v453_v46 = vadd.f32 %v445_v39, %v417_v11  ;;  %v454_v49 = vadd.f32 %v446_v40, %v418_v12  ;;  %v455_v47 = vadd.f32 %v447_v41, %v419_v60 }
  0x70   :  { %v458_v50 = vmul.f32 %v457_v15, %v2602_v0  ;;  %v459_v51 = vmul.f32 %v457_v15, %v2607_v1  ;;  %v460_v52 = vmul.f32 %v457_v15, %v2612_v2  ;;  %v461_v53 = vmul.f32 %v457_v15, %v2617_v3 }
  0x71   :  { %v462_v54 = vmul.f32 %v457_v15, %v2622_v4  ;;  %v463_v55 = vmul.f32 %v457_v15, %v2627_v5  ;;  %v464_v56 = vmul.f32 %v457_v15, %v2632_v6  ;;  %v465_v48 = vmul.f32 %v457_v15, %v2637_v7 }
  0x72   :  { %v468_v57 = vadd.f32 %v467_v16, %v458_v50  ;;  %v469_v58 = vadd.f32 %v467_v16, %v459_v51  ;;  %v470_v61 = vadd.f32 %v467_v16, %v460_v52  ;;  %v471_v59 = vadd.f32 %v467_v16, %v461_v53 }
  0x73   :  { %v472_v62 = vadd.f32 %v467_v16, %v462_v54  ;;  %v473_v63 = vadd.f32 %v467_v16, %v463_v55  ;;  %v474_v8 = vadd.f32 %v467_v16, %v464_v56  ;;  %v475_v9 = vadd.f32 %v467_v16, %v465_v48 }
  0x74   :  { %v476_v10 = vmax.f32 %v468_v57, 0.0  ;;  %v477_v11 = vmax.f32 %v469_v58, 0.0  ;;  %v478_v12 = vmax.f32 %v470_v61, 0.0  ;;  %v479_v60 = vmax.f32 %v471_v59, 0.0 }
  0x75   :  { %v480_v13 = vmax.f32 %v472_v62, 0.0  ;;  %v481_v14 = vmax.f32 %v473_v63, 0.0  ;;  %v482_v17 = vmax.f32 %v474_v8, 0.0  ;;  %v483_v15 = vmax.f32 %v475_v9, 0.0 }
  0x76   :  { %v484_v18 = vadd.f32 %v476_v10, %v448_v42  ;;  %v485_v19 = vadd.f32 %v477_v11, %v449_v43  ;;  %v486_v20 = vadd.f32 %v478_v12, %v450_v44  ;;  %v487_v21 = vadd.f32 %v479_v60, %v451_v36 }
  0x77   :  { %v488_v22 = vadd.f32 %v480_v13, %v452_v45  ;;  %v489_v25 = vadd.f32 %v481_v14, %v453_v46  ;;  %v490_v23 = vadd.f32 %v482_v17, %v454_v49  ;;  %v491_v16 = vadd.f32 %v483_v15, %v455_v47 }
  0x78   :  { %v493_v26 = vstv %s2790_s8  ;;  %v503_v27 = vstv %s2792_s9  ;;  %v529_v28 = vstv %s2794_s10  ;;  %v539_v29 = vstv %s2800_s11  ;;  %s2916_s8 = sld [smem:[#allocation5 + $0x12]] }
  0x79   :  { %v494_v30 = vmul.f32 %v493_v26, %v2602_v0  ;;  %v495_v31 = vmul.f32 %v493_v26, %v2607_v1  ;;  %v496_v32 = vmul.f32 %v493_v26, %v2612_v2  ;;  %v497_v24 = vmul.f32 %v493_v26, %v2617_v3  ;;  %s2918_s9 = sld [smem:[#allocation3 + $0x13]] }
  0x7a   :  { %v498_v33 = vmul.f32 %v493_v26, %v2622_v4  ;;  %v499_v34 = vmul.f32 %v493_v26, %v2627_v5  ;;  %v500_v37 = vmul.f32 %v493_v26, %v2632_v6  ;;  %v501_v35 = vmul.f32 %v493_v26, %v2637_v7  ;;  %s2924_s10 = sld [smem:[#allocation5 + $0x13]] }
  0x7b   :  { %v504_v38 = vadd.f32 %v503_v27, %v494_v30  ;;  %v505_v39 = vadd.f32 %v503_v27, %v495_v31  ;;  %v506_v40 = vadd.f32 %v503_v27, %v496_v32  ;;  %v507_v41 = vadd.f32 %v503_v27, %v497_v24  ;;  %s2942_s11 = sld [smem:[#allocation3 + $0x14]] }
  0x7c   :  { %v508_v42 = vadd.f32 %v503_v27, %v498_v33  ;;  %v509_v43 = vadd.f32 %v503_v27, %v499_v34  ;;  %v510_v44 = vadd.f32 %v503_v27, %v500_v37  ;;  %v511_v36 = vadd.f32 %v503_v27, %v501_v35  ;;  %v2841_v33 = vld [vmem:[%s3710_s0] sm:$0xff]  ;;  %v2847_v37 = vld [vmem:[%s3710_s0 + $0x8] sm:$0xff] }
  0x7d   :  { %v512_v45 = vmax.f32 %v504_v38, 0.0  ;;  %v513_v46 = vmax.f32 %v505_v39, 0.0  ;;  %v514_v49 = vmax.f32 %v506_v40, 0.0  ;;  %v515_v47 = vmax.f32 %v507_v41, 0.0  ;;  %v2853_v38 = vld [vmem:[%s3710_s0 + $0x10] sm:$0xff]  ;;  %v2859_v40 = vld [vmem:[%s3710_s0 + $0x18] sm:$0xff] }
  0x7e   :  { %v516_v50 = vmax.f32 %v508_v42, 0.0  ;;  %v517_v51 = vmax.f32 %v509_v43, 0.0  ;;  %v518_v52 = vmax.f32 %v510_v44, 0.0  ;;  %v519_v53 = vmax.f32 %v511_v36, 0.0  ;;  %v2865_v42 = vld [vmem:[%s3710_s0 + $0x20] sm:$0xff]  ;;  %v2871_v44 = vld [vmem:[%s3710_s0 + $0x28] sm:$0xff] }
  0x7f   :  { %v520_v54 = vadd.f32 %v512_v45, %v484_v18  ;;  %v521_v55 = vadd.f32 %v513_v46, %v485_v19  ;;  %v522_v56 = vadd.f32 %v514_v49, %v486_v20  ;;  %v523_v48 = vadd.f32 %v515_v47, %v487_v21  ;;  %v2877_v45 = vld [vmem:[%s3710_s0 + $0x30] sm:$0xff]  ;;  %v2883_v49 = vld [vmem:[%s3710_s0 + $0x38] sm:$0xff] }
  0x80   :  { %v524_v57 = vadd.f32 %v516_v50, %v488_v22  ;;  %v525_v58 = vadd.f32 %v517_v51, %v489_v25  ;;  %v526_v61 = vadd.f32 %v518_v52, %v490_v23  ;;  %v527_v59 = vadd.f32 %v519_v53, %v491_v16 }
  0x81   :  { %v530_v62 = vmul.f32 %v529_v28, %v2602_v0  ;;  %v531_v63 = vmul.f32 %v529_v28, %v2607_v1  ;;  %v532_v8 = vmul.f32 %v529_v28, %v2612_v2  ;;  %v533_v9 = vmul.f32 %v529_v28, %v2617_v3 }
  0x82   :  { %v534_v10 = vmul.f32 %v529_v28, %v2622_v4  ;;  %v535_v11 = vmul.f32 %v529_v28, %v2627_v5  ;;  %v536_v12 = vmul.f32 %v529_v28, %v2632_v6  ;;  %v537_v60 = vmul.f32 %v529_v28, %v2637_v7 }
  0x83   :  { %v540_v13 = vadd.f32 %v539_v29, %v530_v62  ;;  %v541_v14 = vadd.f32 %v539_v29, %v531_v63  ;;  %v542_v17 = vadd.f32 %v539_v29, %v532_v8  ;;  %v543_v0 = vadd.f32 %v539_v29, %v533_v9 }
  0x84   :  { %v544_v15 = vadd.f32 %v539_v29, %v534_v10  ;;  %v545_v1 = vadd.f32 %v539_v29, %v535_v11  ;;  %v546_v18 = vadd.f32 %v539_v29, %v536_v12  ;;  %v547_v2 = vadd.f32 %v539_v29, %v537_v60 }
  0x85   :  { %v548_v19 = vmax.f32 %v540_v13, 0.0  ;;  %v549_v3 = vmax.f32 %v541_v14, 0.0  ;;  %v550_v20 = vmax.f32 %v542_v17, 0.0  ;;  %v551_v4 = vmax.f32 %v543_v0, 0.0 }
  0x86   :  { %v552_v5 = vmax.f32 %v544_v15, 0.0  ;;  %v553_v6 = vmax.f32 %v545_v1, 0.0  ;;  %v554_v21 = vmax.f32 %v546_v18, 0.0  ;;  %v555_v7 = vmax.f32 %v547_v2, 0.0 }
  0x87   :  { %v556_v22 = vadd.f32 %v548_v19, %v520_v54  ;;  %v557_v25 = vadd.f32 %v549_v3, %v521_v55  ;;  %v558_v23 = vadd.f32 %v550_v20, %v522_v56  ;;  %v559_v16 = vadd.f32 %v551_v4, %v523_v48 }
  0x88   :  { %v560_v26 = vadd.f32 %v552_v5, %v524_v57  ;;  %v561_v27 = vadd.f32 %v553_v6, %v525_v58  ;;  %v562_v28 = vadd.f32 %v554_v21, %v526_v61  ;;  %v563_v29 = vadd.f32 %v555_v7, %v527_v59 }
  0x89   :  { %v565_v30 = vstv %s2818_s12  ;;  %v575_v31 = vstv %s2820_s13  ;;  %v601_v32 = vstv %s2822_s14  ;;  %v611_v24 = vstv %s2828_s15  ;;  %s2944_s12 = sld [smem:[#allocation5 + $0x14]] }
  0x8a   :  { %v566_v34 = vmul.f32 %v2841_v33, %v565_v30  ;;  %v567_v35 = vmul.f32 %v2847_v37, %v565_v30  ;;  %v568_v39 = vmul.f32 %v2853_v38, %v565_v30  ;;  %v569_v41 = vmul.f32 %v2859_v40, %v565_v30  ;;  %s2946_s13 = sld [smem:[#allocation3 + $0x15]] }
  0x8b   :  { %v570_v43 = vmul.f32 %v2865_v42, %v565_v30  ;;  %v571_v36 = vmul.f32 %v2871_v44, %v565_v30  ;;  %v572_v46 = vmul.f32 %v2877_v45, %v565_v30  ;;  %v573_v47 = vmul.f32 %v2883_v49, %v565_v30  ;;  %s2952_s14 = sld [smem:[#allocation5 + $0x15]] }
  0x8c   :  { %v576_v50 = vadd.f32 %v575_v31, %v566_v34  ;;  %v577_v51 = vadd.f32 %v575_v31, %v567_v35  ;;  %v578_v52 = vadd.f32 %v575_v31, %v568_v39  ;;  %v579_v53 = vadd.f32 %v575_v31, %v569_v41  ;;  %s2970_s15 = sld [smem:[#allocation3 + $0x16]] }
  0x8d   :  { %v580_v54 = vadd.f32 %v575_v31, %v570_v43  ;;  %v581_v55 = vadd.f32 %v575_v31, %v571_v36  ;;  %v582_v56 = vadd.f32 %v575_v31, %v572_v46  ;;  %v583_v48 = vadd.f32 %v575_v31, %v573_v47 }
  0x8e   :  { %v584_v57 = vmax.f32 %v576_v50, 0.0  ;;  %v585_v58 = vmax.f32 %v577_v51, 0.0  ;;  %v586_v61 = vmax.f32 %v578_v52, 0.0  ;;  %v587_v59 = vmax.f32 %v579_v53, 0.0 }
  0x8f   :  { %v588_v62 = vmax.f32 %v580_v54, 0.0  ;;  %v589_v63 = vmax.f32 %v581_v55, 0.0  ;;  %v590_v8 = vmax.f32 %v582_v56, 0.0  ;;  %v591_v9 = vmax.f32 %v583_v48, 0.0 }
  0x90   :  { %v592_v10 = vadd.f32 %v584_v57, %v556_v22  ;;  %v593_v11 = vadd.f32 %v585_v58, %v557_v25  ;;  %v594_v12 = vadd.f32 %v586_v61, %v558_v23  ;;  %v595_v60 = vadd.f32 %v587_v59, %v559_v16 }
  0x91   :  { %v596_v13 = vadd.f32 %v588_v62, %v560_v26  ;;  %v597_v14 = vadd.f32 %v589_v63, %v561_v27  ;;  %v598_v17 = vadd.f32 %v590_v8, %v562_v28  ;;  %v599_v0 = vadd.f32 %v591_v9, %v563_v29 }
  0x92   :  { %v602_v15 = vmul.f32 %v2841_v33, %v601_v32  ;;  %v603_v1 = vmul.f32 %v2847_v37, %v601_v32  ;;  %v604_v18 = vmul.f32 %v2853_v38, %v601_v32  ;;  %v605_v2 = vmul.f32 %v2859_v40, %v601_v32 }
  0x93   :  { %v606_v19 = vmul.f32 %v2865_v42, %v601_v32  ;;  %v607_v3 = vmul.f32 %v2871_v44, %v601_v32  ;;  %v608_v20 = vmul.f32 %v2877_v45, %v601_v32  ;;  %v609_v4 = vmul.f32 %v2883_v49, %v601_v32 }
  0x94   :  { %v612_v5 = vadd.f32 %v611_v24, %v602_v15  ;;  %v613_v6 = vadd.f32 %v611_v24, %v603_v1  ;;  %v614_v21 = vadd.f32 %v611_v24, %v604_v18  ;;  %v615_v7 = vadd.f32 %v611_v24, %v605_v2 }
  0x95   :  { %v616_v22 = vadd.f32 %v611_v24, %v606_v19  ;;  %v617_v25 = vadd.f32 %v611_v24, %v607_v3  ;;  %v618_v23 = vadd.f32 %v611_v24, %v608_v20  ;;  %v619_v16 = vadd.f32 %v611_v24, %v609_v4 }
  0x96   :  { %v620_v26 = vmax.f32 %v612_v5, 0.0  ;;  %v621_v27 = vmax.f32 %v613_v6, 0.0  ;;  %v622_v28 = vmax.f32 %v614_v21, 0.0  ;;  %v623_v29 = vmax.f32 %v615_v7, 0.0 }
  0x97   :  { %v624_v30 = vmax.f32 %v616_v22, 0.0  ;;  %v625_v31 = vmax.f32 %v617_v25, 0.0  ;;  %v626_v34 = vmax.f32 %v618_v23, 0.0  ;;  %v627_v32 = vmax.f32 %v619_v16, 0.0 }
  0x98   :  { %v628_v35 = vadd.f32 %v620_v26, %v592_v10  ;;  %v629_v39 = vadd.f32 %v621_v27, %v593_v11  ;;  %v630_v41 = vadd.f32 %v622_v28, %v594_v12  ;;  %v631_v43 = vadd.f32 %v623_v29, %v595_v60 }
  0x99   :  { %v632_v36 = vadd.f32 %v624_v30, %v596_v13  ;;  %v633_v46 = vadd.f32 %v625_v31, %v597_v14  ;;  %v634_v47 = vadd.f32 %v626_v34, %v598_v17  ;;  %v635_v24 = vadd.f32 %v627_v32, %v599_v0 }
  0x9a   :  { %v637_v50 = vstv %s2886_s29  ;;  %v647_v51 = vstv %s2888_s30  ;;  %v673_v52 = vstv %s2890_s5  ;;  %v683_v53 = vstv %s2896_s6  ;;  %s3084_s29 = sld [smem:[#allocation5 + $0x1e]] }
  0x9b   :  { %v638_v54 = vmul.f32 %v2841_v33, %v637_v50  ;;  %v639_v55 = vmul.f32 %v2847_v37, %v637_v50  ;;  %v640_v56 = vmul.f32 %v2853_v38, %v637_v50  ;;  %v641_v48 = vmul.f32 %v2859_v40, %v637_v50  ;;  %s3086_s30 = sld [smem:[#allocation3 + $0x1f]] }
  0x9c   :  { %v642_v57 = vmul.f32 %v2865_v42, %v637_v50  ;;  %v643_v58 = vmul.f32 %v2871_v44, %v637_v50  ;;  %v644_v61 = vmul.f32 %v2877_v45, %v637_v50  ;;  %v645_v59 = vmul.f32 %v2883_v49, %v637_v50  ;;  %s3234_s5 = sld [smem:[#allocation3 + $0x26]] }
  0x9d   :  { %v648_v62 = vadd.f32 %v647_v51, %v638_v54  ;;  %v649_v63 = vadd.f32 %v647_v51, %v639_v55  ;;  %v650_v8 = vadd.f32 %v647_v51, %v640_v56  ;;  %v651_v9 = vadd.f32 %v647_v51, %v641_v48  ;;  %s3236_s6 = sld [smem:[#allocation5 + $0x26]] }
  0x9e   :  { %v652_v10 = vadd.f32 %v647_v51, %v642_v57  ;;  %v653_v11 = vadd.f32 %v647_v51, %v643_v58  ;;  %v654_v12 = vadd.f32 %v647_v51, %v644_v61  ;;  %v655_v60 = vadd.f32 %v647_v51, %v645_v59 }
  0x9f   :  { %v656_v13 = vmax.f32 %v648_v62, 0.0  ;;  %v657_v14 = vmax.f32 %v649_v63, 0.0  ;;  %v658_v17 = vmax.f32 %v650_v8, 0.0  ;;  %v659_v0 = vmax.f32 %v651_v9, 0.0 }
  0xa0   :  { %v660_v15 = vmax.f32 %v652_v10, 0.0  ;;  %v661_v1 = vmax.f32 %v653_v11, 0.0  ;;  %v662_v18 = vmax.f32 %v654_v12, 0.0  ;;  %v663_v2 = vmax.f32 %v655_v60, 0.0 }
  0xa1   :  { %v664_v19 = vadd.f32 %v656_v13, %v628_v35  ;;  %v665_v3 = vadd.f32 %v657_v14, %v629_v39  ;;  %v666_v20 = vadd.f32 %v658_v17, %v630_v41  ;;  %v667_v4 = vadd.f32 %v659_v0, %v631_v43 }
  0xa2   :  { %v668_v5 = vadd.f32 %v660_v15, %v632_v36  ;;  %v669_v6 = vadd.f32 %v661_v1, %v633_v46  ;;  %v670_v21 = vadd.f32 %v662_v18, %v634_v47  ;;  %v671_v7 = vadd.f32 %v663_v2, %v635_v24 }
  0xa3   :  { %v674_v22 = vmul.f32 %v2841_v33, %v673_v52  ;;  %v675_v25 = vmul.f32 %v2847_v37, %v673_v52  ;;  %v676_v23 = vmul.f32 %v2853_v38, %v673_v52  ;;  %v677_v16 = vmul.f32 %v2859_v40, %v673_v52 }
  0xa4   :  { %v678_v26 = vmul.f32 %v2865_v42, %v673_v52  ;;  %v679_v27 = vmul.f32 %v2871_v44, %v673_v52  ;;  %v680_v28 = vmul.f32 %v2877_v45, %v673_v52  ;;  %v681_v29 = vmul.f32 %v2883_v49, %v673_v52 }
  0xa5   :  { %v684_v30 = vadd.f32 %v683_v53, %v674_v22  ;;  %v685_v31 = vadd.f32 %v683_v53, %v675_v25  ;;  %v686_v34 = vadd.f32 %v683_v53, %v676_v23  ;;  %v687_v32 = vadd.f32 %v683_v53, %v677_v16 }
  0xa6   :  { %v688_v35 = vadd.f32 %v683_v53, %v678_v26  ;;  %v689_v39 = vadd.f32 %v683_v53, %v679_v27  ;;  %v690_v41 = vadd.f32 %v683_v53, %v680_v28  ;;  %v691_v43 = vadd.f32 %v683_v53, %v681_v29 }
  0xa7   :  { %v692_v36 = vmax.f32 %v684_v30, 0.0  ;;  %v693_v46 = vmax.f32 %v685_v31, 0.0  ;;  %v694_v47 = vmax.f32 %v686_v34, 0.0  ;;  %v695_v24 = vmax.f32 %v687_v32, 0.0 }
  0xa8   :  { %v696_v50 = vmax.f32 %v688_v35, 0.0  ;;  %v697_v51 = vmax.f32 %v689_v39, 0.0  ;;  %v698_v54 = vmax.f32 %v690_v41, 0.0  ;;  %v699_v52 = vmax.f32 %v691_v43, 0.0 }
  0xa9   :  { %v700_v55 = vadd.f32 %v692_v36, %v664_v19  ;;  %v701_v56 = vadd.f32 %v693_v46, %v665_v3  ;;  %v702_v48 = vadd.f32 %v694_v47, %v666_v20  ;;  %v703_v57 = vadd.f32 %v695_v24, %v667_v4 }
  0xaa   :  { %v704_v58 = vadd.f32 %v696_v50, %v668_v5  ;;  %v705_v61 = vadd.f32 %v697_v51, %v669_v6  ;;  %v706_v59 = vadd.f32 %v698_v54, %v670_v21  ;;  %v707_v53 = vadd.f32 %v699_v52, %v671_v7 }
  0xab   :  { %v709_v62 = vstv %s2914_s7  ;;  %v719_v63 = vstv %s2916_s8  ;;  %v745_v8 = vstv %s2918_s9  ;;  %v755_v9 = vstv %s2924_s10  ;;  %s3238_s7 = sld [smem:[#allocation3 + $0x27]] }
  0xac   :  { %v710_v10 = vmul.f32 %v2841_v33, %v709_v62  ;;  %v711_v11 = vmul.f32 %v2847_v37, %v709_v62  ;;  %v712_v12 = vmul.f32 %v2853_v38, %v709_v62  ;;  %v713_v60 = vmul.f32 %v2859_v40, %v709_v62  ;;  %s3244_s8 = sld [smem:[#allocation5 + $0x27]] }
  0xad   :  { %v714_v13 = vmul.f32 %v2865_v42, %v709_v62  ;;  %v715_v14 = vmul.f32 %v2871_v44, %v709_v62  ;;  %v716_v17 = vmul.f32 %v2877_v45, %v709_v62  ;;  %v717_v0 = vmul.f32 %v2883_v49, %v709_v62  ;;  %s3262_s9 = sld [smem:[#allocation3 + $0x28]] }
  0xae   :  { %v720_v15 = vadd.f32 %v719_v63, %v710_v10  ;;  %v721_v1 = vadd.f32 %v719_v63, %v711_v11  ;;  %v722_v18 = vadd.f32 %v719_v63, %v712_v12  ;;  %v723_v2 = vadd.f32 %v719_v63, %v713_v60  ;;  %s3264_s10 = sld [smem:[#allocation5 + $0x28]] }
  0xaf   :  { %v724_v19 = vadd.f32 %v719_v63, %v714_v13  ;;  %v725_v3 = vadd.f32 %v719_v63, %v715_v14  ;;  %v726_v20 = vadd.f32 %v719_v63, %v716_v17  ;;  %v727_v4 = vadd.f32 %v719_v63, %v717_v0 }
  0xb0   :  { %v728_v5 = vmax.f32 %v720_v15, 0.0  ;;  %v729_v6 = vmax.f32 %v721_v1, 0.0  ;;  %v730_v21 = vmax.f32 %v722_v18, 0.0  ;;  %v731_v7 = vmax.f32 %v723_v2, 0.0 }
  0xb1   :  { %v732_v22 = vmax.f32 %v724_v19, 0.0  ;;  %v733_v25 = vmax.f32 %v725_v3, 0.0  ;;  %v734_v23 = vmax.f32 %v726_v20, 0.0  ;;  %v735_v16 = vmax.f32 %v727_v4, 0.0 }
  0xb2   :  { %v736_v26 = vadd.f32 %v728_v5, %v700_v55  ;;  %v737_v27 = vadd.f32 %v729_v6, %v701_v56  ;;  %v738_v28 = vadd.f32 %v730_v21, %v702_v48  ;;  %v739_v29 = vadd.f32 %v731_v7, %v703_v57 }
  0xb3   :  { %v740_v30 = vadd.f32 %v732_v22, %v704_v58  ;;  %v741_v31 = vadd.f32 %v733_v25, %v705_v61  ;;  %v742_v34 = vadd.f32 %v734_v23, %v706_v59  ;;  %v743_v32 = vadd.f32 %v735_v16, %v707_v53 }
  0xb4   :  { %v746_v35 = vmul.f32 %v2841_v33, %v745_v8  ;;  %v747_v39 = vmul.f32 %v2847_v37, %v745_v8  ;;  %v748_v41 = vmul.f32 %v2853_v38, %v745_v8  ;;  %v749_v43 = vmul.f32 %v2859_v40, %v745_v8 }
  0xb5   :  { %v750_v36 = vmul.f32 %v2865_v42, %v745_v8  ;;  %v751_v46 = vmul.f32 %v2871_v44, %v745_v8  ;;  %v752_v47 = vmul.f32 %v2877_v45, %v745_v8  ;;  %v753_v24 = vmul.f32 %v2883_v49, %v745_v8 }
  0xb6   :  { %v756_v50 = vadd.f32 %v755_v9, %v746_v35  ;;  %v757_v51 = vadd.f32 %v755_v9, %v747_v39  ;;  %v758_v54 = vadd.f32 %v755_v9, %v748_v41  ;;  %v759_v52 = vadd.f32 %v755_v9, %v749_v43 }
  0xb7   :  { %v760_v55 = vadd.f32 %v755_v9, %v750_v36  ;;  %v761_v56 = vadd.f32 %v755_v9, %v751_v46  ;;  %v762_v48 = vadd.f32 %v755_v9, %v752_v47  ;;  %v763_v57 = vadd.f32 %v755_v9, %v753_v24 }
  0xb8   :  { %v764_v58 = vmax.f32 %v756_v50, 0.0  ;;  %v765_v61 = vmax.f32 %v757_v51, 0.0  ;;  %v766_v59 = vmax.f32 %v758_v54, 0.0  ;;  %v767_v53 = vmax.f32 %v759_v52, 0.0 }
  0xb9   :  { %v768_v62 = vmax.f32 %v760_v55, 0.0  ;;  %v769_v63 = vmax.f32 %v761_v56, 0.0  ;;  %v770_v10 = vmax.f32 %v762_v48, 0.0  ;;  %v771_v8 = vmax.f32 %v763_v57, 0.0 }
  0xba   :  { %v772_v11 = vadd.f32 %v764_v58, %v736_v26  ;;  %v773_v12 = vadd.f32 %v765_v61, %v737_v27  ;;  %v774_v60 = vadd.f32 %v766_v59, %v738_v28  ;;  %v775_v13 = vadd.f32 %v767_v53, %v739_v29 }
  0xbb   :  { %v776_v14 = vadd.f32 %v768_v62, %v740_v30  ;;  %v777_v17 = vadd.f32 %v769_v63, %v741_v31  ;;  %v778_v0 = vadd.f32 %v770_v10, %v742_v34  ;;  %v779_v9 = vadd.f32 %v771_v8, %v743_v32 }
  0xbc   :  { %v781_v15 = vstv %s2942_s11  ;;  %v791_v1 = vstv %s2944_s12  ;;  %v817_v18 = vstv %s2946_s13  ;;  %v827_v2 = vstv %s2952_s14  ;;  %s3112_s13 = sld [smem:[#allocation5 + $0x1f]] }
  0xbd   :  { %v782_v19 = vmul.f32 %v2841_v33, %v781_v15  ;;  %v783_v3 = vmul.f32 %v2847_v37, %v781_v15  ;;  %v784_v20 = vmul.f32 %v2853_v38, %v781_v15  ;;  %v785_v4 = vmul.f32 %v2859_v40, %v781_v15  ;;  %s3266_s11 = sld [smem:[#allocation3 + $0x29]] }
  0xbe   :  { %v786_v5 = vmul.f32 %v2865_v42, %v781_v15  ;;  %v787_v6 = vmul.f32 %v2871_v44, %v781_v15  ;;  %v788_v21 = vmul.f32 %v2877_v45, %v781_v15  ;;  %v789_v7 = vmul.f32 %v2883_v49, %v781_v15  ;;  %s3272_s12 = sld [smem:[#allocation5 + $0x29]] }
  0xbf   :  { %v792_v22 = vadd.f32 %v791_v1, %v782_v19  ;;  %v793_v25 = vadd.f32 %v791_v1, %v783_v3  ;;  %v794_v23 = vadd.f32 %v791_v1, %v784_v20  ;;  %v795_v16 = vadd.f32 %v791_v1, %v785_v4  ;;  %s3292_s14 = sld [smem:[#allocation5 + $0x2a]] }
  0xc0   :  { %v796_v26 = vadd.f32 %v791_v1, %v786_v5  ;;  %v797_v27 = vadd.f32 %v791_v1, %v787_v6  ;;  %v798_v28 = vadd.f32 %v791_v1, %v788_v21  ;;  %v799_v29 = vadd.f32 %v791_v1, %v789_v7 }
  0xc1   :  { %v800_v30 = vmax.f32 %v792_v22, 0.0  ;;  %v801_v31 = vmax.f32 %v793_v25, 0.0  ;;  %v802_v34 = vmax.f32 %v794_v23, 0.0  ;;  %v803_v32 = vmax.f32 %v795_v16, 0.0 }
  0xc2   :  { %v804_v35 = vmax.f32 %v796_v26, 0.0  ;;  %v805_v39 = vmax.f32 %v797_v27, 0.0  ;;  %v806_v41 = vmax.f32 %v798_v28, 0.0  ;;  %v807_v43 = vmax.f32 %v799_v29, 0.0 }
  0xc3   :  { %v808_v36 = vadd.f32 %v800_v30, %v772_v11  ;;  %v809_v46 = vadd.f32 %v801_v31, %v773_v12  ;;  %v810_v47 = vadd.f32 %v802_v34, %v774_v60  ;;  %v811_v24 = vadd.f32 %v803_v32, %v775_v13 }
  0xc4   :  { %v812_v50 = vadd.f32 %v804_v35, %v776_v14  ;;  %v813_v51 = vadd.f32 %v805_v39, %v777_v17  ;;  %v814_v54 = vadd.f32 %v806_v41, %v778_v0  ;;  %v815_v52 = vadd.f32 %v807_v43, %v779_v9 }
  0xc5   :  { %v818_v55 = vmul.f32 %v2841_v33, %v817_v18  ;;  %v819_v56 = vmul.f32 %v2847_v37, %v817_v18  ;;  %v820_v48 = vmul.f32 %v2853_v38, %v817_v18  ;;  %v821_v57 = vmul.f32 %v2859_v40, %v817_v18 }
  0xc6   :  { %v822_v58 = vmul.f32 %v2865_v42, %v817_v18  ;;  %v823_v61 = vmul.f32 %v2871_v44, %v817_v18  ;;  %v824_v59 = vmul.f32 %v2877_v45, %v817_v18  ;;  %v825_v53 = vmul.f32 %v2883_v49, %v817_v18 }
  0xc7   :  { %v828_v62 = vadd.f32 %v827_v2, %v818_v55  ;;  %v829_v63 = vadd.f32 %v827_v2, %v819_v56  ;;  %v830_v10 = vadd.f32 %v827_v2, %v820_v48  ;;  %v831_v8 = vadd.f32 %v827_v2, %v821_v57 }
  0xc8   :  { %v832_v11 = vadd.f32 %v827_v2, %v822_v58  ;;  %v833_v12 = vadd.f32 %v827_v2, %v823_v61  ;;  %v834_v60 = vadd.f32 %v827_v2, %v824_v59  ;;  %v835_v13 = vadd.f32 %v827_v2, %v825_v53 }
  0xc9   :  { %v836_v14 = vmax.f32 %v828_v62, 0.0  ;;  %v837_v17 = vmax.f32 %v829_v63, 0.0  ;;  %v838_v0 = vmax.f32 %v830_v10, 0.0  ;;  %v839_v9 = vmax.f32 %v831_v8, 0.0 }
  0xca   :  { %v840_v15 = vmax.f32 %v832_v11, 0.0  ;;  %v841_v1 = vmax.f32 %v833_v12, 0.0  ;;  %v842_v19 = vmax.f32 %v834_v60, 0.0  ;;  %v843_v18 = vmax.f32 %v835_v13, 0.0 }
  0xcb   :  { %v844_v3 = vadd.f32 %v836_v14, %v808_v36  ;;  %v845_v20 = vadd.f32 %v837_v17, %v809_v46  ;;  %v846_v4 = vadd.f32 %v838_v0, %v810_v47  ;;  %v847_v5 = vadd.f32 %v839_v9, %v811_v24 }
  0xcc   :  { %v848_v6 = vadd.f32 %v840_v15, %v812_v50  ;;  %v849_v21 = vadd.f32 %v841_v1, %v813_v51  ;;  %v850_v7 = vadd.f32 %v842_v19, %v814_v54  ;;  %v851_v2 = vadd.f32 %v843_v18, %v815_v52 }
  0xcd   :  { %v853_v22 = vstv %s2970_s15  ;;  %v863_v25 = vstv %s2972_s16  ;;  %v889_v23 = vstv %s2974_s3  ;;  %v899_v16 = vstv %s2980_s17  ;;  %s3294_s15 = sld [smem:[#allocation3 + $0x2b]] }
  0xce   :  { %v854_v26 = vmul.f32 %v2841_v33, %v853_v22  ;;  %v855_v27 = vmul.f32 %v2847_v37, %v853_v22  ;;  %v856_v28 = vmul.f32 %v2853_v38, %v853_v22  ;;  %v857_v29 = vmul.f32 %v2859_v40, %v853_v22  ;;  %s3300_s16 = sld [smem:[#allocation5 + $0x2b]] }
  0xcf   :  { %v858_v30 = vmul.f32 %v2865_v42, %v853_v22  ;;  %v859_v31 = vmul.f32 %v2871_v44, %v853_v22  ;;  %v860_v34 = vmul.f32 %v2877_v45, %v853_v22  ;;  %v861_v32 = vmul.f32 %v2883_v49, %v853_v22  ;;  %s3318_s3 = sld [smem:[#allocation3 + $0x2c]] }
  0xd0   :  { %v864_v35 = vadd.f32 %v863_v25, %v854_v26  ;;  %v865_v39 = vadd.f32 %v863_v25, %v855_v27  ;;  %v866_v41 = vadd.f32 %v863_v25, %v856_v28  ;;  %v867_v43 = vadd.f32 %v863_v25, %v857_v29  ;;  %s3320_s17 = sld [smem:[#allocation5 + $0x2c]] }
  0xd1   :  { %v868_v36 = vadd.f32 %v863_v25, %v858_v30  ;;  %v869_v46 = vadd.f32 %v863_v25, %v859_v31  ;;  %v870_v47 = vadd.f32 %v863_v25, %v860_v34  ;;  %v871_v24 = vadd.f32 %v863_v25, %v861_v32 }
  0xd2   :  { %v872_v50 = vmax.f32 %v864_v35, 0.0  ;;  %v873_v51 = vmax.f32 %v865_v39, 0.0  ;;  %v874_v54 = vmax.f32 %v866_v41, 0.0  ;;  %v875_v52 = vmax.f32 %v867_v43, 0.0 }
  0xd3   :  { %v876_v55 = vmax.f32 %v868_v36, 0.0  ;;  %v877_v56 = vmax.f32 %v869_v46, 0.0  ;;  %v878_v48 = vmax.f32 %v870_v47, 0.0  ;;  %v879_v57 = vmax.f32 %v871_v24, 0.0 }
  0xd4   :  { %v880_v58 = vadd.f32 %v872_v50, %v844_v3  ;;  %v881_v61 = vadd.f32 %v873_v51, %v845_v20  ;;  %v882_v59 = vadd.f32 %v874_v54, %v846_v4  ;;  %v883_v53 = vadd.f32 %v875_v52, %v847_v5 }
  0xd5   :  { %v884_v62 = vadd.f32 %v876_v55, %v848_v6  ;;  %v885_v63 = vadd.f32 %v877_v56, %v849_v21  ;;  %v886_v10 = vadd.f32 %v878_v48, %v850_v7  ;;  %v887_v8 = vadd.f32 %v879_v57, %v851_v2 }
  0xd6   :  { %v890_v11 = vmul.f32 %v2841_v33, %v889_v23  ;;  %v891_v12 = vmul.f32 %v2847_v37, %v889_v23  ;;  %v892_v60 = vmul.f32 %v2853_v38, %v889_v23  ;;  %v893_v13 = vmul.f32 %v2859_v40, %v889_v23 }
  0xd7   :  { %v894_v14 = vmul.f32 %v2865_v42, %v889_v23  ;;  %v895_v17 = vmul.f32 %v2871_v44, %v889_v23  ;;  %v896_v0 = vmul.f32 %v2877_v45, %v889_v23  ;;  %v897_v9 = vmul.f32 %v2883_v49, %v889_v23 }
  0xd8   :  { %v900_v15 = vadd.f32 %v899_v16, %v890_v11  ;;  %v901_v1 = vadd.f32 %v899_v16, %v891_v12  ;;  %v902_v19 = vadd.f32 %v899_v16, %v892_v60  ;;  %v903_v18 = vadd.f32 %v899_v16, %v893_v13 }
  0xd9   :  { %v904_v3 = vadd.f32 %v899_v16, %v894_v14  ;;  %v905_v20 = vadd.f32 %v899_v16, %v895_v17  ;;  %v906_v4 = vadd.f32 %v899_v16, %v896_v0  ;;  %v907_v5 = vadd.f32 %v899_v16, %v897_v9 }
  0xda   :  { %v908_v6 = vmax.f32 %v900_v15, 0.0  ;;  %v909_v21 = vmax.f32 %v901_v1, 0.0  ;;  %v910_v7 = vmax.f32 %v902_v19, 0.0  ;;  %v911_v2 = vmax.f32 %v903_v18, 0.0 }
  0xdb   :  { %v912_v22 = vmax.f32 %v904_v3, 0.0  ;;  %v913_v25 = vmax.f32 %v905_v20, 0.0  ;;  %v914_v26 = vmax.f32 %v906_v4, 0.0  ;;  %v915_v23 = vmax.f32 %v907_v5, 0.0 }
  0xdc   :  { %v916_v27 = vadd.f32 %v908_v6, %v880_v58  ;;  %v917_v28 = vadd.f32 %v909_v21, %v881_v61  ;;  %v918_v29 = vadd.f32 %v910_v7, %v882_v59  ;;  %v919_v30 = vadd.f32 %v911_v2, %v883_v53 }
  0xdd   :  { %v920_v31 = vadd.f32 %v912_v22, %v884_v62  ;;  %v921_v34 = vadd.f32 %v913_v25, %v885_v63  ;;  %v922_v32 = vadd.f32 %v914_v26, %v886_v10  ;;  %v923_v16 = vadd.f32 %v915_v23, %v887_v8 }
  0xde   :  { %v925_v35 = vstv %s2998_s18  ;;  %v935_v39 = vstv %s3000_s19  ;;  %v961_v41 = vstv %s3002_s20  ;;  %v971_v43 = vstv %s3008_s21  ;;  %s3150_s21 = sld [smem:[#allocation3 + $0x20]] }
  0xdf   :  { %v926_v36 = vmul.f32 %v2841_v33, %v925_v35  ;;  %v927_v46 = vmul.f32 %v2847_v37, %v925_v35  ;;  %v928_v47 = vmul.f32 %v2853_v38, %v925_v35  ;;  %v929_v24 = vmul.f32 %v2859_v40, %v925_v35  ;;  %s3322_s18 = sld [smem:[#allocation3 + $0x2d]] }
  0xe0   :  { %v930_v50 = vmul.f32 %v2865_v42, %v925_v35  ;;  %v931_v51 = vmul.f32 %v2871_v44, %v925_v35  ;;  %v932_v54 = vmul.f32 %v2877_v45, %v925_v35  ;;  %v933_v52 = vmul.f32 %v2883_v49, %v925_v35  ;;  %s3328_s19 = sld [smem:[#allocation5 + $0x2d]] }
  0xe1   :  { %v936_v55 = vadd.f32 %v935_v39, %v926_v36  ;;  %v937_v56 = vadd.f32 %v935_v39, %v927_v46  ;;  %v938_v48 = vadd.f32 %v935_v39, %v928_v47  ;;  %v939_v57 = vadd.f32 %v935_v39, %v929_v24  ;;  %s3472_s20 = sld [smem:[#allocation5 + $0x34]] }
  0xe2   :  { %v940_v58 = vadd.f32 %v935_v39, %v930_v50  ;;  %v941_v61 = vadd.f32 %v935_v39, %v931_v51  ;;  %v942_v59 = vadd.f32 %v935_v39, %v932_v54  ;;  %v943_v53 = vadd.f32 %v935_v39, %v933_v52 }
  0xe3   :  { %v944_v62 = vmax.f32 %v936_v55, 0.0  ;;  %v945_v63 = vmax.f32 %v937_v56, 0.0  ;;  %v946_v10 = vmax.f32 %v938_v48, 0.0  ;;  %v947_v8 = vmax.f32 %v939_v57, 0.0 }
  0xe4   :  { %v948_v11 = vmax.f32 %v940_v58, 0.0  ;;  %v949_v12 = vmax.f32 %v941_v61, 0.0  ;;  %v950_v60 = vmax.f32 %v942_v59, 0.0  ;;  %v951_v13 = vmax.f32 %v943_v53, 0.0 }
  0xe5   :  { %v952_v14 = vadd.f32 %v944_v62, %v916_v27  ;;  %v953_v17 = vadd.f32 %v945_v63, %v917_v28  ;;  %v954_v0 = vadd.f32 %v946_v10, %v918_v29  ;;  %v955_v9 = vadd.f32 %v947_v8, %v919_v30 }
  0xe6   :  { %v956_v15 = vadd.f32 %v948_v11, %v920_v31  ;;  %v957_v1 = vadd.f32 %v949_v12, %v921_v34  ;;  %v958_v19 = vadd.f32 %v950_v60, %v922_v32  ;;  %v959_v18 = vadd.f32 %v951_v13, %v923_v16 }
  0xe7   :  { %v962_v3 = vmul.f32 %v2841_v33, %v961_v41  ;;  %v963_v20 = vmul.f32 %v2847_v37, %v961_v41  ;;  %v964_v4 = vmul.f32 %v2853_v38, %v961_v41  ;;  %v965_v5 = vmul.f32 %v2859_v40, %v961_v41 }
  0xe8   :  { %v966_v6 = vmul.f32 %v2865_v42, %v961_v41  ;;  %v967_v21 = vmul.f32 %v2871_v44, %v961_v41  ;;  %v968_v7 = vmul.f32 %v2877_v45, %v961_v41  ;;  %v969_v2 = vmul.f32 %v2883_v49, %v961_v41 }
  0xe9   :  { %v972_v22 = vadd.f32 %v971_v43, %v962_v3  ;;  %v973_v25 = vadd.f32 %v971_v43, %v963_v20  ;;  %v974_v26 = vadd.f32 %v971_v43, %v964_v4  ;;  %v975_v23 = vadd.f32 %v971_v43, %v965_v5 }
  0xea   :  { %v976_v27 = vadd.f32 %v971_v43, %v966_v6  ;;  %v977_v28 = vadd.f32 %v971_v43, %v967_v21  ;;  %v978_v29 = vadd.f32 %v971_v43, %v968_v7  ;;  %v979_v30 = vadd.f32 %v971_v43, %v969_v2 }
  0xeb   :  { %v980_v31 = vmax.f32 %v972_v22, 0.0  ;;  %v981_v34 = vmax.f32 %v973_v25, 0.0  ;;  %v982_v32 = vmax.f32 %v974_v26, 0.0  ;;  %v983_v16 = vmax.f32 %v975_v23, 0.0 }
  0xec   :  { %v984_v35 = vmax.f32 %v976_v27, 0.0  ;;  %v985_v39 = vmax.f32 %v977_v28, 0.0  ;;  %v986_v36 = vmax.f32 %v978_v29, 0.0  ;;  %v987_v41 = vmax.f32 %v979_v30, 0.0 }
  0xed   :  { %v988_v46 = vadd.f32 %v980_v31, %v952_v14  ;;  %v989_v47 = vadd.f32 %v981_v34, %v953_v17  ;;  %v990_v24 = vadd.f32 %v982_v32, %v954_v0  ;;  %v991_v50 = vadd.f32 %v983_v16, %v955_v9 }
  0xee   :  { %v992_v51 = vadd.f32 %v984_v35, %v956_v15  ;;  %v993_v54 = vadd.f32 %v985_v39, %v957_v1  ;;  %v994_v52 = vadd.f32 %v986_v36, %v958_v19  ;;  %v995_v43 = vadd.f32 %v987_v41, %v959_v18 }
  0xef   :  { %v997_v55 = vstv %s3026_s22  ;;  %v1007_v56 = vstv %s3028_s23  ;;  %v1033_v48 = vstv %s3030_s24  ;;  %v1043_v57 = vstv %s3036_s25  ;;  %s3152_s22 = sld [smem:[#allocation5 + $0x20]] }
  0xf0   :  { %v998_v58 = vmul.f32 %v2841_v33, %v997_v55  ;;  %v999_v61 = vmul.f32 %v2847_v37, %v997_v55  ;;  %v1000_v59 = vmul.f32 %v2853_v38, %v997_v55  ;;  %v1001_v53 = vmul.f32 %v2859_v40, %v997_v55  ;;  %s3154_s23 = sld [smem:[#allocation3 + $0x21]] }
  0xf1   :  { %v1002_v62 = vmul.f32 %v2865_v42, %v997_v55  ;;  %v1003_v63 = vmul.f32 %v2871_v44, %v997_v55  ;;  %v1004_v10 = vmul.f32 %v2877_v45, %v997_v55  ;;  %v1005_v8 = vmul.f32 %v2883_v49, %v997_v55  ;;  %s3160_s24 = sld [smem:[#allocation5 + $0x21]] }
  0xf2   :  { %v1008_v11 = vadd.f32 %v1007_v56, %v998_v58  ;;  %v1009_v12 = vadd.f32 %v1007_v56, %v999_v61  ;;  %v1010_v60 = vadd.f32 %v1007_v56, %v1000_v59  ;;  %v1011_v13 = vadd.f32 %v1007_v56, %v1001_v53  ;;  %s3178_s25 = sld [smem:[#allocation3 + $0x22]] }
  0xf3   :  { %v1012_v14 = vadd.f32 %v1007_v56, %v1002_v62  ;;  %v1013_v17 = vadd.f32 %v1007_v56, %v1003_v63  ;;  %v1014_v0 = vadd.f32 %v1007_v56, %v1004_v10  ;;  %v1015_v9 = vadd.f32 %v1007_v56, %v1005_v8 }
  0xf4   :  { %v1016_v15 = vmax.f32 %v1008_v11, 0.0  ;;  %v1017_v1 = vmax.f32 %v1009_v12, 0.0  ;;  %v1018_v19 = vmax.f32 %v1010_v60, 0.0  ;;  %v1019_v18 = vmax.f32 %v1011_v13, 0.0 }
  0xf5   :  { %v1020_v3 = vmax.f32 %v1012_v14, 0.0  ;;  %v1021_v20 = vmax.f32 %v1013_v17, 0.0  ;;  %v1022_v4 = vmax.f32 %v1014_v0, 0.0  ;;  %v1023_v5 = vmax.f32 %v1015_v9, 0.0 }
  0xf6   :  { %v1024_v6 = vadd.f32 %v1016_v15, %v988_v46  ;;  %v1025_v21 = vadd.f32 %v1017_v1, %v989_v47  ;;  %v1026_v7 = vadd.f32 %v1018_v19, %v990_v24  ;;  %v1027_v2 = vadd.f32 %v1019_v18, %v991_v50 }
  0xf7   :  { %v1028_v22 = vadd.f32 %v1020_v3, %v992_v51  ;;  %v1029_v25 = vadd.f32 %v1021_v20, %v993_v54  ;;  %v1030_v26 = vadd.f32 %v1022_v4, %v994_v52  ;;  %v1031_v23 = vadd.f32 %v1023_v5, %v995_v43 }
  0xf8   :  { %v1034_v27 = vmul.f32 %v2841_v33, %v1033_v48  ;;  %v1035_v28 = vmul.f32 %v2847_v37, %v1033_v48  ;;  %v1036_v29 = vmul.f32 %v2853_v38, %v1033_v48  ;;  %v1037_v30 = vmul.f32 %v2859_v40, %v1033_v48 }
  0xf9   :  { %v1038_v31 = vmul.f32 %v2865_v42, %v1033_v48  ;;  %v1039_v34 = vmul.f32 %v2871_v44, %v1033_v48  ;;  %v1040_v32 = vmul.f32 %v2877_v45, %v1033_v48  ;;  %v1041_v16 = vmul.f32 %v2883_v49, %v1033_v48 }
  0xfa   :  { %v1044_v35 = vadd.f32 %v1043_v57, %v1034_v27  ;;  %v1045_v39 = vadd.f32 %v1043_v57, %v1035_v28  ;;  %v1046_v36 = vadd.f32 %v1043_v57, %v1036_v29  ;;  %v1047_v41 = vadd.f32 %v1043_v57, %v1037_v30 }
  0xfb   :  { %v1048_v46 = vadd.f32 %v1043_v57, %v1038_v31  ;;  %v1049_v47 = vadd.f32 %v1043_v57, %v1039_v34  ;;  %v1050_v24 = vadd.f32 %v1043_v57, %v1040_v32  ;;  %v1051_v50 = vadd.f32 %v1043_v57, %v1041_v16  ;;  %v3091_v31 = vld [vmem:[%s3710_s0] sm:$0xff]  ;;  %v3097_v32 = vld [vmem:[%s3710_s0 + $0x8] sm:$0xff] }
  0xfc   :  { %v1052_v51 = vmax.f32 %v1044_v35, 0.0  ;;  %v1053_v54 = vmax.f32 %v1045_v39, 0.0  ;;  %v1054_v52 = vmax.f32 %v1046_v36, 0.0  ;;  %v1055_v43 = vmax.f32 %v1047_v41, 0.0  ;;  %v3103_v35 = vld [vmem:[%s3710_s0 + $0x10] sm:$0xff]  ;;  %v3109_v36 = vld [vmem:[%s3710_s0 + $0x18] sm:$0xff] }
  0xfd   :  { %v1056_v55 = vmax.f32 %v1048_v46, 0.0  ;;  %v1057_v56 = vmax.f32 %v1049_v47, 0.0  ;;  %v1058_v58 = vmax.f32 %v1050_v24, 0.0  ;;  %v1059_v48 = vmax.f32 %v1051_v50, 0.0  ;;  %v3117_v46 = vld [vmem:[%s3710_s0 + $0x20] sm:$0xff]  ;;  %v3123_v24 = vld [vmem:[%s3710_s0 + $0x28] sm:$0xff] }
  0xfe   :  { %v1060_v61 = vadd.f32 %v1052_v51, %v1024_v6  ;;  %v1061_v59 = vadd.f32 %v1053_v54, %v1025_v21  ;;  %v1062_v53 = vadd.f32 %v1054_v52, %v1026_v7  ;;  %v1063_v62 = vadd.f32 %v1055_v43, %v1027_v2  ;;  %v3129_v51 = vld [vmem:[%s3710_s0 + $0x30] sm:$0xff]  ;;  %v3135_v52 = vld [vmem:[%s3710_s0 + $0x38] sm:$0xff] }
  0xff   :  { %v1064_v63 = vadd.f32 %v1056_v55, %v1028_v22  ;;  %v1065_v10 = vadd.f32 %v1057_v56, %v1029_v25  ;;  %v1066_v8 = vadd.f32 %v1058_v58, %v1030_v26  ;;  %v1067_v57 = vadd.f32 %v1059_v48, %v1031_v23 }
 0x100   :  { %v1069_v11 = vstv %s3054_s1  ;;  %v1079_v12 = vstv %s3056_s26  ;;  %v1105_v60 = vstv %s3058_s27  ;;  %v1115_v13 = vstv %s3064_s2  ;;  %s3180_s1 = sld [smem:[#allocation5 + $0x22]] }
 0x101   :  { %v1070_v14 = vmul.f32 %v2841_v33, %v1069_v11  ;;  %v1071_v17 = vmul.f32 %v2847_v37, %v1069_v11  ;;  %v1072_v0 = vmul.f32 %v2853_v38, %v1069_v11  ;;  %v1073_v9 = vmul.f32 %v2859_v40, %v1069_v11  ;;  %s3182_s26 = sld [smem:[#allocation3 + $0x23]] }
 0x102   :  { %v1074_v15 = vmul.f32 %v2865_v42, %v1069_v11  ;;  %v1075_v1 = vmul.f32 %v2871_v44, %v1069_v11  ;;  %v1076_v19 = vmul.f32 %v2877_v45, %v1069_v11  ;;  %v1077_v18 = vmul.f32 %v2883_v49, %v1069_v11  ;;  %s3188_s27 = sld [smem:[#allocation5 + $0x23]] }
 0x103   :  { %v1080_v3 = vadd.f32 %v1079_v12, %v1070_v14  ;;  %v1081_v20 = vadd.f32 %v1079_v12, %v1071_v17  ;;  %v1082_v4 = vadd.f32 %v1079_v12, %v1072_v0  ;;  %v1083_v5 = vadd.f32 %v1079_v12, %v1073_v9  ;;  %s3206_s2 = sld [smem:[#allocation3 + $0x24]] }
 0x104   :  { %v1084_v6 = vadd.f32 %v1079_v12, %v1074_v15  ;;  %v1085_v33 = vadd.f32 %v1079_v12, %v1075_v1  ;;  %v1086_v21 = vadd.f32 %v1079_v12, %v1076_v19  ;;  %v1087_v37 = vadd.f32 %v1079_v12, %v1077_v18 }
 0x105   :  { %v1088_v7 = vmax.f32 %v1080_v3, 0.0  ;;  %v1089_v38 = vmax.f32 %v1081_v20, 0.0  ;;  %v1090_v2 = vmax.f32 %v1082_v4, 0.0  ;;  %v1091_v40 = vmax.f32 %v1083_v5, 0.0 }
 0x106   :  { %v1092_v22 = vmax.f32 %v1084_v6, 0.0  ;;  %v1093_v42 = vmax.f32 %v1085_v33, 0.0  ;;  %v1094_v25 = vmax.f32 %v1086_v21, 0.0  ;;  %v1095_v44 = vmax.f32 %v1087_v37, 0.0 }
 0x107   :  { %v1096_v45 = vadd.f32 %v1088_v7, %v1060_v61  ;;  %v1097_v49 = vadd.f32 %v1089_v38, %v1061_v59  ;;  %v1098_v26 = vadd.f32 %v1090_v2, %v1062_v53  ;;  %v1099_v23 = vadd.f32 %v1091_v40, %v1063_v62 }
 0x108   :  { %v1100_v27 = vadd.f32 %v1092_v22, %v1064_v63  ;;  %v1101_v28 = vadd.f32 %v1093_v42, %v1065_v10  ;;  %v1102_v29 = vadd.f32 %v1094_v25, %v1066_v8  ;;  %v1103_v30 = vadd.f32 %v1095_v44, %v1067_v57 }
 0x109   :  { %v1106_v34 = vmul.f32 %v3091_v31, %v1105_v60  ;;  %v1107_v16 = vmul.f32 %v3097_v32, %v1105_v60  ;;  %v1108_v39 = vmul.f32 %v3103_v35, %v1105_v60  ;;  %v1109_v41 = vmul.f32 %v3109_v36, %v1105_v60 }
 0x10a   :  { %v1110_v47 = vmul.f32 %v3117_v46, %v1105_v60  ;;  %v1111_v50 = vmul.f32 %v3123_v24, %v1105_v60  ;;  %v1112_v54 = vmul.f32 %v3129_v51, %v1105_v60  ;;  %v1113_v43 = vmul.f32 %v3135_v52, %v1105_v60 }
 0x10b   :  { %v1116_v55 = vadd.f32 %v1115_v13, %v1106_v34  ;;  %v1117_v56 = vadd.f32 %v1115_v13, %v1107_v16  ;;  %v1118_v58 = vadd.f32 %v1115_v13, %v1108_v39  ;;  %v1119_v48 = vadd.f32 %v1115_v13, %v1109_v41 }
 0x10c   :  { %v1120_v61 = vadd.f32 %v1115_v13, %v1110_v47  ;;  %v1121_v59 = vadd.f32 %v1115_v13, %v1111_v50  ;;  %v1122_v53 = vadd.f32 %v1115_v13, %v1112_v54  ;;  %v1123_v62 = vadd.f32 %v1115_v13, %v1113_v43 }
 0x10d   :  { %v1124_v63 = vmin.f32 %v1116_v55, 0.0  ;;  %v1125_v10 = vmin.f32 %v1117_v56, 0.0  ;;  %v1126_v8 = vmin.f32 %v1118_v58, 0.0  ;;  %v1127_v57 = vmin.f32 %v1119_v48, 0.0 }
 0x10e   :  { %v1128_v11 = vmin.f32 %v1120_v61, 0.0  ;;  %v1129_v12 = vmin.f32 %v1121_v59, 0.0  ;;  %v1130_v14 = vmin.f32 %v1122_v53, 0.0  ;;  %v1131_v60 = vmin.f32 %v1123_v62, 0.0 }
 0x10f   :  { %v1132_v17 = vadd.f32 %v1124_v63, %v1096_v45  ;;  %v1133_v0 = vadd.f32 %v1125_v10, %v1097_v49  ;;  %v1134_v9 = vadd.f32 %v1126_v8, %v1098_v26  ;;  %v1135_v15 = vadd.f32 %v1127_v57, %v1099_v23 }
 0x110   :  { %v1136_v1 = vadd.f32 %v1128_v11, %v1100_v27  ;;  %v1137_v19 = vadd.f32 %v1129_v12, %v1101_v28  ;;  %v1138_v18 = vadd.f32 %v1130_v14, %v1102_v29  ;;  %v1139_v13 = vadd.f32 %v1131_v60, %v1103_v30 }
 0x111   :  { %v1141_v3 = vstv %s3082_s28  ;;  %v1151_v20 = vstv %s3084_s29  ;;  %v1177_v4 = vstv %s3086_s30  ;;  %v1187_v5 = vstv %s3112_s13  ;;  %s3208_s28 = sld [smem:[#allocation5 + $0x24]] }
 0x112   :  { %v1142_v6 = vmul.f32 %v3091_v31, %v1141_v3  ;;  %v1143_v33 = vmul.f32 %v3097_v32, %v1141_v3  ;;  %v1144_v21 = vmul.f32 %v3103_v35, %v1141_v3  ;;  %v1145_v37 = vmul.f32 %v3109_v36, %v1141_v3  ;;  %s3210_s29 = sld [smem:[#allocation3 + $0x25]] }
 0x113   :  { %v1146_v7 = vmul.f32 %v3117_v46, %v1141_v3  ;;  %v1147_v38 = vmul.f32 %v3123_v24, %v1141_v3  ;;  %v1148_v2 = vmul.f32 %v3129_v51, %v1141_v3  ;;  %v1149_v40 = vmul.f32 %v3135_v52, %v1141_v3  ;;  %s3216_s30 = sld [smem:[#allocation5 + $0x25]] }
 0x114   :  { %v1152_v22 = vadd.f32 %v1151_v20, %v1142_v6  ;;  %v1153_v42 = vadd.f32 %v1151_v20, %v1143_v33  ;;  %v1154_v25 = vadd.f32 %v1151_v20, %v1144_v21  ;;  %v1155_v44 = vadd.f32 %v1151_v20, %v1145_v37  ;;  %s3290_s13 = sld [smem:[#allocation3 + $0x2a]] }
 0x115   :  { %v1156_v45 = vadd.f32 %v1151_v20, %v1146_v7  ;;  %v1157_v49 = vadd.f32 %v1151_v20, %v1147_v38  ;;  %v1158_v26 = vadd.f32 %v1151_v20, %v1148_v2  ;;  %v1159_v23 = vadd.f32 %v1151_v20, %v1149_v40 }
 0x116   :  { %v1160_v27 = vmin.f32 %v1152_v22, 0.0  ;;  %v1161_v28 = vmin.f32 %v1153_v42, 0.0  ;;  %v1162_v29 = vmin.f32 %v1154_v25, 0.0  ;;  %v1163_v30 = vmin.f32 %v1155_v44, 0.0 }
 0x117   :  { %v1164_v34 = vmin.f32 %v1156_v45, 0.0  ;;  %v1165_v16 = vmin.f32 %v1157_v49, 0.0  ;;  %v1166_v39 = vmin.f32 %v1158_v26, 0.0  ;;  %v1167_v41 = vmin.f32 %v1159_v23, 0.0 }
 0x118   :  { %v1168_v47 = vadd.f32 %v1160_v27, %v1132_v17  ;;  %v1169_v50 = vadd.f32 %v1161_v28, %v1133_v0  ;;  %v1170_v54 = vadd.f32 %v1162_v29, %v1134_v9  ;;  %v1171_v43 = vadd.f32 %v1163_v30, %v1135_v15 }
 0x119   :  { %v1172_v55 = vadd.f32 %v1164_v34, %v1136_v1  ;;  %v1173_v56 = vadd.f32 %v1165_v16, %v1137_v19  ;;  %v1174_v58 = vadd.f32 %v1166_v39, %v1138_v18  ;;  %v1175_v48 = vadd.f32 %v1167_v41, %v1139_v13 }
 0x11a   :  { %v1178_v61 = vmul.f32 %v3091_v31, %v1177_v4  ;;  %v1179_v59 = vmul.f32 %v3097_v32, %v1177_v4  ;;  %v1180_v53 = vmul.f32 %v3103_v35, %v1177_v4  ;;  %v1181_v62 = vmul.f32 %v3109_v36, %v1177_v4 }
 0x11b   :  { %v1182_v63 = vmul.f32 %v3117_v46, %v1177_v4  ;;  %v1183_v10 = vmul.f32 %v3123_v24, %v1177_v4  ;;  %v1184_v8 = vmul.f32 %v3129_v51, %v1177_v4  ;;  %v1185_v57 = vmul.f32 %v3135_v52, %v1177_v4 }
 0x11c   :  { %v1188_v11 = vadd.f32 %v1187_v5, %v1178_v61  ;;  %v1189_v12 = vadd.f32 %v1187_v5, %v1179_v59  ;;  %v1190_v14 = vadd.f32 %v1187_v5, %v1180_v53  ;;  %v1191_v60 = vadd.f32 %v1187_v5, %v1181_v62 }
 0x11d   :  { %v1192_v17 = vadd.f32 %v1187_v5, %v1182_v63  ;;  %v1193_v0 = vadd.f32 %v1187_v5, %v1183_v10  ;;  %v1194_v9 = vadd.f32 %v1187_v5, %v1184_v8  ;;  %v1195_v15 = vadd.f32 %v1187_v5, %v1185_v57 }
 0x11e   :  { %v1196_v1 = vmin.f32 %v1188_v11, 0.0  ;;  %v1197_v19 = vmin.f32 %v1189_v12, 0.0  ;;  %v1198_v18 = vmin.f32 %v1190_v14, 0.0  ;;  %v1199_v13 = vmin.f32 %v1191_v60, 0.0 }
 0x11f   :  { %v1200_v3 = vmin.f32 %v1192_v17, 0.0  ;;  %v1201_v20 = vmin.f32 %v1193_v0, 0.0  ;;  %v1202_v6 = vmin.f32 %v1194_v9, 0.0  ;;  %v1203_v4 = vmin.f32 %v1195_v15, 0.0 }
 0x120   :  { %v1204_v33 = vadd.f32 %v1196_v1, %v1168_v47  ;;  %v1205_v21 = vadd.f32 %v1197_v19, %v1169_v50  ;;  %v1206_v37 = vadd.f32 %v1198_v18, %v1170_v54  ;;  %v1207_v7 = vadd.f32 %v1199_v13, %v1171_v43 }
 0x121   :  { %v1208_v38 = vadd.f32 %v1200_v3, %v1172_v55  ;;  %v1209_v2 = vadd.f32 %v1201_v20, %v1173_v56  ;;  %v1210_v40 = vadd.f32 %v1202_v6, %v1174_v58  ;;  %v1211_v5 = vadd.f32 %v1203_v4, %v1175_v48 }
 0x122   :  { %v1213_v22 = vstv %s3150_s21  ;;  %v1223_v42 = vstv %s3152_s22  ;;  %v1249_v25 = vstv %s3154_s23  ;;  %v1259_v44 = vstv %s3160_s24  ;;  %s3474_s21 = sld [smem:[#allocation3 + $0x35]] }
 0x123   :  { %v1214_v45 = vmul.f32 %v3091_v31, %v1213_v22  ;;  %v1215_v49 = vmul.f32 %v3097_v32, %v1213_v22  ;;  %v1216_v26 = vmul.f32 %v3103_v35, %v1213_v22  ;;  %v1217_v23 = vmul.f32 %v3109_v36, %v1213_v22  ;;  %s3480_s22 = sld [smem:[#allocation5 + $0x35]] }
 0x124   :  { %v1218_v27 = vmul.f32 %v3117_v46, %v1213_v22  ;;  %v1219_v28 = vmul.f32 %v3123_v24, %v1213_v22  ;;  %v1220_v29 = vmul.f32 %v3129_v51, %v1213_v22  ;;  %v1221_v30 = vmul.f32 %v3135_v52, %v1213_v22  ;;  %s3498_s23 = sld [smem:[#allocation3 + $0x36]] }
 0x125   :  { %v1224_v34 = vadd.f32 %v1223_v42, %v1214_v45  ;;  %v1225_v16 = vadd.f32 %v1223_v42, %v1215_v49  ;;  %v1226_v39 = vadd.f32 %v1223_v42, %v1216_v26  ;;  %v1227_v41 = vadd.f32 %v1223_v42, %v1217_v23  ;;  %s3500_s24 = sld [smem:[#allocation5 + $0x36]] }
 0x126   :  { %v1228_v47 = vadd.f32 %v1223_v42, %v1218_v27  ;;  %v1229_v50 = vadd.f32 %v1223_v42, %v1219_v28  ;;  %v1230_v54 = vadd.f32 %v1223_v42, %v1220_v29  ;;  %v1231_v43 = vadd.f32 %v1223_v42, %v1221_v30 }
 0x127   :  { %v1232_v55 = vmin.f32 %v1224_v34, 0.0  ;;  %v1233_v56 = vmin.f32 %v1225_v16, 0.0  ;;  %v1234_v58 = vmin.f32 %v1226_v39, 0.0  ;;  %v1235_v48 = vmin.f32 %v1227_v41, 0.0 }
 0x128   :  { %v1236_v61 = vmin.f32 %v1228_v47, 0.0  ;;  %v1237_v59 = vmin.f32 %v1229_v50, 0.0  ;;  %v1238_v53 = vmin.f32 %v1230_v54, 0.0  ;;  %v1239_v62 = vmin.f32 %v1231_v43, 0.0 }
 0x129   :  { %v1240_v63 = vadd.f32 %v1232_v55, %v1204_v33  ;;  %v1241_v10 = vadd.f32 %v1233_v56, %v1205_v21  ;;  %v1242_v8 = vadd.f32 %v1234_v58, %v1206_v37  ;;  %v1243_v57 = vadd.f32 %v1235_v48, %v1207_v7 }
 0x12a   :  { %v1244_v11 = vadd.f32 %v1236_v61, %v1208_v38  ;;  %v1245_v12 = vadd.f32 %v1237_v59, %v1209_v2  ;;  %v1246_v14 = vadd.f32 %v1238_v53, %v1210_v40  ;;  %v1247_v60 = vadd.f32 %v1239_v62, %v1211_v5 }
 0x12b   :  { %v1250_v17 = vmul.f32 %v3091_v31, %v1249_v25  ;;  %v1251_v0 = vmul.f32 %v3097_v32, %v1249_v25  ;;  %v1252_v9 = vmul.f32 %v3103_v35, %v1249_v25  ;;  %v1253_v15 = vmul.f32 %v3109_v36, %v1249_v25 }
 0x12c   :  { %v1254_v1 = vmul.f32 %v3117_v46, %v1249_v25  ;;  %v1255_v19 = vmul.f32 %v3123_v24, %v1249_v25  ;;  %v1256_v18 = vmul.f32 %v3129_v51, %v1249_v25  ;;  %v1257_v13 = vmul.f32 %v3135_v52, %v1249_v25 }
 0x12d   :  { %v1260_v3 = vadd.f32 %v1259_v44, %v1250_v17  ;;  %v1261_v20 = vadd.f32 %v1259_v44, %v1251_v0  ;;  %v1262_v6 = vadd.f32 %v1259_v44, %v1252_v9  ;;  %v1263_v4 = vadd.f32 %v1259_v44, %v1253_v15 }
 0x12e   :  { %v1264_v33 = vadd.f32 %v1259_v44, %v1254_v1  ;;  %v1265_v21 = vadd.f32 %v1259_v44, %v1255_v19  ;;  %v1266_v37 = vadd.f32 %v1259_v44, %v1256_v18  ;;  %v1267_v7 = vadd.f32 %v1259_v44, %v1257_v13 }
 0x12f   :  { %v1268_v38 = vmin.f32 %v1260_v3, 0.0  ;;  %v1269_v2 = vmin.f32 %v1261_v20, 0.0  ;;  %v1270_v40 = vmin.f32 %v1262_v6, 0.0  ;;  %v1271_v5 = vmin.f32 %v1263_v4, 0.0 }
 0x130   :  { %v1272_v22 = vmin.f32 %v1264_v33, 0.0  ;;  %v1273_v42 = vmin.f32 %v1265_v21, 0.0  ;;  %v1274_v45 = vmin.f32 %v1266_v37, 0.0  ;;  %v1275_v25 = vmin.f32 %v1267_v7, 0.0 }
 0x131   :  { %v1276_v49 = vadd.f32 %v1268_v38, %v1240_v63  ;;  %v1277_v26 = vadd.f32 %v1269_v2, %v1241_v10  ;;  %v1278_v23 = vadd.f32 %v1270_v40, %v1242_v8  ;;  %v1279_v27 = vadd.f32 %v1271_v5, %v1243_v57 }
 0x132   :  { %v1280_v28 = vadd.f32 %v1272_v22, %v1244_v11  ;;  %v1281_v29 = vadd.f32 %v1273_v42, %v1245_v12  ;;  %v1282_v30 = vadd.f32 %v1274_v45, %v1246_v14  ;;  %v1283_v44 = vadd.f32 %v1275_v25, %v1247_v60 }
 0x133   :  { %v1285_v34 = vstv %s3178_s25  ;;  %v1295_v16 = vstv %s3180_s1  ;;  %v1321_v39 = vstv %s3182_s26  ;;  %v1331_v41 = vstv %s3188_s27  ;;  %s3502_s25 = sld [smem:[#allocation3 + $0x37]] }
 0x134   :  { %v1286_v47 = vmul.f32 %v3091_v31, %v1285_v34  ;;  %v1287_v50 = vmul.f32 %v3097_v32, %v1285_v34  ;;  %v1288_v54 = vmul.f32 %v3103_v35, %v1285_v34  ;;  %v1289_v43 = vmul.f32 %v3109_v36, %v1285_v34  ;;  %s3508_s1 = sld [smem:[#allocation5 + $0x37]] }
 0x135   :  { %v1290_v55 = vmul.f32 %v3117_v46, %v1285_v34  ;;  %v1291_v56 = vmul.f32 %v3123_v24, %v1285_v34  ;;  %v1292_v58 = vmul.f32 %v3129_v51, %v1285_v34  ;;  %v1293_v48 = vmul.f32 %v3135_v52, %v1285_v34  ;;  %s3526_s26 = sld [smem:[#allocation3 + $0x38]] }
 0x136   :  { %v1296_v61 = vadd.f32 %v1295_v16, %v1286_v47  ;;  %v1297_v59 = vadd.f32 %v1295_v16, %v1287_v50  ;;  %v1298_v53 = vadd.f32 %v1295_v16, %v1288_v54  ;;  %v1299_v62 = vadd.f32 %v1295_v16, %v1289_v43  ;;  %s3528_s27 = sld [smem:[#allocation5 + $0x38]] }
 0x137   :  { %v1300_v63 = vadd.f32 %v1295_v16, %v1290_v55  ;;  %v1301_v10 = vadd.f32 %v1295_v16, %v1291_v56  ;;  %v1302_v8 = vadd.f32 %v1295_v16, %v1292_v58  ;;  %v1303_v57 = vadd.f32 %v1295_v16, %v1293_v48 }
 0x138   :  { %v1304_v11 = vmin.f32 %v1296_v61, 0.0  ;;  %v1305_v12 = vmin.f32 %v1297_v59, 0.0  ;;  %v1306_v14 = vmin.f32 %v1298_v53, 0.0  ;;  %v1307_v60 = vmin.f32 %v1299_v62, 0.0 }
 0x139   :  { %v1308_v17 = vmin.f32 %v1300_v63, 0.0  ;;  %v1309_v0 = vmin.f32 %v1301_v10, 0.0  ;;  %v1310_v9 = vmin.f32 %v1302_v8, 0.0  ;;  %v1311_v15 = vmin.f32 %v1303_v57, 0.0 }
 0x13a   :  { %v1312_v1 = vadd.f32 %v1304_v11, %v1276_v49  ;;  %v1313_v19 = vadd.f32 %v1305_v12, %v1277_v26  ;;  %v1314_v18 = vadd.f32 %v1306_v14, %v1278_v23  ;;  %v1315_v13 = vadd.f32 %v1307_v60, %v1279_v27 }
 0x13b   :  { %v1316_v3 = vadd.f32 %v1308_v17, %v1280_v28  ;;  %v1317_v20 = vadd.f32 %v1309_v0, %v1281_v29  ;;  %v1318_v6 = vadd.f32 %v1310_v9, %v1282_v30  ;;  %v1319_v4 = vadd.f32 %v1311_v15, %v1283_v44 }
 0x13c   :  { %v1322_v33 = vmul.f32 %v3091_v31, %v1321_v39  ;;  %v1323_v21 = vmul.f32 %v3097_v32, %v1321_v39  ;;  %v1324_v37 = vmul.f32 %v3103_v35, %v1321_v39  ;;  %v1325_v7 = vmul.f32 %v3109_v36, %v1321_v39 }
 0x13d   :  { %v1326_v38 = vmul.f32 %v3117_v46, %v1321_v39  ;;  %v1327_v2 = vmul.f32 %v3123_v24, %v1321_v39  ;;  %v1328_v40 = vmul.f32 %v3129_v51, %v1321_v39  ;;  %v1329_v5 = vmul.f32 %v3135_v52, %v1321_v39 }
 0x13e   :  { %v1332_v22 = vadd.f32 %v1331_v41, %v1322_v33  ;;  %v1333_v42 = vadd.f32 %v1331_v41, %v1323_v21  ;;  %v1334_v45 = vadd.f32 %v1331_v41, %v1324_v37  ;;  %v1335_v25 = vadd.f32 %v1331_v41, %v1325_v7 }
 0x13f   :  { %v1336_v49 = vadd.f32 %v1331_v41, %v1326_v38  ;;  %v1337_v26 = vadd.f32 %v1331_v41, %v1327_v2  ;;  %v1338_v23 = vadd.f32 %v1331_v41, %v1328_v40  ;;  %v1339_v27 = vadd.f32 %v1331_v41, %v1329_v5 }
 0x140   :  { %v1340_v28 = vmin.f32 %v1332_v22, 0.0  ;;  %v1341_v29 = vmin.f32 %v1333_v42, 0.0  ;;  %v1342_v30 = vmin.f32 %v1334_v45, 0.0  ;;  %v1343_v44 = vmin.f32 %v1335_v25, 0.0 }
 0x141   :  { %v1344_v34 = vmin.f32 %v1336_v49, 0.0  ;;  %v1345_v16 = vmin.f32 %v1337_v26, 0.0  ;;  %v1346_v47 = vmin.f32 %v1338_v23, 0.0  ;;  %v1347_v39 = vmin.f32 %v1339_v27, 0.0 }
 0x142   :  { %v1348_v50 = vadd.f32 %v1340_v28, %v1312_v1  ;;  %v1349_v54 = vadd.f32 %v1341_v29, %v1313_v19  ;;  %v1350_v43 = vadd.f32 %v1342_v30, %v1314_v18  ;;  %v1351_v55 = vadd.f32 %v1343_v44, %v1315_v13 }
 0x143   :  { %v1352_v56 = vadd.f32 %v1344_v34, %v1316_v3  ;;  %v1353_v58 = vadd.f32 %v1345_v16, %v1317_v20  ;;  %v1354_v48 = vadd.f32 %v1346_v47, %v1318_v6  ;;  %v1355_v41 = vadd.f32 %v1347_v39, %v1319_v4 }
 0x144   :  { %v1357_v61 = vstv %s3206_s2  ;;  %v1367_v59 = vstv %s3208_s28  ;;  %v1393_v53 = vstv %s3210_s29  ;;  %v1403_v62 = vstv %s3216_s30  ;;  %s3530_s2 = sld [smem:[#allocation3 + $0x39]] }
 0x145   :  { %v1358_v63 = vmul.f32 %v3091_v31, %v1357_v61  ;;  %v1359_v10 = vmul.f32 %v3097_v32, %v1357_v61  ;;  %v1360_v8 = vmul.f32 %v3103_v35, %v1357_v61  ;;  %v1361_v57 = vmul.f32 %v3109_v36, %v1357_v61  ;;  %s3536_s28 = sld [smem:[#allocation5 + $0x39]] }
 0x146   :  { %v1362_v11 = vmul.f32 %v3117_v46, %v1357_v61  ;;  %v1363_v12 = vmul.f32 %v3123_v24, %v1357_v61  ;;  %v1364_v14 = vmul.f32 %v3129_v51, %v1357_v61  ;;  %v1365_v60 = vmul.f32 %v3135_v52, %v1357_v61  ;;  %s3554_s29 = sld [smem:[#allocation3 + $0x3a]] }
 0x147   :  { %v1368_v17 = vadd.f32 %v1367_v59, %v1358_v63  ;;  %v1369_v0 = vadd.f32 %v1367_v59, %v1359_v10  ;;  %v1370_v9 = vadd.f32 %v1367_v59, %v1360_v8  ;;  %v1371_v15 = vadd.f32 %v1367_v59, %v1361_v57  ;;  %s3556_s30 = sld [smem:[#allocation5 + $0x3a]] }
 0x148   :  { %v1372_v1 = vadd.f32 %v1367_v59, %v1362_v11  ;;  %v1373_v19 = vadd.f32 %v1367_v59, %v1363_v12  ;;  %v1374_v18 = vadd.f32 %v1367_v59, %v1364_v14  ;;  %v1375_v13 = vadd.f32 %v1367_v59, %v1365_v60 }
 0x149   :  { %v1376_v3 = vmin.f32 %v1368_v17, 0.0  ;;  %v1377_v20 = vmin.f32 %v1369_v0, 0.0  ;;  %v1378_v6 = vmin.f32 %v1370_v9, 0.0  ;;  %v1379_v4 = vmin.f32 %v1371_v15, 0.0 }
 0x14a   :  { %v1380_v33 = vmin.f32 %v1372_v1, 0.0  ;;  %v1381_v21 = vmin.f32 %v1373_v19, 0.0  ;;  %v1382_v37 = vmin.f32 %v1374_v18, 0.0  ;;  %v1383_v7 = vmin.f32 %v1375_v13, 0.0 }
 0x14b   :  { %v1384_v38 = vadd.f32 %v1376_v3, %v1348_v50  ;;  %v1385_v2 = vadd.f32 %v1377_v20, %v1349_v54  ;;  %v1386_v40 = vadd.f32 %v1378_v6, %v1350_v43  ;;  %v1387_v5 = vadd.f32 %v1379_v4, %v1351_v55 }
 0x14c   :  { %v1388_v22 = vadd.f32 %v1380_v33, %v1352_v56  ;;  %v1389_v42 = vadd.f32 %v1381_v21, %v1353_v58  ;;  %v1390_v45 = vadd.f32 %v1382_v37, %v1354_v48  ;;  %v1391_v25 = vadd.f32 %v1383_v7, %v1355_v41 }
 0x14d   :  { %v1394_v49 = vmul.f32 %v3091_v31, %v1393_v53  ;;  %v1395_v26 = vmul.f32 %v3097_v32, %v1393_v53  ;;  %v1396_v23 = vmul.f32 %v3103_v35, %v1393_v53  ;;  %v1397_v27 = vmul.f32 %v3109_v36, %v1393_v53 }
 0x14e   :  { %v1398_v28 = vmul.f32 %v3117_v46, %v1393_v53  ;;  %v1399_v29 = vmul.f32 %v3123_v24, %v1393_v53  ;;  %v1400_v30 = vmul.f32 %v3129_v51, %v1393_v53  ;;  %v1401_v44 = vmul.f32 %v3135_v52, %v1393_v53 }
 0x14f   :  { %v1404_v34 = vadd.f32 %v1403_v62, %v1394_v49  ;;  %v1405_v16 = vadd.f32 %v1403_v62, %v1395_v26  ;;  %v1406_v47 = vadd.f32 %v1403_v62, %v1396_v23  ;;  %v1407_v39 = vadd.f32 %v1403_v62, %v1397_v27 }
 0x150   :  { %v1408_v50 = vadd.f32 %v1403_v62, %v1398_v28  ;;  %v1409_v54 = vadd.f32 %v1403_v62, %v1399_v29  ;;  %v1410_v43 = vadd.f32 %v1403_v62, %v1400_v30  ;;  %v1411_v55 = vadd.f32 %v1403_v62, %v1401_v44 }
 0x151   :  { %v1412_v56 = vmin.f32 %v1404_v34, 0.0  ;;  %v1413_v58 = vmin.f32 %v1405_v16, 0.0  ;;  %v1414_v48 = vmin.f32 %v1406_v47, 0.0  ;;  %v1415_v41 = vmin.f32 %v1407_v39, 0.0 }
 0x152   :  { %v1416_v61 = vmin.f32 %v1408_v50, 0.0  ;;  %v1417_v59 = vmin.f32 %v1409_v54, 0.0  ;;  %v1418_v63 = vmin.f32 %v1410_v43, 0.0  ;;  %v1419_v53 = vmin.f32 %v1411_v55, 0.0 }
 0x153   :  { %v1420_v10 = vadd.f32 %v1412_v56, %v1384_v38  ;;  %v1421_v8 = vadd.f32 %v1413_v58, %v1385_v2  ;;  %v1422_v57 = vadd.f32 %v1414_v48, %v1386_v40  ;;  %v1423_v11 = vadd.f32 %v1415_v41, %v1387_v5 }
 0x154   :  { %v1424_v12 = vadd.f32 %v1416_v61, %v1388_v22  ;;  %v1425_v14 = vadd.f32 %v1417_v59, %v1389_v42  ;;  %v1426_v60 = vadd.f32 %v1418_v63, %v1390_v45  ;;  %v1427_v62 = vadd.f32 %v1419_v53, %v1391_v25 }
 0x155   :  { %v1429_v17 = vstv %s3234_s5  ;;  %v1439_v0 = vstv %s3236_s6  ;;  %v1465_v9 = vstv %s3238_s7  ;;  %v1475_v15 = vstv %s3244_s8  ;;  %s3386_s8 = sld [smem:[#allocation3 + $0x2e]] }
 0x156   :  { %v1430_v1 = vmul.f32 %v3091_v31, %v1429_v17  ;;  %v1431_v19 = vmul.f32 %v3097_v32, %v1429_v17  ;;  %v1432_v18 = vmul.f32 %v3103_v35, %v1429_v17  ;;  %v1433_v13 = vmul.f32 %v3109_v36, %v1429_v17  ;;  %s3558_s5 = sld [smem:[#allocation3 + $0x3b]] }
 0x157   :  { %v1434_v3 = vmul.f32 %v3117_v46, %v1429_v17  ;;  %v1435_v20 = vmul.f32 %v3123_v24, %v1429_v17  ;;  %v1436_v6 = vmul.f32 %v3129_v51, %v1429_v17  ;;  %v1437_v4 = vmul.f32 %v3135_v52, %v1429_v17  ;;  %s3564_s6 = sld [smem:[#allocation5 + $0x3b]] }
 0x158   :  { %v1440_v33 = vadd.f32 %v1439_v0, %v1430_v1  ;;  %v1441_v21 = vadd.f32 %v1439_v0, %v1431_v19  ;;  %v1442_v37 = vadd.f32 %v1439_v0, %v1432_v18  ;;  %v1443_v7 = vadd.f32 %v1439_v0, %v1433_v13  ;;  %s3582_s7 = sld [smem:[#allocation3 + $0x3c]] }
 0x159   :  { %v1444_v38 = vadd.f32 %v1439_v0, %v1434_v3  ;;  %v1445_v2 = vadd.f32 %v1439_v0, %v1435_v20  ;;  %v1446_v40 = vadd.f32 %v1439_v0, %v1436_v6  ;;  %v1447_v5 = vadd.f32 %v1439_v0, %v1437_v4 }
 0x15a   :  { %v1448_v22 = vmin.f32 %v1440_v33, 0.0  ;;  %v1449_v42 = vmin.f32 %v1441_v21, 0.0  ;;  %v1450_v45 = vmin.f32 %v1442_v37, 0.0  ;;  %v1451_v25 = vmin.f32 %v1443_v7, 0.0 }
 0x15b   :  { %v1452_v49 = vmin.f32 %v1444_v38, 0.0  ;;  %v1453_v26 = vmin.f32 %v1445_v2, 0.0  ;;  %v1454_v23 = vmin.f32 %v1446_v40, 0.0  ;;  %v1455_v27 = vmin.f32 %v1447_v5, 0.0 }
 0x15c   :  { %v1456_v28 = vadd.f32 %v1448_v22, %v1420_v10  ;;  %v1457_v29 = vadd.f32 %v1449_v42, %v1421_v8  ;;  %v1458_v30 = vadd.f32 %v1450_v45, %v1422_v57  ;;  %v1459_v44 = vadd.f32 %v1451_v25, %v1423_v11 }
 0x15d   :  { %v1460_v34 = vadd.f32 %v1452_v49, %v1424_v12  ;;  %v1461_v16 = vadd.f32 %v1453_v26, %v1425_v14  ;;  %v1462_v47 = vadd.f32 %v1454_v23, %v1426_v60  ;;  %v1463_v39 = vadd.f32 %v1455_v27, %v1427_v62 }
 0x15e   :  { %v1466_v50 = vmul.f32 %v3091_v31, %v1465_v9  ;;  %v1467_v54 = vmul.f32 %v3097_v32, %v1465_v9  ;;  %v1468_v43 = vmul.f32 %v3103_v35, %v1465_v9  ;;  %v1469_v55 = vmul.f32 %v3109_v36, %v1465_v9 }
 0x15f   :  { %v1470_v56 = vmul.f32 %v3117_v46, %v1465_v9  ;;  %v1471_v58 = vmul.f32 %v3123_v24, %v1465_v9  ;;  %v1472_v48 = vmul.f32 %v3129_v51, %v1465_v9  ;;  %v1473_v41 = vmul.f32 %v3135_v52, %v1465_v9 }
 0x160   :  { %v1476_v61 = vadd.f32 %v1475_v15, %v1466_v50  ;;  %v1477_v59 = vadd.f32 %v1475_v15, %v1467_v54  ;;  %v1478_v63 = vadd.f32 %v1475_v15, %v1468_v43  ;;  %v1479_v53 = vadd.f32 %v1475_v15, %v1469_v55 }
 0x161   :  { %v1480_v10 = vadd.f32 %v1475_v15, %v1470_v56  ;;  %v1481_v8 = vadd.f32 %v1475_v15, %v1471_v58  ;;  %v1482_v57 = vadd.f32 %v1475_v15, %v1472_v48  ;;  %v1483_v11 = vadd.f32 %v1475_v15, %v1473_v41 }
 0x162   :  { %v1484_v12 = vmin.f32 %v1476_v61, 0.0  ;;  %v1485_v14 = vmin.f32 %v1477_v59, 0.0  ;;  %v1486_v60 = vmin.f32 %v1478_v63, 0.0  ;;  %v1487_v62 = vmin.f32 %v1479_v53, 0.0 }
 0x163   :  { %v1488_v17 = vmin.f32 %v1480_v10, 0.0  ;;  %v1489_v0 = vmin.f32 %v1481_v8, 0.0  ;;  %v1490_v1 = vmin.f32 %v1482_v57, 0.0  ;;  %v1491_v9 = vmin.f32 %v1483_v11, 0.0 }
 0x164   :  { %v1492_v19 = vadd.f32 %v1484_v12, %v1456_v28  ;;  %v1493_v18 = vadd.f32 %v1485_v14, %v1457_v29  ;;  %v1494_v13 = vadd.f32 %v1486_v60, %v1458_v30  ;;  %v1495_v3 = vadd.f32 %v1487_v62, %v1459_v44 }
 0x165   :  { %v1496_v20 = vadd.f32 %v1488_v17, %v1460_v34  ;;  %v1497_v6 = vadd.f32 %v1489_v0, %v1461_v16  ;;  %v1498_v4 = vadd.f32 %v1490_v1, %v1462_v47  ;;  %v1499_v15 = vadd.f32 %v1491_v9, %v1463_v39 }
 0x166   :  { %v1501_v33 = vstv %s3262_s9  ;;  %v1511_v21 = vstv %s3264_s10  ;;  %v1537_v37 = vstv %s3266_s11  ;;  %v1547_v7 = vstv %s3272_s12  ;;  %s3388_s9 = sld [smem:[#allocation5 + $0x2e]] }
 0x167   :  { %v1502_v38 = vmul.f32 %v3091_v31, %v1501_v33  ;;  %v1503_v2 = vmul.f32 %v3097_v32, %v1501_v33  ;;  %v1504_v40 = vmul.f32 %v3103_v35, %v1501_v33  ;;  %v1505_v5 = vmul.f32 %v3109_v36, %v1501_v33  ;;  %s3390_s10 = sld [smem:[#allocation3 + $0x2f]] }
 0x168   :  { %v1506_v22 = vmul.f32 %v3117_v46, %v1501_v33  ;;  %v1507_v42 = vmul.f32 %v3123_v24, %v1501_v33  ;;  %v1508_v45 = vmul.f32 %v3129_v51, %v1501_v33  ;;  %v1509_v25 = vmul.f32 %v3135_v52, %v1501_v33  ;;  %s3396_s11 = sld [smem:[#allocation5 + $0x2f]] }
 0x169   :  { %v1512_v49 = vadd.f32 %v1511_v21, %v1502_v38  ;;  %v1513_v26 = vadd.f32 %v1511_v21, %v1503_v2  ;;  %v1514_v23 = vadd.f32 %v1511_v21, %v1504_v40  ;;  %v1515_v27 = vadd.f32 %v1511_v21, %v1505_v5  ;;  %s3414_s12 = sld [smem:[#allocation3 + $0x30]] }
 0x16a   :  { %v1516_v28 = vadd.f32 %v1511_v21, %v1506_v22  ;;  %v1517_v29 = vadd.f32 %v1511_v21, %v1507_v42  ;;  %v1518_v30 = vadd.f32 %v1511_v21, %v1508_v45  ;;  %v1519_v44 = vadd.f32 %v1511_v21, %v1509_v25 }
 0x16b   :  { %v1520_v34 = vmin.f32 %v1512_v49, 0.0  ;;  %v1521_v16 = vmin.f32 %v1513_v26, 0.0  ;;  %v1522_v47 = vmin.f32 %v1514_v23, 0.0  ;;  %v1523_v39 = vmin.f32 %v1515_v27, 0.0 }
 0x16c   :  { %v1524_v50 = vmin.f32 %v1516_v28, 0.0  ;;  %v1525_v54 = vmin.f32 %v1517_v29, 0.0  ;;  %v1526_v43 = vmin.f32 %v1518_v30, 0.0  ;;  %v1527_v55 = vmin.f32 %v1519_v44, 0.0 }
 0x16d   :  { %v1528_v56 = vadd.f32 %v1520_v34, %v1492_v19  ;;  %v1529_v58 = vadd.f32 %v1521_v16, %v1493_v18  ;;  %v1530_v48 = vadd.f32 %v1522_v47, %v1494_v13  ;;  %v1531_v41 = vadd.f32 %v1523_v39, %v1495_v3 }
 0x16e   :  { %v1532_v61 = vadd.f32 %v1524_v50, %v1496_v20  ;;  %v1533_v59 = vadd.f32 %v1525_v54, %v1497_v6  ;;  %v1534_v63 = vadd.f32 %v1526_v43, %v1498_v4  ;;  %v1535_v53 = vadd.f32 %v1527_v55, %v1499_v15 }
 0x16f   :  { %v1538_v10 = vmul.f32 %v3091_v31, %v1537_v37  ;;  %v1539_v8 = vmul.f32 %v3097_v32, %v1537_v37  ;;  %v1540_v57 = vmul.f32 %v3103_v35, %v1537_v37  ;;  %v1541_v11 = vmul.f32 %v3109_v36, %v1537_v37 }
 0x170   :  { %v1542_v12 = vmul.f32 %v3117_v46, %v1537_v37  ;;  %v1543_v14 = vmul.f32 %v3123_v24, %v1537_v37  ;;  %v1544_v60 = vmul.f32 %v3129_v51, %v1537_v37  ;;  %v1545_v62 = vmul.f32 %v3135_v52, %v1537_v37 }
 0x171   :  { %v1548_v17 = vadd.f32 %v1547_v7, %v1538_v10  ;;  %v1549_v0 = vadd.f32 %v1547_v7, %v1539_v8  ;;  %v1550_v1 = vadd.f32 %v1547_v7, %v1540_v57  ;;  %v1551_v9 = vadd.f32 %v1547_v7, %v1541_v11 }
 0x172   :  { %v1552_v19 = vadd.f32 %v1547_v7, %v1542_v12  ;;  %v1553_v18 = vadd.f32 %v1547_v7, %v1543_v14  ;;  %v1554_v13 = vadd.f32 %v1547_v7, %v1544_v60  ;;  %v1555_v3 = vadd.f32 %v1547_v7, %v1545_v62 }
 0x173   :  { %v1556_v20 = vmin.f32 %v1548_v17, 0.0  ;;  %v1557_v6 = vmin.f32 %v1549_v0, 0.0  ;;  %v1558_v4 = vmin.f32 %v1550_v1, 0.0  ;;  %v1559_v15 = vmin.f32 %v1551_v9, 0.0 }
 0x174   :  { %v1560_v33 = vmin.f32 %v1552_v19, 0.0  ;;  %v1561_v21 = vmin.f32 %v1553_v18, 0.0  ;;  %v1562_v38 = vmin.f32 %v1554_v13, 0.0  ;;  %v1563_v37 = vmin.f32 %v1555_v3, 0.0 }
 0x175   :  { %v1564_v2 = vadd.f32 %v1556_v20, %v1528_v56  ;;  %v1565_v40 = vadd.f32 %v1557_v6, %v1529_v58  ;;  %v1566_v5 = vadd.f32 %v1558_v4, %v1530_v48  ;;  %v1567_v22 = vadd.f32 %v1559_v15, %v1531_v41 }
 0x176   :  { %v1568_v42 = vadd.f32 %v1560_v33, %v1532_v61  ;;  %v1569_v45 = vadd.f32 %v1561_v21, %v1533_v59  ;;  %v1570_v25 = vadd.f32 %v1562_v38, %v1534_v63  ;;  %v1571_v7 = vadd.f32 %v1563_v37, %v1535_v53 }
 0x177   :  { %v1573_v49 = vstv %s3290_s13  ;;  %v1583_v26 = vstv %s3292_s14  ;;  %v1609_v23 = vstv %s3294_s15  ;;  %v1619_v27 = vstv %s3300_s16  ;;  %s3416_s13 = sld [smem:[#allocation5 + $0x30]] }
 0x178   :  { %v1574_v28 = vmul.f32 %v3091_v31, %v1573_v49  ;;  %v1575_v29 = vmul.f32 %v3097_v32, %v1573_v49  ;;  %v1576_v30 = vmul.f32 %v3103_v35, %v1573_v49  ;;  %v1577_v44 = vmul.f32 %v3109_v36, %v1573_v49  ;;  %s3418_s14 = sld [smem:[#allocation3 + $0x31]] }
 0x179   :  { %v1578_v34 = vmul.f32 %v3117_v46, %v1573_v49  ;;  %v1579_v16 = vmul.f32 %v3123_v24, %v1573_v49  ;;  %v1580_v47 = vmul.f32 %v3129_v51, %v1573_v49  ;;  %v1581_v39 = vmul.f32 %v3135_v52, %v1573_v49  ;;  %s3424_s15 = sld [smem:[#allocation5 + $0x31]] }
 0x17a   :  { %v1584_v50 = vadd.f32 %v1583_v26, %v1574_v28  ;;  %v1585_v54 = vadd.f32 %v1583_v26, %v1575_v29  ;;  %v1586_v43 = vadd.f32 %v1583_v26, %v1576_v30  ;;  %v1587_v55 = vadd.f32 %v1583_v26, %v1577_v44  ;;  %s3442_s16 = sld [smem:[#allocation3 + $0x32]] }
 0x17b   :  { %v1588_v56 = vadd.f32 %v1583_v26, %v1578_v34  ;;  %v1589_v58 = vadd.f32 %v1583_v26, %v1579_v16  ;;  %v1590_v48 = vadd.f32 %v1583_v26, %v1580_v47  ;;  %v1591_v41 = vadd.f32 %v1583_v26, %v1581_v39  ;;  %v3341_v34 = vld [vmem:[%s3710_s0] sm:$0xff]  ;;  %v3347_v47 = vld [vmem:[%s3710_s0 + $0x8] sm:$0xff] }
 0x17c   :  { %v1592_v61 = vmin.f32 %v1584_v50, 0.0  ;;  %v1593_v59 = vmin.f32 %v1585_v54, 0.0  ;;  %v1594_v63 = vmin.f32 %v1586_v43, 0.0  ;;  %v1595_v53 = vmin.f32 %v1587_v55, 0.0  ;;  %v3353_v50 = vld [vmem:[%s3710_s0 + $0x10] sm:$0xff]  ;;  %v3359_v43 = vld [vmem:[%s3710_s0 + $0x18] sm:$0xff] }
 0x17d   :  { %v1596_v10 = vmin.f32 %v1588_v56, 0.0  ;;  %v1597_v8 = vmin.f32 %v1589_v58, 0.0  ;;  %v1598_v57 = vmin.f32 %v1590_v48, 0.0  ;;  %v1599_v11 = vmin.f32 %v1591_v41, 0.0  ;;  %v3365_v56 = vld [vmem:[%s3710_s0 + $0x20] sm:$0xff]  ;;  %v3371_v48 = vld [vmem:[%s3710_s0 + $0x28] sm:$0xff] }
 0x17e   :  { %v1600_v12 = vadd.f32 %v1592_v61, %v1564_v2  ;;  %v1601_v14 = vadd.f32 %v1593_v59, %v1565_v40  ;;  %v1602_v60 = vadd.f32 %v1594_v63, %v1566_v5  ;;  %v1603_v62 = vadd.f32 %v1595_v53, %v1567_v22  ;;  %v3377_v61 = vld [vmem:[%s3710_s0 + $0x30] sm:$0xff]  ;;  %v3383_v63 = vld [vmem:[%s3710_s0 + $0x38] sm:$0xff] }
 0x17f   :  { %v1604_v17 = vadd.f32 %v1596_v10, %v1568_v42  ;;  %v1605_v0 = vadd.f32 %v1597_v8, %v1569_v45  ;;  %v1606_v1 = vadd.f32 %v1598_v57, %v1570_v25  ;;  %v1607_v9 = vadd.f32 %v1599_v11, %v1571_v7 }
 0x180   :  { %v1610_v19 = vmul.f32 %v3091_v31, %v1609_v23  ;;  %v1611_v18 = vmul.f32 %v3097_v32, %v1609_v23  ;;  %v1612_v13 = vmul.f32 %v3103_v35, %v1609_v23  ;;  %v1613_v3 = vmul.f32 %v3109_v36, %v1609_v23 }
 0x181   :  { %v1614_v20 = vmul.f32 %v3117_v46, %v1609_v23  ;;  %v1615_v6 = vmul.f32 %v3123_v24, %v1609_v23  ;;  %v1616_v4 = vmul.f32 %v3129_v51, %v1609_v23  ;;  %v1617_v15 = vmul.f32 %v3135_v52, %v1609_v23 }
 0x182   :  { %v1620_v33 = vadd.f32 %v1619_v27, %v1610_v19  ;;  %v1621_v21 = vadd.f32 %v1619_v27, %v1611_v18  ;;  %v1622_v38 = vadd.f32 %v1619_v27, %v1612_v13  ;;  %v1623_v31 = vadd.f32 %v1619_v27, %v1613_v3 }
 0x183   :  { %v1624_v37 = vadd.f32 %v1619_v27, %v1614_v20  ;;  %v1625_v32 = vadd.f32 %v1619_v27, %v1615_v6  ;;  %v1626_v2 = vadd.f32 %v1619_v27, %v1616_v4  ;;  %v1627_v35 = vadd.f32 %v1619_v27, %v1617_v15 }
 0x184   :  { %v1628_v40 = vmin.f32 %v1620_v33, 0.0  ;;  %v1629_v36 = vmin.f32 %v1621_v21, 0.0  ;;  %v1630_v5 = vmin.f32 %v1622_v38, 0.0  ;;  %v1631_v46 = vmin.f32 %v1623_v31, 0.0 }
 0x185   :  { %v1632_v24 = vmin.f32 %v1624_v37, 0.0  ;;  %v1633_v51 = vmin.f32 %v1625_v32, 0.0  ;;  %v1634_v22 = vmin.f32 %v1626_v2, 0.0  ;;  %v1635_v52 = vmin.f32 %v1627_v35, 0.0 }
 0x186   :  { %v1636_v42 = vadd.f32 %v1628_v40, %v1600_v12  ;;  %v1637_v45 = vadd.f32 %v1629_v36, %v1601_v14  ;;  %v1638_v25 = vadd.f32 %v1630_v5, %v1602_v60  ;;  %v1639_v7 = vadd.f32 %v1631_v46, %v1603_v62 }
 0x187   :  { %v1640_v49 = vadd.f32 %v1632_v24, %v1604_v17  ;;  %v1641_v26 = vadd.f32 %v1633_v51, %v1605_v0  ;;  %v1642_v23 = vadd.f32 %v1634_v22, %v1606_v1  ;;  %v1643_v27 = vadd.f32 %v1635_v52, %v1607_v9 }
 0x188   :  { %v1645_v28 = vstv %s3318_s3  ;;  %v1655_v29 = vstv %s3320_s17  ;;  %v1681_v30 = vstv %s3322_s18  ;;  %v1691_v44 = vstv %s3328_s19  ;;  %s3444_s3 = sld [smem:[#allocation5 + $0x32]] }
 0x189   :  { %v1646_v16 = vmul.f32 %v3341_v34, %v1645_v28  ;;  %v1647_v39 = vmul.f32 %v3347_v47, %v1645_v28  ;;  %v1648_v54 = vmul.f32 %v3353_v50, %v1645_v28  ;;  %v1649_v55 = vmul.f32 %v3359_v43, %v1645_v28  ;;  %s3446_s17 = sld [smem:[#allocation3 + $0x33]] }
 0x18a   :  { %v1650_v58 = vmul.f32 %v3365_v56, %v1645_v28  ;;  %v1651_v41 = vmul.f32 %v3371_v48, %v1645_v28  ;;  %v1652_v59 = vmul.f32 %v3377_v61, %v1645_v28  ;;  %v1653_v53 = vmul.f32 %v3383_v63, %v1645_v28  ;;  %s3452_s18 = sld [smem:[#allocation5 + $0x33]] }
 0x18b   :  { %v1656_v10 = vadd.f32 %v1655_v29, %v1646_v16  ;;  %v1657_v8 = vadd.f32 %v1655_v29, %v1647_v39  ;;  %v1658_v57 = vadd.f32 %v1655_v29, %v1648_v54  ;;  %v1659_v11 = vadd.f32 %v1655_v29, %v1649_v55  ;;  %s3470_s19 = sld [smem:[#allocation3 + $0x34]] }
 0x18c   :  { %v1660_v12 = vadd.f32 %v1655_v29, %v1650_v58  ;;  %v1661_v14 = vadd.f32 %v1655_v29, %v1651_v41  ;;  %v1662_v60 = vadd.f32 %v1655_v29, %v1652_v59  ;;  %v1663_v62 = vadd.f32 %v1655_v29, %v1653_v53 }
 0x18d   :  { %v1664_v17 = vmin.f32 %v1656_v10, 0.0  ;;  %v1665_v0 = vmin.f32 %v1657_v8, 0.0  ;;  %v1666_v1 = vmin.f32 %v1658_v57, 0.0  ;;  %v1667_v9 = vmin.f32 %v1659_v11, 0.0 }
 0x18e   :  { %v1668_v19 = vmin.f32 %v1660_v12, 0.0  ;;  %v1669_v18 = vmin.f32 %v1661_v14, 0.0  ;;  %v1670_v13 = vmin.f32 %v1662_v60, 0.0  ;;  %v1671_v3 = vmin.f32 %v1663_v62, 0.0 }
 0x18f   :  { %v1672_v20 = vadd.f32 %v1664_v17, %v1636_v42  ;;  %v1673_v6 = vadd.f32 %v1665_v0, %v1637_v45  ;;  %v1674_v4 = vadd.f32 %v1666_v1, %v1638_v25  ;;  %v1675_v15 = vadd.f32 %v1667_v9, %v1639_v7 }
 0x190   :  { %v1676_v33 = vadd.f32 %v1668_v19, %v1640_v49  ;;  %v1677_v21 = vadd.f32 %v1669_v18, %v1641_v26  ;;  %v1678_v38 = vadd.f32 %v1670_v13, %v1642_v23  ;;  %v1679_v31 = vadd.f32 %v1671_v3, %v1643_v27 }
 0x191   :  { %v1682_v37 = vmul.f32 %v3341_v34, %v1681_v30  ;;  %v1683_v32 = vmul.f32 %v3347_v47, %v1681_v30  ;;  %v1684_v2 = vmul.f32 %v3353_v50, %v1681_v30  ;;  %v1685_v35 = vmul.f32 %v3359_v43, %v1681_v30 }
 0x192   :  { %v1686_v40 = vmul.f32 %v3365_v56, %v1681_v30  ;;  %v1687_v36 = vmul.f32 %v3371_v48, %v1681_v30  ;;  %v1688_v5 = vmul.f32 %v3377_v61, %v1681_v30  ;;  %v1689_v46 = vmul.f32 %v3383_v63, %v1681_v30 }
 0x193   :  { %v1692_v24 = vadd.f32 %v1691_v44, %v1682_v37  ;;  %v1693_v51 = vadd.f32 %v1691_v44, %v1683_v32  ;;  %v1694_v22 = vadd.f32 %v1691_v44, %v1684_v2  ;;  %v1695_v52 = vadd.f32 %v1691_v44, %v1685_v35 }
 0x194   :  { %v1696_v42 = vadd.f32 %v1691_v44, %v1686_v40  ;;  %v1697_v45 = vadd.f32 %v1691_v44, %v1687_v36  ;;  %v1698_v25 = vadd.f32 %v1691_v44, %v1688_v5  ;;  %v1699_v7 = vadd.f32 %v1691_v44, %v1689_v46 }
 0x195   :  { %v1700_v49 = vmin.f32 %v1692_v24, 0.0  ;;  %v1701_v26 = vmin.f32 %v1693_v51, 0.0  ;;  %v1702_v23 = vmin.f32 %v1694_v22, 0.0  ;;  %v1703_v27 = vmin.f32 %v1695_v52, 0.0 }
 0x196   :  { %v1704_v28 = vmin.f32 %v1696_v42, 0.0  ;;  %v1705_v29 = vmin.f32 %v1697_v45, 0.0  ;;  %v1706_v16 = vmin.f32 %v1698_v25, 0.0  ;;  %v1707_v30 = vmin.f32 %v1699_v7, 0.0 }
 0x197   :  { %v1708_v39 = vadd.f32 %v1700_v49, %v1672_v20  ;;  %v1709_v54 = vadd.f32 %v1701_v26, %v1673_v6  ;;  %v1710_v55 = vadd.f32 %v1702_v23, %v1674_v4  ;;  %v1711_v58 = vadd.f32 %v1703_v27, %v1675_v15 }
 0x198   :  { %v1712_v41 = vadd.f32 %v1704_v28, %v1676_v33  ;;  %v1713_v59 = vadd.f32 %v1705_v29, %v1677_v21  ;;  %v1714_v53 = vadd.f32 %v1706_v16, %v1678_v38  ;;  %v1715_v44 = vadd.f32 %v1707_v30, %v1679_v31 }
 0x199   :  { %v1717_v10 = vstv %s3386_s8  ;;  %v1727_v8 = vstv %s3388_s9  ;;  %v1753_v57 = vstv %s3390_s10  ;;  %v1763_v11 = vstv %s3396_s11  ;;  %s3584_s8 = sld [smem:[#allocation5 + $0x3c]] }
 0x19a   :  { %v1718_v12 = vmul.f32 %v3341_v34, %v1717_v10  ;;  %v1719_v14 = vmul.f32 %v3347_v47, %v1717_v10  ;;  %v1720_v60 = vmul.f32 %v3353_v50, %v1717_v10  ;;  %v1721_v62 = vmul.f32 %v3359_v43, %v1717_v10 }
 0x19b   :  { %v1722_v17 = vmul.f32 %v3365_v56, %v1717_v10  ;;  %v1723_v0 = vmul.f32 %v3371_v48, %v1717_v10  ;;  %v1724_v1 = vmul.f32 %v3377_v61, %v1717_v10  ;;  %v1725_v9 = vmul.f32 %v3383_v63, %v1717_v10 }
 0x19c   :  { %v1728_v19 = vadd.f32 %v1727_v8, %v1718_v12  ;;  %v1729_v18 = vadd.f32 %v1727_v8, %v1719_v14  ;;  %v1730_v13 = vadd.f32 %v1727_v8, %v1720_v60  ;;  %v1731_v3 = vadd.f32 %v1727_v8, %v1721_v62 }
 0x19d   :  { %v1732_v20 = vadd.f32 %v1727_v8, %v1722_v17  ;;  %v1733_v6 = vadd.f32 %v1727_v8, %v1723_v0  ;;  %v1734_v4 = vadd.f32 %v1727_v8, %v1724_v1  ;;  %v1735_v15 = vadd.f32 %v1727_v8, %v1725_v9 }
 0x19e   :  { %v1736_v33 = vmin.f32 %v1728_v19, 0.0  ;;  %v1737_v21 = vmin.f32 %v1729_v18, 0.0  ;;  %v1738_v38 = vmin.f32 %v1730_v13, 0.0  ;;  %v1739_v31 = vmin.f32 %v1731_v3, 0.0 }
 0x19f   :  { %v1740_v37 = vmin.f32 %v1732_v20, 0.0  ;;  %v1741_v32 = vmin.f32 %v1733_v6, 0.0  ;;  %v1742_v2 = vmin.f32 %v1734_v4, 0.0  ;;  %v1743_v35 = vmin.f32 %v1735_v15, 0.0 }
 0x1a0   :  { %v1744_v40 = vadd.f32 %v1736_v33, %v1708_v39  ;;  %v1745_v36 = vadd.f32 %v1737_v21, %v1709_v54  ;;  %v1746_v5 = vadd.f32 %v1738_v38, %v1710_v55  ;;  %v1747_v46 = vadd.f32 %v1739_v31, %v1711_v58 }
 0x1a1   :  { %v1748_v24 = vadd.f32 %v1740_v37, %v1712_v41  ;;  %v1749_v51 = vadd.f32 %v1741_v32, %v1713_v59  ;;  %v1750_v22 = vadd.f32 %v1742_v2, %v1714_v53  ;;  %v1751_v52 = vadd.f32 %v1743_v35, %v1715_v44 }
 0x1a2   :  { %v1754_v42 = vmul.f32 %v3341_v34, %v1753_v57  ;;  %v1755_v45 = vmul.f32 %v3347_v47, %v1753_v57  ;;  %v1756_v25 = vmul.f32 %v3353_v50, %v1753_v57  ;;  %v1757_v7 = vmul.f32 %v3359_v43, %v1753_v57 }
 0x1a3   :  { %v1758_v49 = vmul.f32 %v3365_v56, %v1753_v57  ;;  %v1759_v26 = vmul.f32 %v3371_v48, %v1753_v57  ;;  %v1760_v23 = vmul.f32 %v3377_v61, %v1753_v57  ;;  %v1761_v27 = vmul.f32 %v3383_v63, %v1753_v57 }
 0x1a4   :  { %v1764_v28 = vadd.f32 %v1763_v11, %v1754_v42  ;;  %v1765_v29 = vadd.f32 %v1763_v11, %v1755_v45  ;;  %v1766_v16 = vadd.f32 %v1763_v11, %v1756_v25  ;;  %v1767_v30 = vadd.f32 %v1763_v11, %v1757_v7 }
 0x1a5   :  { %v1768_v39 = vadd.f32 %v1763_v11, %v1758_v49  ;;  %v1769_v54 = vadd.f32 %v1763_v11, %v1759_v26  ;;  %v1770_v55 = vadd.f32 %v1763_v11, %v1760_v23  ;;  %v1771_v58 = vadd.f32 %v1763_v11, %v1761_v27 }
 0x1a6   :  { %v1772_v41 = vmin.f32 %v1764_v28, 0.0  ;;  %v1773_v59 = vmin.f32 %v1765_v29, 0.0  ;;  %v1774_v53 = vmin.f32 %v1766_v16, 0.0  ;;  %v1775_v44 = vmin.f32 %v1767_v30, 0.0 }
 0x1a7   :  { %v1776_v10 = vmin.f32 %v1768_v39, 0.0  ;;  %v1777_v8 = vmin.f32 %v1769_v54, 0.0  ;;  %v1778_v12 = vmin.f32 %v1770_v55, 0.0  ;;  %v1779_v57 = vmin.f32 %v1771_v58, 0.0 }
 0x1a8   :  { %v1780_v14 = vadd.f32 %v1772_v41, %v1744_v40  ;;  %v1781_v60 = vadd.f32 %v1773_v59, %v1745_v36  ;;  %v1782_v62 = vadd.f32 %v1774_v53, %v1746_v5  ;;  %v1783_v17 = vadd.f32 %v1775_v44, %v1747_v46 }
 0x1a9   :  { %v1784_v0 = vadd.f32 %v1776_v10, %v1748_v24  ;;  %v1785_v1 = vadd.f32 %v1777_v8, %v1749_v51  ;;  %v1786_v9 = vadd.f32 %v1778_v12, %v1750_v22  ;;  %v1787_v11 = vadd.f32 %v1779_v57, %v1751_v52 }
 0x1aa   :  { %v1789_v19 = vstv %s3414_s12  ;;  %v1799_v18 = vstv %s3416_s13  ;;  %v1825_v13 = vstv %s3418_s14  ;;  %v1835_v3 = vstv %s3424_s15 }
 0x1ab   :  { %v1790_v20 = vmul.f32 %v3341_v34, %v1789_v19  ;;  %v1791_v6 = vmul.f32 %v3347_v47, %v1789_v19  ;;  %v1792_v4 = vmul.f32 %v3353_v50, %v1789_v19  ;;  %v1793_v15 = vmul.f32 %v3359_v43, %v1789_v19 }
 0x1ac   :  { %v1794_v33 = vmul.f32 %v3365_v56, %v1789_v19  ;;  %v1795_v21 = vmul.f32 %v3371_v48, %v1789_v19  ;;  %v1796_v38 = vmul.f32 %v3377_v61, %v1789_v19  ;;  %v1797_v31 = vmul.f32 %v3383_v63, %v1789_v19 }
 0x1ad   :  { %v1800_v37 = vadd.f32 %v1799_v18, %v1790_v20  ;;  %v1801_v32 = vadd.f32 %v1799_v18, %v1791_v6  ;;  %v1802_v2 = vadd.f32 %v1799_v18, %v1792_v4  ;;  %v1803_v35 = vadd.f32 %v1799_v18, %v1793_v15 }
 0x1ae   :  { %v1804_v40 = vadd.f32 %v1799_v18, %v1794_v33  ;;  %v1805_v36 = vadd.f32 %v1799_v18, %v1795_v21  ;;  %v1806_v5 = vadd.f32 %v1799_v18, %v1796_v38  ;;  %v1807_v46 = vadd.f32 %v1799_v18, %v1797_v31 }
 0x1af   :  { %v1808_v24 = vmin.f32 %v1800_v37, 0.0  ;;  %v1809_v51 = vmin.f32 %v1801_v32, 0.0  ;;  %v1810_v22 = vmin.f32 %v1802_v2, 0.0  ;;  %v1811_v52 = vmin.f32 %v1803_v35, 0.0 }
 0x1b0   :  { %v1812_v42 = vmin.f32 %v1804_v40, 0.0  ;;  %v1813_v45 = vmin.f32 %v1805_v36, 0.0  ;;  %v1814_v25 = vmin.f32 %v1806_v5, 0.0  ;;  %v1815_v7 = vmin.f32 %v1807_v46, 0.0 }
 0x1b1   :  { %v1816_v49 = vadd.f32 %v1808_v24, %v1780_v14  ;;  %v1817_v26 = vadd.f32 %v1809_v51, %v1781_v60  ;;  %v1818_v23 = vadd.f32 %v1810_v22, %v1782_v62  ;;  %v1819_v27 = vadd.f32 %v1811_v52, %v1783_v17 }
 0x1b2   :  { %v1820_v28 = vadd.f32 %v1812_v42, %v1784_v0  ;;  %v1821_v29 = vadd.f32 %v1813_v45, %v1785_v1  ;;  %v1822_v16 = vadd.f32 %v1814_v25, %v1786_v9  ;;  %v1823_v30 = vadd.f32 %v1815_v7, %v1787_v11 }
 0x1b3   :  { %v1826_v39 = vmul.f32 %v3341_v34, %v1825_v13  ;;  %v1827_v54 = vmul.f32 %v3347_v47, %v1825_v13  ;;  %v1828_v55 = vmul.f32 %v3353_v50, %v1825_v13  ;;  %v1829_v58 = vmul.f32 %v3359_v43, %v1825_v13 }
 0x1b4   :  { %v1830_v41 = vmul.f32 %v3365_v56, %v1825_v13  ;;  %v1831_v59 = vmul.f32 %v3371_v48, %v1825_v13  ;;  %v1832_v53 = vmul.f32 %v3377_v61, %v1825_v13  ;;  %v1833_v44 = vmul.f32 %v3383_v63, %v1825_v13 }
 0x1b5   :  { %v1836_v10 = vadd.f32 %v1835_v3, %v1826_v39  ;;  %v1837_v8 = vadd.f32 %v1835_v3, %v1827_v54  ;;  %v1838_v12 = vadd.f32 %v1835_v3, %v1828_v55  ;;  %v1839_v57 = vadd.f32 %v1835_v3, %v1829_v58 }
 0x1b6   :  { %v1840_v14 = vadd.f32 %v1835_v3, %v1830_v41  ;;  %v1841_v60 = vadd.f32 %v1835_v3, %v1831_v59  ;;  %v1842_v62 = vadd.f32 %v1835_v3, %v1832_v53  ;;  %v1843_v17 = vadd.f32 %v1835_v3, %v1833_v44 }
 0x1b7   :  { %v1844_v0 = vmin.f32 %v1836_v10, 0.0  ;;  %v1845_v1 = vmin.f32 %v1837_v8, 0.0  ;;  %v1846_v9 = vmin.f32 %v1838_v12, 0.0  ;;  %v1847_v11 = vmin.f32 %v1839_v57, 0.0 }
 0x1b8   :  { %v1848_v19 = vmin.f32 %v1840_v14, 0.0  ;;  %v1849_v18 = vmin.f32 %v1841_v60, 0.0  ;;  %v1850_v20 = vmin.f32 %v1842_v62, 0.0  ;;  %v1851_v13 = vmin.f32 %v1843_v17, 0.0 }
 0x1b9   :  { %v1852_v6 = vadd.f32 %v1844_v0, %v1816_v49  ;;  %v1853_v4 = vadd.f32 %v1845_v1, %v1817_v26  ;;  %v1854_v15 = vadd.f32 %v1846_v9, %v1818_v23  ;;  %v1855_v33 = vadd.f32 %v1847_v11, %v1819_v27 }
 0x1ba   :  { %v1856_v21 = vadd.f32 %v1848_v19, %v1820_v28  ;;  %v1857_v38 = vadd.f32 %v1849_v18, %v1821_v29  ;;  %v1858_v31 = vadd.f32 %v1850_v20, %v1822_v16  ;;  %v1859_v3 = vadd.f32 %v1851_v13, %v1823_v30 }
 0x1bb   :  { %v1861_v37 = vstv %s3442_s16  ;;  %v1871_v32 = vstv %s3444_s3  ;;  %v1897_v2 = vstv %s3446_s17  ;;  %v1907_v35 = vstv %s3452_s18  ;;  %s3610_s3 = sld [smem:[#allocation3 + $0x3d]] }
 0x1bc   :  { %v1862_v40 = vmul.f32 %v3341_v34, %v1861_v37  ;;  %v1863_v36 = vmul.f32 %v3347_v47, %v1861_v37  ;;  %v1864_v5 = vmul.f32 %v3353_v50, %v1861_v37  ;;  %v1865_v46 = vmul.f32 %v3359_v43, %v1861_v37 }
 0x1bd   :  { %v1866_v24 = vmul.f32 %v3365_v56, %v1861_v37  ;;  %v1867_v51 = vmul.f32 %v3371_v48, %v1861_v37  ;;  %v1868_v22 = vmul.f32 %v3377_v61, %v1861_v37  ;;  %v1869_v52 = vmul.f32 %v3383_v63, %v1861_v37 }
 0x1be   :  { %v1872_v42 = vadd.f32 %v1871_v32, %v1862_v40  ;;  %v1873_v45 = vadd.f32 %v1871_v32, %v1863_v36  ;;  %v1874_v25 = vadd.f32 %v1871_v32, %v1864_v5  ;;  %v1875_v7 = vadd.f32 %v1871_v32, %v1865_v46 }
 0x1bf   :  { %v1876_v49 = vadd.f32 %v1871_v32, %v1866_v24  ;;  %v1877_v26 = vadd.f32 %v1871_v32, %v1867_v51  ;;  %v1878_v23 = vadd.f32 %v1871_v32, %v1868_v22  ;;  %v1879_v27 = vadd.f32 %v1871_v32, %v1869_v52 }
 0x1c0   :  { %v1880_v28 = vmin.f32 %v1872_v42, 0.0  ;;  %v1881_v29 = vmin.f32 %v1873_v45, 0.0  ;;  %v1882_v16 = vmin.f32 %v1874_v25, 0.0  ;;  %v1883_v30 = vmin.f32 %v1875_v7, 0.0 }
 0x1c1   :  { %v1884_v39 = vmin.f32 %v1876_v49, 0.0  ;;  %v1885_v54 = vmin.f32 %v1877_v26, 0.0  ;;  %v1886_v55 = vmin.f32 %v1878_v23, 0.0  ;;  %v1887_v58 = vmin.f32 %v1879_v27, 0.0 }
 0x1c2   :  { %v1888_v41 = vadd.f32 %v1880_v28, %v1852_v6  ;;  %v1889_v59 = vadd.f32 %v1881_v29, %v1853_v4  ;;  %v1890_v53 = vadd.f32 %v1882_v16, %v1854_v15  ;;  %v1891_v44 = vadd.f32 %v1883_v30, %v1855_v33 }
 0x1c3   :  { %v1892_v10 = vadd.f32 %v1884_v39, %v1856_v21  ;;  %v1893_v8 = vadd.f32 %v1885_v54, %v1857_v38  ;;  %v1894_v12 = vadd.f32 %v1886_v55, %v1858_v31  ;;  %v1895_v57 = vadd.f32 %v1887_v58, %v1859_v3 }
 0x1c4   :  { %v1898_v14 = vmul.f32 %v3341_v34, %v1897_v2  ;;  %v1899_v60 = vmul.f32 %v3347_v47, %v1897_v2  ;;  %v1900_v62 = vmul.f32 %v3353_v50, %v1897_v2  ;;  %v1901_v17 = vmul.f32 %v3359_v43, %v1897_v2 }
 0x1c5   :  { %v1902_v0 = vmul.f32 %v3365_v56, %v1897_v2  ;;  %v1903_v1 = vmul.f32 %v3371_v48, %v1897_v2  ;;  %v1904_v9 = vmul.f32 %v3377_v61, %v1897_v2  ;;  %v1905_v11 = vmul.f32 %v3383_v63, %v1897_v2 }
 0x1c6   :  { %v1908_v19 = vadd.f32 %v1907_v35, %v1898_v14  ;;  %v1909_v18 = vadd.f32 %v1907_v35, %v1899_v60  ;;  %v1910_v20 = vadd.f32 %v1907_v35, %v1900_v62  ;;  %v1911_v13 = vadd.f32 %v1907_v35, %v1901_v17 }
 0x1c7   :  { %v1912_v6 = vadd.f32 %v1907_v35, %v1902_v0  ;;  %v1913_v4 = vadd.f32 %v1907_v35, %v1903_v1  ;;  %v1914_v15 = vadd.f32 %v1907_v35, %v1904_v9  ;;  %v1915_v33 = vadd.f32 %v1907_v35, %v1905_v11 }
 0x1c8   :  { %v1916_v21 = vmin.f32 %v1908_v19, 0.0  ;;  %v1917_v38 = vmin.f32 %v1909_v18, 0.0  ;;  %v1918_v31 = vmin.f32 %v1910_v20, 0.0  ;;  %v1919_v3 = vmin.f32 %v1911_v13, 0.0 }
 0x1c9   :  { %v1920_v37 = vmin.f32 %v1912_v6, 0.0  ;;  %v1921_v32 = vmin.f32 %v1913_v4, 0.0  ;;  %v1922_v40 = vmin.f32 %v1914_v15, 0.0  ;;  %v1923_v2 = vmin.f32 %v1915_v33, 0.0 }
 0x1ca   :  { %v1924_v36 = vadd.f32 %v1916_v21, %v1888_v41  ;;  %v1925_v5 = vadd.f32 %v1917_v38, %v1889_v59  ;;  %v1926_v46 = vadd.f32 %v1918_v31, %v1890_v53  ;;  %v1927_v24 = vadd.f32 %v1919_v3, %v1891_v44 }
 0x1cb   :  { %v1928_v51 = vadd.f32 %v1920_v37, %v1892_v10  ;;  %v1929_v22 = vadd.f32 %v1921_v32, %v1893_v8  ;;  %v1930_v52 = vadd.f32 %v1922_v40, %v1894_v12  ;;  %v1931_v35 = vadd.f32 %v1923_v2, %v1895_v57 }
 0x1cc   :  { %v1933_v42 = vstv %s3470_s19  ;;  %v1943_v45 = vstv %s3472_s20  ;;  %v1969_v25 = vstv %s3474_s21  ;;  %v1979_v7 = vstv %s3480_s22 }
 0x1cd   :  { %v1934_v49 = vmul.f32 %v3341_v34, %v1933_v42  ;;  %v1935_v26 = vmul.f32 %v3347_v47, %v1933_v42  ;;  %v1936_v23 = vmul.f32 %v3353_v50, %v1933_v42  ;;  %v1937_v27 = vmul.f32 %v3359_v43, %v1933_v42 }
 0x1ce   :  { %v1938_v28 = vmul.f32 %v3365_v56, %v1933_v42  ;;  %v1939_v29 = vmul.f32 %v3371_v48, %v1933_v42  ;;  %v1940_v16 = vmul.f32 %v3377_v61, %v1933_v42  ;;  %v1941_v30 = vmul.f32 %v3383_v63, %v1933_v42 }
 0x1cf   :  { %v1944_v39 = vadd.f32 %v1943_v45, %v1934_v49  ;;  %v1945_v54 = vadd.f32 %v1943_v45, %v1935_v26  ;;  %v1946_v55 = vadd.f32 %v1943_v45, %v1936_v23  ;;  %v1947_v58 = vadd.f32 %v1943_v45, %v1937_v27 }
 0x1d0   :  { %v1948_v41 = vadd.f32 %v1943_v45, %v1938_v28  ;;  %v1949_v59 = vadd.f32 %v1943_v45, %v1939_v29  ;;  %v1950_v53 = vadd.f32 %v1943_v45, %v1940_v16  ;;  %v1951_v44 = vadd.f32 %v1943_v45, %v1941_v30 }
 0x1d1   :  { %v1952_v10 = vmin.f32 %v1944_v39, 0.0  ;;  %v1953_v8 = vmin.f32 %v1945_v54, 0.0  ;;  %v1954_v12 = vmin.f32 %v1946_v55, 0.0  ;;  %v1955_v57 = vmin.f32 %v1947_v58, 0.0 }
 0x1d2   :  { %v1956_v14 = vmin.f32 %v1948_v41, 0.0  ;;  %v1957_v60 = vmin.f32 %v1949_v59, 0.0  ;;  %v1958_v62 = vmin.f32 %v1950_v53, 0.0  ;;  %v1959_v17 = vmin.f32 %v1951_v44, 0.0 }
 0x1d3   :  { %v1960_v0 = vadd.f32 %v1952_v10, %v1924_v36  ;;  %v1961_v1 = vadd.f32 %v1953_v8, %v1925_v5  ;;  %v1962_v9 = vadd.f32 %v1954_v12, %v1926_v46  ;;  %v1963_v11 = vadd.f32 %v1955_v57, %v1927_v24 }
 0x1d4   :  { %v1964_v19 = vadd.f32 %v1956_v14, %v1928_v51  ;;  %v1965_v18 = vadd.f32 %v1957_v60, %v1929_v22  ;;  %v1966_v20 = vadd.f32 %v1958_v62, %v1930_v52  ;;  %v1967_v13 = vadd.f32 %v1959_v17, %v1931_v35 }
 0x1d5   :  { %v1970_v6 = vmul.f32 %v3341_v34, %v1969_v25  ;;  %v1971_v4 = vmul.f32 %v3347_v47, %v1969_v25  ;;  %v1972_v15 = vmul.f32 %v3353_v50, %v1969_v25  ;;  %v1973_v33 = vmul.f32 %v3359_v43, %v1969_v25 }
 0x1d6   :  { %v1974_v21 = vmul.f32 %v3365_v56, %v1969_v25  ;;  %v1975_v38 = vmul.f32 %v3371_v48, %v1969_v25  ;;  %v1976_v31 = vmul.f32 %v3377_v61, %v1969_v25  ;;  %v1977_v3 = vmul.f32 %v3383_v63, %v1969_v25 }
 0x1d7   :  { %v1980_v37 = vadd.f32 %v1979_v7, %v1970_v6  ;;  %v1981_v32 = vadd.f32 %v1979_v7, %v1971_v4  ;;  %v1982_v40 = vadd.f32 %v1979_v7, %v1972_v15  ;;  %v1983_v2 = vadd.f32 %v1979_v7, %v1973_v33 }
 0x1d8   :  { %v1984_v36 = vadd.f32 %v1979_v7, %v1974_v21  ;;  %v1985_v5 = vadd.f32 %v1979_v7, %v1975_v38  ;;  %v1986_v46 = vadd.f32 %v1979_v7, %v1976_v31  ;;  %v1987_v24 = vadd.f32 %v1979_v7, %v1977_v3 }
 0x1d9   :  { %v1988_v51 = vmin.f32 %v1980_v37, 0.0  ;;  %v1989_v22 = vmin.f32 %v1981_v32, 0.0  ;;  %v1990_v52 = vmin.f32 %v1982_v40, 0.0  ;;  %v1991_v35 = vmin.f32 %v1983_v2, 0.0 }
 0x1da   :  { %v1992_v42 = vmin.f32 %v1984_v36, 0.0  ;;  %v1993_v45 = vmin.f32 %v1985_v5, 0.0  ;;  %v1994_v49 = vmin.f32 %v1986_v46, 0.0  ;;  %v1995_v25 = vmin.f32 %v1987_v24, 0.0 }
 0x1db   :  { %v1996_v26 = vadd.f32 %v1988_v51, %v1960_v0  ;;  %v1997_v23 = vadd.f32 %v1989_v22, %v1961_v1  ;;  %v1998_v27 = vadd.f32 %v1990_v52, %v1962_v9  ;;  %v1999_v28 = vadd.f32 %v1991_v35, %v1963_v11 }
 0x1dc   :  { %v2000_v29 = vadd.f32 %v1992_v42, %v1964_v19  ;;  %v2001_v16 = vadd.f32 %v1993_v45, %v1965_v18  ;;  %v2002_v30 = vadd.f32 %v1994_v49, %v1966_v20  ;;  %v2003_v7 = vadd.f32 %v1995_v25, %v1967_v13 }
 0x1dd   :  { %v2005_v39 = vstv %s3498_s23  ;;  %v2015_v54 = vstv %s3500_s24  ;;  %v2041_v55 = vstv %s3502_s25  ;;  %v2051_v58 = vstv %s3508_s1  ;;  %s3650_s25 = sld [smem:[#allocation3 + $0x3e]] }
 0x1de   :  { %v2006_v41 = vmul.f32 %v3341_v34, %v2005_v39  ;;  %v2007_v59 = vmul.f32 %v3347_v47, %v2005_v39  ;;  %v2008_v53 = vmul.f32 %v3353_v50, %v2005_v39  ;;  %v2009_v44 = vmul.f32 %v3359_v43, %v2005_v39  ;;  %s3656_s1 = sld [smem:[#allocation5 + $0x3e]] }
 0x1df   :  { %v2010_v10 = vmul.f32 %v3365_v56, %v2005_v39  ;;  %v2011_v8 = vmul.f32 %v3371_v48, %v2005_v39  ;;  %v2012_v12 = vmul.f32 %v3377_v61, %v2005_v39  ;;  %v2013_v57 = vmul.f32 %v3383_v63, %v2005_v39 }
 0x1e0   :  { %v2016_v14 = vadd.f32 %v2015_v54, %v2006_v41  ;;  %v2017_v60 = vadd.f32 %v2015_v54, %v2007_v59  ;;  %v2018_v62 = vadd.f32 %v2015_v54, %v2008_v53  ;;  %v2019_v17 = vadd.f32 %v2015_v54, %v2009_v44 }
 0x1e1   :  { %v2020_v0 = vadd.f32 %v2015_v54, %v2010_v10  ;;  %v2021_v1 = vadd.f32 %v2015_v54, %v2011_v8  ;;  %v2022_v9 = vadd.f32 %v2015_v54, %v2012_v12  ;;  %v2023_v11 = vadd.f32 %v2015_v54, %v2013_v57 }
 0x1e2   :  { %v2024_v19 = vmin.f32 %v2016_v14, 0.0  ;;  %v2025_v18 = vmin.f32 %v2017_v60, 0.0  ;;  %v2026_v20 = vmin.f32 %v2018_v62, 0.0  ;;  %v2027_v13 = vmin.f32 %v2019_v17, 0.0 }
 0x1e3   :  { %v2028_v6 = vmin.f32 %v2020_v0, 0.0  ;;  %v2029_v4 = vmin.f32 %v2021_v1, 0.0  ;;  %v2030_v15 = vmin.f32 %v2022_v9, 0.0  ;;  %v2031_v33 = vmin.f32 %v2023_v11, 0.0 }
 0x1e4   :  { %v2032_v21 = vadd.f32 %v2024_v19, %v1996_v26  ;;  %v2033_v38 = vadd.f32 %v2025_v18, %v1997_v23  ;;  %v2034_v31 = vadd.f32 %v2026_v20, %v1998_v27  ;;  %v2035_v3 = vadd.f32 %v2027_v13, %v1999_v28 }
 0x1e5   :  { %v2036_v37 = vadd.f32 %v2028_v6, %v2000_v29  ;;  %v2037_v32 = vadd.f32 %v2029_v4, %v2001_v16  ;;  %v2038_v40 = vadd.f32 %v2030_v15, %v2002_v30  ;;  %v2039_v2 = vadd.f32 %v2031_v33, %v2003_v7 }
 0x1e6   :  { %v2042_v36 = vmul.f32 %v3341_v34, %v2041_v55  ;;  %v2043_v5 = vmul.f32 %v3347_v47, %v2041_v55  ;;  %v2044_v46 = vmul.f32 %v3353_v50, %v2041_v55  ;;  %v2045_v24 = vmul.f32 %v3359_v43, %v2041_v55 }
 0x1e7   :  { %v2046_v51 = vmul.f32 %v3365_v56, %v2041_v55  ;;  %v2047_v22 = vmul.f32 %v3371_v48, %v2041_v55  ;;  %v2048_v52 = vmul.f32 %v3377_v61, %v2041_v55  ;;  %v2049_v35 = vmul.f32 %v3383_v63, %v2041_v55 }
 0x1e8   :  { %v2052_v42 = vadd.f32 %v2051_v58, %v2042_v36  ;;  %v2053_v45 = vadd.f32 %v2051_v58, %v2043_v5  ;;  %v2054_v49 = vadd.f32 %v2051_v58, %v2044_v46  ;;  %v2055_v25 = vadd.f32 %v2051_v58, %v2045_v24 }
 0x1e9   :  { %v2056_v26 = vadd.f32 %v2051_v58, %v2046_v51  ;;  %v2057_v23 = vadd.f32 %v2051_v58, %v2047_v22  ;;  %v2058_v27 = vadd.f32 %v2051_v58, %v2048_v52  ;;  %v2059_v28 = vadd.f32 %v2051_v58, %v2049_v35 }
 0x1ea   :  { %v2060_v29 = vmin.f32 %v2052_v42, 0.0  ;;  %v2061_v16 = vmin.f32 %v2053_v45, 0.0  ;;  %v2062_v30 = vmin.f32 %v2054_v49, 0.0  ;;  %v2063_v7 = vmin.f32 %v2055_v25, 0.0 }
 0x1eb   :  { %v2064_v39 = vmin.f32 %v2056_v26, 0.0  ;;  %v2065_v54 = vmin.f32 %v2057_v23, 0.0  ;;  %v2066_v41 = vmin.f32 %v2058_v27, 0.0  ;;  %v2067_v55 = vmin.f32 %v2059_v28, 0.0 }
 0x1ec   :  { %v2068_v59 = vadd.f32 %v2060_v29, %v2032_v21  ;;  %v2069_v53 = vadd.f32 %v2061_v16, %v2033_v38  ;;  %v2070_v44 = vadd.f32 %v2062_v30, %v2034_v31  ;;  %v2071_v10 = vadd.f32 %v2063_v7, %v2035_v3 }
 0x1ed   :  { %v2072_v8 = vadd.f32 %v2064_v39, %v2036_v37  ;;  %v2073_v12 = vadd.f32 %v2065_v54, %v2037_v32  ;;  %v2074_v57 = vadd.f32 %v2066_v41, %v2038_v40  ;;  %v2075_v58 = vadd.f32 %v2067_v55, %v2039_v2 }
 0x1ee   :  { %v2077_v14 = vstv %s3526_s26  ;;  %v2087_v60 = vstv %s3528_s27  ;;  %v2113_v62 = vstv %s3530_s2  ;;  %v2123_v17 = vstv %s3536_s28  ;;  %s3662_s26 = sld [smem:[#allocation3 + $0x3f]] }
 0x1ef   :  { %v2078_v0 = vmul.f32 %v3341_v34, %v2077_v14  ;;  %v2079_v1 = vmul.f32 %v3347_v47, %v2077_v14  ;;  %v2080_v9 = vmul.f32 %v3353_v50, %v2077_v14  ;;  %v2081_v11 = vmul.f32 %v3359_v43, %v2077_v14  ;;  %s3664_s27 = sld [smem:[#allocation5 + $0x3f]] }
 0x1f0   :  { %v2082_v19 = vmul.f32 %v3365_v56, %v2077_v14  ;;  %v2083_v18 = vmul.f32 %v3371_v48, %v2077_v14  ;;  %v2084_v20 = vmul.f32 %v3377_v61, %v2077_v14  ;;  %v2085_v13 = vmul.f32 %v3383_v63, %v2077_v14 }
 0x1f1   :  { %v2088_v6 = vadd.f32 %v2087_v60, %v2078_v0  ;;  %v2089_v4 = vadd.f32 %v2087_v60, %v2079_v1  ;;  %v2090_v15 = vadd.f32 %v2087_v60, %v2080_v9  ;;  %v2091_v33 = vadd.f32 %v2087_v60, %v2081_v11 }
 0x1f2   :  { %v2092_v21 = vadd.f32 %v2087_v60, %v2082_v19  ;;  %v2093_v38 = vadd.f32 %v2087_v60, %v2083_v18  ;;  %v2094_v31 = vadd.f32 %v2087_v60, %v2084_v20  ;;  %v2095_v3 = vadd.f32 %v2087_v60, %v2085_v13 }
 0x1f3   :  { %v2096_v37 = vmin.f32 %v2088_v6, 0.0  ;;  %v2097_v32 = vmin.f32 %v2089_v4, 0.0  ;;  %v2098_v40 = vmin.f32 %v2090_v15, 0.0  ;;  %v2099_v2 = vmin.f32 %v2091_v33, 0.0 }
 0x1f4   :  { %v2100_v36 = vmin.f32 %v2092_v21, 0.0  ;;  %v2101_v5 = vmin.f32 %v2093_v38, 0.0  ;;  %v2102_v46 = vmin.f32 %v2094_v31, 0.0  ;;  %v2103_v24 = vmin.f32 %v2095_v3, 0.0 }
 0x1f5   :  { %v2104_v51 = vadd.f32 %v2096_v37, %v2068_v59  ;;  %v2105_v22 = vadd.f32 %v2097_v32, %v2069_v53  ;;  %v2106_v52 = vadd.f32 %v2098_v40, %v2070_v44  ;;  %v2107_v35 = vadd.f32 %v2099_v2, %v2071_v10 }
 0x1f6   :  { %v2108_v42 = vadd.f32 %v2100_v36, %v2072_v8  ;;  %v2109_v45 = vadd.f32 %v2101_v5, %v2073_v12  ;;  %v2110_v49 = vadd.f32 %v2102_v46, %v2074_v57  ;;  %v2111_v25 = vadd.f32 %v2103_v24, %v2075_v58 }
 0x1f7   :  { %v2114_v26 = vmul.f32 %v3341_v34, %v2113_v62  ;;  %v2115_v23 = vmul.f32 %v3347_v47, %v2113_v62  ;;  %v2116_v27 = vmul.f32 %v3353_v50, %v2113_v62  ;;  %v2117_v28 = vmul.f32 %v3359_v43, %v2113_v62 }
 0x1f8   :  { %v2118_v29 = vmul.f32 %v3365_v56, %v2113_v62  ;;  %v2119_v16 = vmul.f32 %v3371_v48, %v2113_v62  ;;  %v2120_v30 = vmul.f32 %v3377_v61, %v2113_v62  ;;  %v2121_v7 = vmul.f32 %v3383_v63, %v2113_v62 }
 0x1f9   :  { %v2124_v39 = vadd.f32 %v2123_v17, %v2114_v26  ;;  %v2125_v54 = vadd.f32 %v2123_v17, %v2115_v23  ;;  %v2126_v41 = vadd.f32 %v2123_v17, %v2116_v27  ;;  %v2127_v55 = vadd.f32 %v2123_v17, %v2117_v28 }
 0x1fa   :  { %v2128_v59 = vadd.f32 %v2123_v17, %v2118_v29  ;;  %v2129_v53 = vadd.f32 %v2123_v17, %v2119_v16  ;;  %v2130_v44 = vadd.f32 %v2123_v17, %v2120_v30  ;;  %v2131_v10 = vadd.f32 %v2123_v17, %v2121_v7  ;;  %v3589_v29 = vld [vmem:[%s3710_s0] sm:$0xff]  ;;  %v3595_v30 = vld [vmem:[%s3710_s0 + $0x8] sm:$0xff] }
 0x1fb   :  { %v2132_v8 = vmin.f32 %v2124_v39, 0.0  ;;  %v2133_v12 = vmin.f32 %v2125_v54, 0.0  ;;  %v2134_v57 = vmin.f32 %v2126_v41, 0.0  ;;  %v2135_v58 = vmin.f32 %v2127_v55, 0.0  ;;  %v3601_v39 = vld [vmem:[%s3710_s0 + $0x10] sm:$0xff]  ;;  %v3607_v41 = vld [vmem:[%s3710_s0 + $0x18] sm:$0xff] }
 0x1fc   :  { %v2136_v14 = vmin.f32 %v2128_v59, 0.0  ;;  %v2137_v60 = vmin.f32 %v2129_v53, 0.0  ;;  %v2138_v0 = vmin.f32 %v2130_v44, 0.0  ;;  %v2139_v62 = vmin.f32 %v2131_v10, 0.0  ;;  %v3615_v59 = vld [vmem:[%s3710_s0 + $0x20] sm:$0xff]  ;;  %v3621_v44 = vld [vmem:[%s3710_s0 + $0x28] sm:$0xff] }
 0x1fd   :  { %v2140_v1 = vadd.f32 %v2132_v8, %v2104_v51  ;;  %v2141_v9 = vadd.f32 %v2133_v12, %v2105_v22  ;;  %v2142_v11 = vadd.f32 %v2134_v57, %v2106_v52  ;;  %v2143_v19 = vadd.f32 %v2135_v58, %v2107_v35  ;;  %v3627_v8 = vld [vmem:[%s3710_s0 + $0x30] sm:$0xff]  ;;  %v3633_v57 = vld [vmem:[%s3710_s0 + $0x38] sm:$0xff]  ;;  %s3636_s0 = sld [smem:[#allocation5 + $0x3d]] }
 0x1fe   :  { %v2144_v18 = vadd.f32 %v2136_v14, %v2108_v42  ;;  %v2145_v20 = vadd.f32 %v2137_v60, %v2109_v45  ;;  %v2146_v13 = vadd.f32 %v2138_v0, %v2110_v49  ;;  %v2147_v17 = vadd.f32 %v2139_v62, %v2111_v25 }
 0x1ff   :  { %v2149_v6 = vstv %s3554_s29  ;;  %v2159_v4 = vstv %s3556_s30  ;;  %v2185_v15 = vstv %s3558_s5  ;;  %v2195_v33 = vstv %s3564_s6 }
 0x200   :  { %v2150_v21 = vmul.f32 %v3341_v34, %v2149_v6  ;;  %v2151_v38 = vmul.f32 %v3347_v47, %v2149_v6  ;;  %v2152_v31 = vmul.f32 %v3353_v50, %v2149_v6  ;;  %v2153_v3 = vmul.f32 %v3359_v43, %v2149_v6 }
 0x201   :  { %v2154_v37 = vmul.f32 %v3365_v56, %v2149_v6  ;;  %v2155_v32 = vmul.f32 %v3371_v48, %v2149_v6  ;;  %v2156_v40 = vmul.f32 %v3377_v61, %v2149_v6  ;;  %v2157_v2 = vmul.f32 %v3383_v63, %v2149_v6 }
 0x202   :  { %v2160_v36 = vadd.f32 %v2159_v4, %v2150_v21  ;;  %v2161_v5 = vadd.f32 %v2159_v4, %v2151_v38  ;;  %v2162_v46 = vadd.f32 %v2159_v4, %v2152_v31  ;;  %v2163_v24 = vadd.f32 %v2159_v4, %v2153_v3 }
 0x203   :  { %v2164_v51 = vadd.f32 %v2159_v4, %v2154_v37  ;;  %v2165_v34 = vadd.f32 %v2159_v4, %v2155_v32  ;;  %v2166_v22 = vadd.f32 %v2159_v4, %v2156_v40  ;;  %v2167_v47 = vadd.f32 %v2159_v4, %v2157_v2 }
 0x204   :  { %v2168_v52 = vmin.f32 %v2160_v36, 0.0  ;;  %v2169_v50 = vmin.f32 %v2161_v5, 0.0  ;;  %v2170_v35 = vmin.f32 %v2162_v46, 0.0  ;;  %v2171_v43 = vmin.f32 %v2163_v24, 0.0 }
 0x205   :  { %v2172_v42 = vmin.f32 %v2164_v51, 0.0  ;;  %v2173_v56 = vmin.f32 %v2165_v34, 0.0  ;;  %v2174_v45 = vmin.f32 %v2166_v22, 0.0  ;;  %v2175_v48 = vmin.f32 %v2167_v47, 0.0 }
 0x206   :  { %v2176_v49 = vadd.f32 %v2168_v52, %v2140_v1  ;;  %v2177_v61 = vadd.f32 %v2169_v50, %v2141_v9  ;;  %v2178_v25 = vadd.f32 %v2170_v35, %v2142_v11  ;;  %v2179_v63 = vadd.f32 %v2171_v43, %v2143_v19 }
 0x207   :  { %v2180_v26 = vadd.f32 %v2172_v42, %v2144_v18  ;;  %v2181_v23 = vadd.f32 %v2173_v56, %v2145_v20  ;;  %v2182_v27 = vadd.f32 %v2174_v45, %v2146_v13  ;;  %v2183_v28 = vadd.f32 %v2175_v48, %v2147_v17 }
 0x208   :  { %v2186_v16 = vmul.f32 %v3589_v29, %v2185_v15  ;;  %v2187_v7 = vmul.f32 %v3595_v30, %v2185_v15  ;;  %v2188_v54 = vmul.f32 %v3601_v39, %v2185_v15  ;;  %v2189_v55 = vmul.f32 %v3607_v41, %v2185_v15 }
 0x209   :  { %v2190_v53 = vmul.f32 %v3615_v59, %v2185_v15  ;;  %v2191_v10 = vmul.f32 %v3621_v44, %v2185_v15  ;;  %v2192_v12 = vmul.f32 %v3627_v8, %v2185_v15  ;;  %v2193_v58 = vmul.f32 %v3633_v57, %v2185_v15 }
 0x20a   :  { %v2196_v14 = vadd.f32 %v2195_v33, %v2186_v16  ;;  %v2197_v60 = vadd.f32 %v2195_v33, %v2187_v7  ;;  %v2198_v0 = vadd.f32 %v2195_v33, %v2188_v54  ;;  %v2199_v62 = vadd.f32 %v2195_v33, %v2189_v55 }
 0x20b   :  { %v2200_v1 = vadd.f32 %v2195_v33, %v2190_v53  ;;  %v2201_v9 = vadd.f32 %v2195_v33, %v2191_v10  ;;  %v2202_v11 = vadd.f32 %v2195_v33, %v2192_v12  ;;  %v2203_v19 = vadd.f32 %v2195_v33, %v2193_v58 }
 0x20c   :  { %v2204_v18 = vmin.f32 %v2196_v14, 0.0  ;;  %v2205_v20 = vmin.f32 %v2197_v60, 0.0  ;;  %v2206_v13 = vmin.f32 %v2198_v0, 0.0  ;;  %v2207_v17 = vmin.f32 %v2199_v62, 0.0 }
 0x20d   :  { %v2208_v6 = vmin.f32 %v2200_v1, 0.0  ;;  %v2209_v4 = vmin.f32 %v2201_v9, 0.0  ;;  %v2210_v21 = vmin.f32 %v2202_v11, 0.0  ;;  %v2211_v38 = vmin.f32 %v2203_v19, 0.0 }
 0x20e   :  { %v2212_v15 = vadd.f32 %v2204_v18, %v2176_v49  ;;  %v2213_v31 = vadd.f32 %v2205_v20, %v2177_v61  ;;  %v2214_v3 = vadd.f32 %v2206_v13, %v2178_v25  ;;  %v2215_v37 = vadd.f32 %v2207_v17, %v2179_v63 }
 0x20f   :  { %v2216_v32 = vadd.f32 %v2208_v6, %v2180_v26  ;;  %v2217_v40 = vadd.f32 %v2209_v4, %v2181_v23  ;;  %v2218_v33 = vadd.f32 %v2210_v21, %v2182_v27  ;;  %v2219_v2 = vadd.f32 %v2211_v38, %v2183_v28 }
 0x210   :  { %v2221_v36 = vstv %s3582_s7  ;;  %v2231_v5 = vstv %s3584_s8  ;;  %v2257_v46 = vstv %s3610_s3  ;;  %v2267_v54 = vstv %s3636_s0 }
 0x211   :  { %v2222_v24 = vmul.f32 %v3589_v29, %v2221_v36  ;;  %v2223_v51 = vmul.f32 %v3595_v30, %v2221_v36  ;;  %v2224_v34 = vmul.f32 %v3601_v39, %v2221_v36  ;;  %v2225_v22 = vmul.f32 %v3607_v41, %v2221_v36 }
 0x212   :  { %v2226_v47 = vmul.f32 %v3615_v59, %v2221_v36  ;;  %v2227_v52 = vmul.f32 %v3621_v44, %v2221_v36  ;;  %v2228_v50 = vmul.f32 %v3627_v8, %v2221_v36  ;;  %v2229_v35 = vmul.f32 %v3633_v57, %v2221_v36 }
 0x213   :  { %v2232_v43 = vadd.f32 %v2231_v5, %v2222_v24  ;;  %v2233_v42 = vadd.f32 %v2231_v5, %v2223_v51  ;;  %v2234_v56 = vadd.f32 %v2231_v5, %v2224_v34  ;;  %v2235_v45 = vadd.f32 %v2231_v5, %v2225_v22 }
 0x214   :  { %v2236_v48 = vadd.f32 %v2231_v5, %v2226_v47  ;;  %v2237_v49 = vadd.f32 %v2231_v5, %v2227_v52  ;;  %v2238_v61 = vadd.f32 %v2231_v5, %v2228_v50  ;;  %v2239_v25 = vadd.f32 %v2231_v5, %v2229_v35 }
 0x215   :  { %v2240_v63 = vmin.f32 %v2232_v43, 0.0  ;;  %v2241_v26 = vmin.f32 %v2233_v42, 0.0  ;;  %v2242_v23 = vmin.f32 %v2234_v56, 0.0  ;;  %v2243_v27 = vmin.f32 %v2235_v45, 0.0 }
 0x216   :  { %v2244_v28 = vmin.f32 %v2236_v48, 0.0  ;;  %v2245_v16 = vmin.f32 %v2237_v49, 0.0  ;;  %v2246_v7 = vmin.f32 %v2238_v61, 0.0  ;;  %v2247_v55 = vmin.f32 %v2239_v25, 0.0 }
 0x217   :  { %v2248_v53 = vadd.f32 %v2240_v63, %v2212_v15  ;;  %v2249_v10 = vadd.f32 %v2241_v26, %v2213_v31  ;;  %v2250_v12 = vadd.f32 %v2242_v23, %v2214_v3  ;;  %v2251_v58 = vadd.f32 %v2243_v27, %v2215_v37 }
 0x218   :  { %v2252_v14 = vadd.f32 %v2244_v28, %v2216_v32  ;;  %v2253_v60 = vadd.f32 %v2245_v16, %v2217_v40  ;;  %v2254_v0 = vadd.f32 %v2246_v7, %v2218_v33  ;;  %v2258_v62 = vmul.f32 %v3589_v29, %v2257_v46 }
 0x219   :  { %v2259_v1 = vmul.f32 %v3595_v30, %v2257_v46  ;;  %v2260_v9 = vmul.f32 %v3601_v39, %v2257_v46  ;;  %v2261_v11 = vmul.f32 %v3607_v41, %v2257_v46  ;;  %v2262_v19 = vmul.f32 %v3615_v59, %v2257_v46 }
 0x21a   :  { %v2263_v18 = vmul.f32 %v3621_v44, %v2257_v46  ;;  %v2264_v20 = vmul.f32 %v3627_v8, %v2257_v46  ;;  %v2265_v13 = vmul.f32 %v3633_v57, %v2257_v46  ;;  %v2268_v17 = vadd.f32 %v2267_v54, %v2258_v62 }
 0x21b   :  { %v2269_v6 = vadd.f32 %v2267_v54, %v2259_v1  ;;  %v2270_v4 = vadd.f32 %v2267_v54, %v2260_v9  ;;  %v2271_v21 = vadd.f32 %v2267_v54, %v2261_v11  ;;  %v2272_v38 = vadd.f32 %v2267_v54, %v2262_v19 }
 0x21c   :  { %v2273_v15 = vadd.f32 %v2267_v54, %v2263_v18  ;;  %v2274_v31 = vadd.f32 %v2267_v54, %v2264_v20  ;;  %v2275_v3 = vadd.f32 %v2267_v54, %v2265_v13  ;;  %v2276_v37 = vmin.f32 %v2268_v17, 0.0 }
 0x21d   :  { %v2277_v32 = vmin.f32 %v2269_v6, 0.0  ;;  %v2278_v40 = vmin.f32 %v2270_v4, 0.0  ;;  %v2279_v33 = vmin.f32 %v2271_v21, 0.0  ;;  %v2280_v36 = vmin.f32 %v2272_v38, 0.0 }
 0x21e   :  { %v2281_v5 = vmin.f32 %v2273_v15, 0.0  ;;  %v2282_v24 = vmin.f32 %v2274_v31, 0.0  ;;  %v2255_v46 = vadd.f32 %v2247_v55, %v2219_v2  ;;  %v2283_v51 = vmin.f32 %v2275_v3, 0.0 }
 0x21f   :  { %v2284_v34 = vadd.f32 %v2276_v37, %v2248_v53  ;;  %v2285_v22 = vadd.f32 %v2277_v32, %v2249_v10  ;;  %v2286_v47 = vadd.f32 %v2278_v40, %v2250_v12  ;;  %v2287_v52 = vadd.f32 %v2279_v33, %v2251_v58 }
 0x220   :  { %v2288_v50 = vadd.f32 %v2280_v36, %v2252_v14  ;;  %v2289_v35 = vadd.f32 %v2281_v5, %v2253_v60  ;;  %v2290_v43 = vadd.f32 %v2282_v24, %v2254_v0  ;;  %v2293_v42 = vstv %s3650_s25 }
 0x221   :  { %v2303_v56 = vstv %s3656_s1  ;;  %v2294_v45 = vmul.f32 %v3589_v29, %v2293_v42  ;;  %v2295_v48 = vmul.f32 %v3595_v30, %v2293_v42  ;;  %v2296_v49 = vmul.f32 %v3601_v39, %v2293_v42 }
 0x222   :  { %v2297_v2 = vmul.f32 %v3607_v41, %v2293_v42  ;;  %v2298_v61 = vmul.f32 %v3615_v59, %v2293_v42  ;;  %v2299_v25 = vmul.f32 %v3621_v44, %v2293_v42  ;;  %v2300_v63 = vmul.f32 %v3627_v8, %v2293_v42 }
 0x223   :  { %v2301_v26 = vmul.f32 %v3633_v57, %v2293_v42  ;;  %v2304_v23 = vadd.f32 %v2303_v56, %v2294_v45  ;;  %v2305_v27 = vadd.f32 %v2303_v56, %v2295_v48  ;;  %v2306_v28 = vadd.f32 %v2303_v56, %v2296_v49 }
 0x224   :  { %v2307_v16 = vadd.f32 %v2303_v56, %v2297_v2  ;;  %v2308_v7 = vadd.f32 %v2303_v56, %v2298_v61  ;;  %v2309_v54 = vadd.f32 %v2303_v56, %v2299_v25  ;;  %v2310_v55 = vadd.f32 %v2303_v56, %v2300_v63 }
 0x225   :  { %v2311_v53 = vadd.f32 %v2303_v56, %v2301_v26  ;;  %v2312_v10 = vmin.f32 %v2304_v23, 0.0  ;;  %v2313_v12 = vmin.f32 %v2305_v27, 0.0  ;;  %v2314_v58 = vmin.f32 %v2306_v28, 0.0 }
 0x226   :  { %v2315_v14 = vmin.f32 %v2307_v16, 0.0  ;;  %v2291_v60 = vadd.f32 %v2283_v51, %v2255_v46  ;;  %v2316_v0 = vmin.f32 %v2308_v7, 0.0  ;;  %v2329_v62 = vstv %s3662_s26 }
 0x227   :  { %v2339_v1 = vstv %s3664_s27  ;;  %v2317_v9 = vmin.f32 %v2309_v54, 0.0  ;;  %v2318_v11 = vmin.f32 %v2310_v55, 0.0  ;;  %v2319_v19 = vmin.f32 %v2311_v53, 0.0 }
 0x228   :  { %v2320_v18 = vadd.f32 %v2312_v10, %v2284_v34  ;;  %v2321_v20 = vadd.f32 %v2313_v12, %v2285_v22  ;;  %v2322_v13 = vadd.f32 %v2314_v58, %v2286_v47  ;;  %v2323_v17 = vadd.f32 %v2315_v14, %v2287_v52 }
 0x229   :  { %v2324_v6 = vadd.f32 %v2316_v0, %v2288_v50  ;;  %v2330_v4 = vmul.f32 %v3589_v29, %v2329_v62  ;;  %v2331_v21 = vmul.f32 %v3595_v30, %v2329_v62  ;;  %v2332_v38 = vmul.f32 %v3601_v39, %v2329_v62 }
 0x22a   :  { %v2333_v15 = vmul.f32 %v3607_v41, %v2329_v62  ;;  %v2334_v31 = vmul.f32 %v3615_v59, %v2329_v62  ;;  %v2335_v3 = vmul.f32 %v3621_v44, %v2329_v62  ;;  %v2336_v37 = vmul.f32 %v3627_v8, %v2329_v62 }
 0x22b   :  { %v2337_v32 = vmul.f32 %v3633_v57, %v2329_v62  ;;  %v2340_v40 = vadd.f32 %v2339_v1, %v2330_v4  ;;  %v2341_v33 = vadd.f32 %v2339_v1, %v2331_v21  ;;  %v2342_v36 = vadd.f32 %v2339_v1, %v2332_v38 }
 0x22c   :  { %v2343_v5 = vadd.f32 %v2339_v1, %v2333_v15  ;;  %v2344_v24 = vadd.f32 %v2339_v1, %v2334_v31  ;;  %v2345_v29 = vadd.f32 %v2339_v1, %v2335_v3  ;;  %v2346_v46 = vadd.f32 %v2339_v1, %v2336_v37 }
 0x22d   :  { %v2347_v30 = vadd.f32 %v2339_v1, %v2337_v32  ;;  %v2348_v51 = vmin.f32 %v2340_v40, 0.0  ;;  %v2349_v39 = vmin.f32 %v2341_v33, 0.0  ;;  %v2350_v34 = vmin.f32 %v2342_v36, 0.0 }
 0x22e   :  { %v2351_v41 = vmin.f32 %v2343_v5, 0.0  ;;  %v2325_v22 = vadd.f32 %v2317_v9, %v2289_v35  ;;  %v2326_v59 = vadd.f32 %v2318_v11, %v2290_v43  ;;  %v2352_v47 = vmin.f32 %v2344_v24, 0.0 }
 0x22f   :  { %v2353_v44 = vmin.f32 %v2345_v29, 0.0  ;;  %v2354_v52 = vmin.f32 %v2346_v46, 0.0  ;;  %v2356_v8 = vadd.f32 %v2348_v51, %v2320_v18  ;;  %v2357_v50 = vadd.f32 %v2349_v39, %v2321_v20 }
 0x230   :  { %v2358_v57 = vadd.f32 %v2350_v34, %v2322_v13  ;;  %v2327_v42 = vadd.f32 %v2319_v19, %v2291_v60  ;;  %v2355_v56 = vmin.f32 %v2347_v30, 0.0  ;;  %v2359_v45 = vadd.f32 %v2351_v41, %v2323_v17 }
 0x231   :  { %v2360_v48 = vadd.f32 %v2352_v47, %v2324_v6  ;;  %2364 = vst [vmem:[%s3714_s4] sm:$0xff] %v2356_v8  ;;  %v2361_v49 = vadd.f32 %v2353_v44, %v2325_v22  ;;  %v2362_v35 = vadd.f32 %v2354_v52, %v2326_v59 }
 0x232   :  { %2365 = vst [vmem:[%s3714_s4 + $0x8] sm:$0xff] %v2357_v50  ;;  %v2363_v43 = vadd.f32 %v2355_v56, %v2327_v42 }
 0x233   :  { %2366 = vst [vmem:[%s3714_s4 + $0x10] sm:$0xff] %v2358_v57 }
 0x234   :  { %2367 = vst [vmem:[%s3714_s4 + $0x18] sm:$0xff] %v2359_v45 }
 0x235   :  { %2368 = vst [vmem:[%s3714_s4 + $0x20] sm:$0xff] %v2360_v48 }
 0x236   :  { %2369 = vst [vmem:[%s3714_s4 + $0x28] sm:$0xff] %v2361_v49 }
 0x237   :  { %2370 = vst [vmem:[%s3714_s4 + $0x30] sm:$0xff] %v2362_v35 }
 0x238   :  { %2371 = vst [vmem:[%s3714_s4 + $0x38] sm:$0xff] %v2363_v43 }
 0x239   :  { %2376 = vsyncpa [#allocation4], 1 }
 0x23a   :  { %2377 = vsyncpa [#allocation6], 1 }

</bundles_post_ra>
